<compile_context>
chip_gen: v5e
topology: v5e:2x2
jax: 0.10.0
libtpu: 0.0.40
codegen_flags: <defaults>
</compile_context>

<pallas_src>
import jax
import jax.numpy as jnp
from jax import lax
from jax.experimental import pallas as pl
from jax.experimental.pallas import tpu as pltpu

LN_EPS = 1e-5  # torch.nn.LayerNorm default


def _layer_norm_f32(h, gamma, beta):
    # two-pass statistics: numerically robust, XLU reductions have slack here
    mean = jnp.mean(h, axis=-1, keepdims=True)
    c = h - mean
    var = jnp.mean(c * c, axis=-1, keepdims=True)
    return c * lax.rsqrt(var + LN_EPS) * gamma + beta


def linear_block_kernel(x_ref, w1_ref, w2_ref, p_ref, o_ref):
    # packed params: rows 0..5 = b1, gamma1, beta1, b2, gamma2, beta2 (rows 6,7 pad)
    p = p_ref[...]
    b1, g1, be1 = p[0:1, :], p[1:2, :], p[2:3, :]
    b2, g2, be2 = p[3:4, :], p[4:5, :], p[5:6, :]

    # linear_1: bf16 x bf16 -> f32 accumulate on the MXU
    h = jnp.dot(x_ref[...].astype(jnp.bfloat16), w1_ref[...],
                preferred_element_type=jnp.float32) + b1
    # layer_norm_1 (f32) + ReLU; dropout_1(p=0) is identity
    h = jnp.maximum(_layer_norm_f32(h, g1, be1), 0.0)

    # linear_2: bf16 x bf16 -> f32 accumulate on the MXU
    o = jnp.dot(h.astype(jnp.bfloat16), w2_ref[...],
                preferred_element_type=jnp.float32) + b2
    # layer_norm_2 (f32)
    o = _layer_norm_f32(o, g2, be2)
    # residual: re-read the x tile here (no long-lived f32 copy across the matmuls)
    o = o + x_ref[...].astype(jnp.float32)
    # ReLU; dropout_2(p=0) is identity
    o = jnp.maximum(o, 0.0)

    o_ref[...] = o.astype(o_ref.dtype)


def _vmem_cap_bytes():
    """Usable VMEM cap for this chip (physical minus compiler headroom)."""
    try:
        phys = int(pltpu.get_tpu_info().vmem_capacity_bytes)
    except Exception:
        phys = 64 << 20  # conservative (v7x-sized) fallback
    return max(phys - (16 << 20), 32 << 20)


def _vmem_bytes(tm, F, resident_bufs):
    """Estimated VMEM footprint, including in-kernel temporaries."""
    stream = 2 * 2 * tm * F * 4                # x tile + out tile, f32, double-buffered
    weights = resident_bufs * 2 * F * F * 2    # two resident bf16 (F, F) weights
    params = resident_bufs * 8 * F * 4         # packed (8, F) bias/LN rows
    temps = 4 * tm * F * 4 + 2 * tm * F * 2    # h/o/LN f32 temps + bf16 matmul operands
    return stream + weights + params + temps + (2 << 20)  # small slack


def _pick_tm(B, F, cap, resident_bufs):
    # Biggest sublane-aligned tile that divides B and fits the VMEM cap:
    # weights are resident so fewer, bigger steps amortize ~0.35 us/step overhead.
    for cand in (1024, 512, 256, 128, 64, 32, 16, 8):
        if cand <= B and B % cand == 0 and _vmem_bytes(cand, F, resident_bufs) <= cap:
            return cand
    return B  # full-extent block (no (8,128) divisibility requirement then)


def _make_call(B, F, tm, out_dtype, single_buffer):
    grid = (B // tm,)
    tile_spec = pl.BlockSpec((tm, F), lambda i: (i, 0))  # streamed, double-buffered

    if single_buffer:
        # Constant index_map => fetched once; Buffered(1) drops the wasted 2nd buffer.
        resident = lambda shape: pl.BlockSpec(
            shape, lambda i: (0, 0), pipeline_mode=pl.Buffered(1))
        resident_bufs = 1
    else:
        resident = lambda shape: pl.BlockSpec(shape, lambda i: (0, 0))
        resident_bufs = 2

    vmem_limit = int(min(max(_vmem_bytes(tm, F, resident_bufs), 32 << 20),
                         _vmem_cap_bytes()))

    # TODO(synk): for F >= ~2048 on v7x, switch to a K-tiled grid (weights streamed
    # as (tk, F) blocks on a trailing "arbitrary" axis + f32 accumulator scratch).
    return pl.pallas_call(
        linear_block_kernel,
        out_shape=jax.ShapeDtypeStruct((B, F), out_dtype),
        grid=grid,
        in_specs=[
            tile_spec,             # x  (streamed batch tile)
            resident((F, F)),      # w1 (bf16, resident)
            resident((F, F)),      # w2 (bf16, resident)
            resident((8, F)),      # packed b1,g1,be1,b2,g2,be2 (+2 pad rows)
        ],
        out_specs=tile_spec,
        compiler_params=pltpu.CompilerParams(
            # "parallel" lets v7x shard a multi-step batch grid across its 2 TCs;
            # for small B the tm heuristic collapses to grid=(1,) so no weight
            # duplication is paid. No-op on v5e/v6e.
            dimension_semantics=("parallel",),
            vmem_limit_bytes=vmem_limit,
        ),
    )


def linear_block(x, w1, b1, g1, be1, w2, b2, g2, be2, *, tm=None):
    """x: (B, F). w*: (F_in, F_out) (already transposed for x @ W, ideally pre-cast
    to bf16). b*/g*/be*: (F,)."""
    B, F = x.shape

    # Prefer weights pre-cast to bf16 by the caller (saves per-call HBM traffic).
    if w1.dtype != jnp.bfloat16:
        w1 = w1.astype(jnp.bfloat16)
    if w2.dtype != jnp.bfloat16:
        w2 = w2.astype(jnp.bfloat16)

    # Pack the six (F,) parameter rows into one resident (8, F) f32 block.
    zero = jnp.zeros((F,), jnp.float32)
    params = jnp.stack([b1, g1, be1, b2, g2, be2, zero, zero]).astype(jnp.float32)

    cap = _vmem_cap_bytes()
    if tm is None:
        tm = _pick_tm(B, F, cap, resident_bufs=1)
    tm = min(tm, B)
    if B % tm != 0:
        tm = B

    args = (x, w1, w2, params)
    try:
        return _make_call(B, F, tm, x.dtype, single_buffer=True)(*args)
    except Exception:
        # Fallback if pipeline_mode=pl.Buffered(1) is unsupported on this jax/Mosaic
        # version; identical kernel, default (double-buffered) resident specs.
        return _make_call(B, F, tm, x.dtype, single_buffer=False)(*args)


def variance_scaling_init(key, fan_in, fan_out, scale, dtype=jnp.float32):
    # truncated-normal variance-scaling (fan_in mode), deterministic via key
    std = jnp.sqrt(scale / fan_in)
    return (jax.random.truncated_normal(key, -2.0, 2.0, (fan_in, fan_out),
                                        dtype=dtype) * std)


if __name__ == "__main__":
    B, F = 256, 128        # batch rows, feature size ("size" in LinearBlock)
    init_scaling = 0.1

    key = jax.random.PRNGKey(0)
    kx, kw1, kb1, kw2, kb2 = jax.random.split(key, 5)

    x = jax.random.normal(kx, (B, F), dtype=jnp.float32)

    # linear weights, stored as (F_in, F_out) i.e. already transposed
    w1 = variance_scaling_init(kw1, F, F, init_scaling)
    b1 = jax.random.normal(kb1, (F,), dtype=jnp.float32) * 0.01
    w2 = variance_scaling_init(kw2, F, F, init_scaling)
    b2 = jax.random.normal(kb2, (F,), dtype=jnp.float32) * 0.01

    # LayerNorm params (torch default init: gamma=1, beta=0)
    g1 = jnp.ones((F,), jnp.float32)
    be1 = jnp.zeros((F,), jnp.float32)
    g2 = jnp.ones((F,), jnp.float32)
    be2 = jnp.zeros((F,), jnp.float32)

    # Pre-cast weights to bf16 ONCE at parameter-setup time (not per call).
    w1_bf16 = jax.block_until_ready(w1.astype(jnp.bfloat16))
    w2_bf16 = jax.block_until_ready(w2.astype(jnp.bfloat16))

    out = linear_block(x, w1_bf16, b1, g1, be1, w2_bf16, b2, g2, be2)
    out = jax.block_until_ready(out)

    # reference in plain JAX, mirroring the kernel's bf16 matmul operands
    def ref(x):
        xb = x.astype(jnp.bfloat16)
        h = jnp.dot(xb, w1_bf16, preferred_element_type=jnp.float32) + b1
        h = (h - h.mean(-1, keepdims=True)) / jnp.sqrt(
            h.var(-1, keepdims=True) + LN_EPS) * g1 + be1
        h = jnp.maximum(h, 0.0)
        o = jnp.dot(h.astype(jnp.bfloat16), w2_bf16,
                    preferred_element_type=jnp.float32) + b2
        o = (o - o.mean(-1, keepdims=True)) / jnp.sqrt(
            o.var(-1, keepdims=True) + LN_EPS) * g2 + be2
        o = o + x
        return jnp.maximum(o, 0.0)

    expected = jax.block_until_ready(ref(x))
    assert out.shape == (B, F)
    assert jnp.allclose(out, expected, atol=1e-3, rtol=1e-3), "mismatch vs reference"
    print("KERNEL_OK")
</pallas_src>

<mosaic_0001>
module attributes {stable_mosaic.version = 11 : i64} {
  func.func @linear_block_kernel(%arg0: i32, %arg1: memref<256x128xf32, #tpu.memory_space<vmem>>, %arg2: memref<128x128xbf16, #tpu.memory_space<vmem>>, %arg3: memref<128x128xbf16, #tpu.memory_space<vmem>>, %arg4: memref<8x128xf32, #tpu.memory_space<vmem>>, %arg5: memref<256x128xf32, #tpu.memory_space<vmem>>) attributes {dimension_semantics = [#tpu.dimension_semantics<parallel>], iteration_bounds = array<i64: 1>, scalar_prefetch = 0 : i64, scratch_operands = 0 : i64, tpu.core_type = #tpu.core_type<tc>, window_params = [{transform_indices = @transform_0, window_bounds = array<i64: 256, 128>}, {pipeline_mode = #tpu.pipeline_mode<synchronous>, transform_indices = @transform_1, window_bounds = array<i64: 128, 128>}, {pipeline_mode = #tpu.pipeline_mode<synchronous>, transform_indices = @transform_2, window_bounds = array<i64: 128, 128>}, {pipeline_mode = #tpu.pipeline_mode<synchronous>, transform_indices = @transform_3, window_bounds = array<i64: 8, 128>}, {transform_indices = @transform_4, window_bounds = array<i64: 256, 128>}]} {
    %c0 = arith.constant 0 : index
    %c0_0 = arith.constant 0 : index
    %0 = vector.load %arg4[%c0, %c0_0] : memref<8x128xf32, #tpu.memory_space<vmem>>, vector<8x128xf32>
    %1 = vector.extract_strided_slice %0 {offsets = [0, 0], sizes = [1, 128], strides = [1, 1]} : vector<8x128xf32> to vector<1x128xf32>
    %2 = vector.extract_strided_slice %0 {offsets = [1, 0], sizes = [1, 128], strides = [1, 1]} : vector<8x128xf32> to vector<1x128xf32>
    %3 = vector.extract_strided_slice %0 {offsets = [2, 0], sizes = [1, 128], strides = [1, 1]} : vector<8x128xf32> to vector<1x128xf32>
    %4 = vector.extract_strided_slice %0 {offsets = [3, 0], sizes = [1, 128], strides = [1, 1]} : vector<8x128xf32> to vector<1x128xf32>
    %5 = vector.extract_strided_slice %0 {offsets = [4, 0], sizes = [1, 128], strides = [1, 1]} : vector<8x128xf32> to vector<1x128xf32>
    %6 = vector.extract_strided_slice %0 {offsets = [5, 0], sizes = [1, 128], strides = [1, 1]} : vector<8x128xf32> to vector<1x128xf32>
    %c0_1 = arith.constant 0 : index
    %c0_2 = arith.constant 0 : index
    %7 = vector.load %arg1[%c0_1, %c0_2] : memref<256x128xf32, #tpu.memory_space<vmem>>, vector<256x128xf32>
    %8 = arith.truncf %7 : vector<256x128xf32> to vector<256x128xbf16>
    %c0_3 = arith.constant 0 : index
    %c0_4 = arith.constant 0 : index
    %9 = vector.load %arg2[%c0_3, %c0_4] : memref<128x128xbf16, #tpu.memory_space<vmem>>, vector<128x128xbf16>
    %cst = arith.constant dense<0.000000e+00> : vector<256x128xf32>
    %10 = tpu.matmul %8, %9, %cst {dimension_numbers = #tpu.dot_dimension_numbers<[1], [0], [0], [1], [0, 0, 1, 1], [], []>} : vector<256x128xbf16>, vector<128x128xbf16>, vector<256x128xf32> -> vector<256x128xf32>
    %11 = vector.broadcast %1 : vector<1x128xf32> to vector<256x128xf32>
    %12 = arith.addf %10, %11 : vector<256x128xf32>
    %cst_5 = arith.constant dense<0.000000e+00> : vector<256xf32>
    %13 = vector.multi_reduction <add>, %12, %cst_5 [1] : vector<256x128xf32> to vector<256xf32>
    %14 = vector.shape_cast %13 : vector<256xf32> to vector<256x1xf32>
    %cst_6 = arith.constant 1.280000e+02 : f32
    %15 = vector.broadcast %cst_6 : f32 to vector<256x1xf32>
    %16 = arith.divf %14, %15 : vector<256x1xf32>
    %17 = vector.broadcast %16 : vector<256x1xf32> to vector<256x128xf32>
    %18 = arith.subf %12, %17 : vector<256x128xf32>
    %19 = arith.mulf %18, %18 : vector<256x128xf32>
    %cst_7 = arith.constant dense<0.000000e+00> : vector<256xf32>
    %20 = vector.multi_reduction <add>, %19, %cst_7 [1] : vector<256x128xf32> to vector<256xf32>
    %21 = vector.shape_cast %20 : vector<256xf32> to vector<256x1xf32>
    %cst_8 = arith.constant 1.280000e+02 : f32
    %22 = vector.broadcast %cst_8 : f32 to vector<256x1xf32>
    %23 = arith.divf %21, %22 : vector<256x1xf32>
    %cst_9 = arith.constant 9.99999974E-6 : f32
    %24 = vector.broadcast %cst_9 : f32 to vector<256x1xf32>
    %25 = arith.addf %23, %24 : vector<256x1xf32>
    %26 = math.rsqrt %25 : vector<256x1xf32>
    %27 = vector.broadcast %26 : vector<256x1xf32> to vector<256x128xf32>
    %28 = arith.mulf %18, %27 : vector<256x128xf32>
    %29 = vector.broadcast %2 : vector<1x128xf32> to vector<256x128xf32>
    %30 = arith.mulf %28, %29 : vector<256x128xf32>
    %31 = vector.broadcast %3 : vector<1x128xf32> to vector<256x128xf32>
    %32 = arith.addf %30, %31 : vector<256x128xf32>
    %cst_10 = arith.constant 0.000000e+00 : f32
    %33 = vector.broadcast %cst_10 : f32 to vector<256x128xf32>
    %34 = arith.maximumf %32, %33 : vector<256x128xf32>
    %35 = arith.truncf %34 : vector<256x128xf32> to vector<256x128xbf16>
    %c0_11 = arith.constant 0 : index
    %c0_12 = arith.constant 0 : index
    %36 = vector.load %arg3[%c0_11, %c0_12] : memref<128x128xbf16, #tpu.memory_space<vmem>>, vector<128x128xbf16>
    %cst_13 = arith.constant dense<0.000000e+00> : vector<256x128xf32>
    %37 = tpu.matmul %35, %36, %cst_13 {dimension_numbers = #tpu.dot_dimension_numbers<[1], [0], [0], [1], [0, 0, 1, 1], [], []>} : vector<256x128xbf16>, vector<128x128xbf16>, vector<256x128xf32> -> vector<256x128xf32>
    %38 = vector.broadcast %4 : vector<1x128xf32> to vector<256x128xf32>
    %39 = arith.addf %37, %38 : vector<256x128xf32>
    %cst_14 = arith.constant dense<0.000000e+00> : vector<256xf32>
    %40 = vector.multi_reduction <add>, %39, %cst_14 [1] : vector<256x128xf32> to vector<256xf32>
    %41 = vector.shape_cast %40 : vector<256xf32> to vector<256x1xf32>
    %cst_15 = arith.constant 1.280000e+02 : f32
    %42 = vector.broadcast %cst_15 : f32 to vector<256x1xf32>
    %43 = arith.divf %41, %42 : vector<256x1xf32>
    %44 = vector.broadcast %43 : vector<256x1xf32> to vector<256x128xf32>
    %45 = arith.subf %39, %44 : vector<256x128xf32>
    %46 = arith.mulf %45, %45 : vector<256x128xf32>
    %cst_16 = arith.constant dense<0.000000e+00> : vector<256xf32>
    %47 = vector.multi_reduction <add>, %46, %cst_16 [1] : vector<256x128xf32> to vector<256xf32>
    %48 = vector.shape_cast %47 : vector<256xf32> to vector<256x1xf32>
    %cst_17 = arith.constant 1.280000e+02 : f32
    %49 = vector.broadcast %cst_17 : f32 to vector<256x1xf32>
    %50 = arith.divf %48, %49 : vector<256x1xf32>
    %cst_18 = arith.constant 9.99999974E-6 : f32
    %51 = vector.broadcast %cst_18 : f32 to vector<256x1xf32>
    %52 = arith.addf %50, %51 : vector<256x1xf32>
    %53 = math.rsqrt %52 : vector<256x1xf32>
    %54 = vector.broadcast %53 : vector<256x1xf32> to vector<256x128xf32>
    %55 = arith.mulf %45, %54 : vector<256x128xf32>
    %56 = vector.broadcast %5 : vector<1x128xf32> to vector<256x128xf32>
    %57 = arith.mulf %55, %56 : vector<256x128xf32>
    %58 = vector.broadcast %6 : vector<1x128xf32> to vector<256x128xf32>
    %59 = arith.addf %57, %58 : vector<256x128xf32>
    %c0_19 = arith.constant 0 : index
    %c0_20 = arith.constant 0 : index
    %60 = vector.load %arg1[%c0_19, %c0_20] : memref<256x128xf32, #tpu.memory_space<vmem>>, vector<256x128xf32>
    %61 = arith.addf %59, %60 : vector<256x128xf32>
    %cst_21 = arith.constant 0.000000e+00 : f32
    %62 = vector.broadcast %cst_21 : f32 to vector<256x128xf32>
    %63 = arith.maximumf %61, %62 : vector<256x128xf32>
    %c0_22 = arith.constant 0 : index
    %c0_23 = arith.constant 0 : index
    %64 = vector.load %arg5[%c0_22, %c0_23] : memref<256x128xf32, #tpu.memory_space<vmem>>, vector<256x128xf32>
    tpu.vector_store %arg5[%c0_22, %c0_23], %63 {strides = array<i32>} : memref<256x128xf32, #tpu.memory_space<vmem>>, vector<256x128xf32>,
    return
  }
  func.func @transform_0(%arg0: i32) -> (i32, i32) {
    %c0_i32 = arith.constant 0 : i32
    %c0_i32_0 = arith.constant 0 : i32
    return %arg0, %c0_i32 : i32, i32
  }
  func.func @transform_1(%arg0: i32) -> (i32, i32) {
    %c0_i32 = arith.constant 0 : i32
    %c0_i32_0 = arith.constant 0 : i32
    %c0_i32_1 = arith.constant 0 : i32
    return %c0_i32, %c0_i32_0 : i32, i32
  }
  func.func @transform_2(%arg0: i32) -> (i32, i32) {
    %c0_i32 = arith.constant 0 : i32
    %c0_i32_0 = arith.constant 0 : i32
    %c0_i32_1 = arith.constant 0 : i32
    return %c0_i32, %c0_i32_0 : i32, i32
  }
  func.func @transform_3(%arg0: i32) -> (i32, i32) {
    %c0_i32 = arith.constant 0 : i32
    %c0_i32_0 = arith.constant 0 : i32
    %c0_i32_1 = arith.constant 0 : i32
    return %c0_i32, %c0_i32_0 : i32, i32
  }
  func.func @transform_4(%arg0: i32) -> (i32, i32) {
    %c0_i32 = arith.constant 0 : i32
    %c0_i32_0 = arith.constant 0 : i32
    return %arg0, %c0_i32 : i32, i32
  }
}

module attributes {stable_mosaic.version = 11 : i64} {
  func.func @linear_block_kernel(%arg0: i32, %arg1: memref<256x128xf32, #tpu.memory_space<vmem>>, %arg2: memref<128x128xbf16, #tpu.memory_space<vmem>>, %arg3: memref<128x128xbf16, #tpu.memory_space<vmem>>, %arg4: memref<8x128xf32, #tpu.memory_space<vmem>>, %arg5: memref<256x128xf32, #tpu.memory_space<vmem>>) attributes {dimension_semantics = [#tpu.dimension_semantics<parallel>], iteration_bounds = array<i64: 1>, scalar_prefetch = 0 : i64, scratch_operands = 0 : i64, tpu.core_type = #tpu.core_type<tc>, window_params = [{transform_indices = @transform_0, window_bounds = array<i64: 256, 128>}, {pipeline_mode = #tpu.pipeline_mode<synchronous>, transform_indices = @transform_1, window_bounds = array<i64: 128, 128>}, {pipeline_mode = #tpu.pipeline_mode<synchronous>, transform_indices = @transform_2, window_bounds = array<i64: 128, 128>}, {pipeline_mode = #tpu.pipeline_mode<synchronous>, transform_indices = @transform_3, window_bounds = array<i64: 8, 128>}, {transform_indices = @transform_4, window_bounds = array<i64: 256, 128>}]} {
    %c0 = arith.constant 0 : index
    %c0_0 = arith.constant 0 : index
    %0 = vector.load %arg4[%c0, %c0_0] : memref<8x128xf32, #tpu.memory_space<vmem>>, vector<8x128xf32>
    %1 = vector.extract_strided_slice %0 {offsets = [0, 0], sizes = [1, 128], strides = [1, 1]} : vector<8x128xf32> to vector<1x128xf32>
    %2 = vector.extract_strided_slice %0 {offsets = [1, 0], sizes = [1, 128], strides = [1, 1]} : vector<8x128xf32> to vector<1x128xf32>
    %3 = vector.extract_strided_slice %0 {offsets = [2, 0], sizes = [1, 128], strides = [1, 1]} : vector<8x128xf32> to vector<1x128xf32>
    %4 = vector.extract_strided_slice %0 {offsets = [3, 0], sizes = [1, 128], strides = [1, 1]} : vector<8x128xf32> to vector<1x128xf32>
    %5 = vector.extract_strided_slice %0 {offsets = [4, 0], sizes = [1, 128], strides = [1, 1]} : vector<8x128xf32> to vector<1x128xf32>
    %6 = vector.extract_strided_slice %0 {offsets = [5, 0], sizes = [1, 128], strides = [1, 1]} : vector<8x128xf32> to vector<1x128xf32>
    %c0_1 = arith.constant 0 : index
    %c0_2 = arith.constant 0 : index
    %7 = vector.load %arg1[%c0_1, %c0_2] : memref<256x128xf32, #tpu.memory_space<vmem>>, vector<256x128xf32>
    %8 = arith.truncf %7 : vector<256x128xf32> to vector<256x128xbf16>
    %c0_3 = arith.constant 0 : index
    %c0_4 = arith.constant 0 : index
    %9 = vector.load %arg2[%c0_3, %c0_4] : memref<128x128xbf16, #tpu.memory_space<vmem>>, vector<128x128xbf16>
    %cst = arith.constant dense<0.000000e+00> : vector<256x128xf32>
    %10 = tpu.matmul %8, %9, %cst {dimension_numbers = #tpu.dot_dimension_numbers<[1], [0], [0], [1], [0, 0, 1, 1], [], []>} : vector<256x128xbf16>, vector<128x128xbf16>, vector<256x128xf32> -> vector<256x128xf32>
    %11 = vector.broadcast %1 : vector<1x128xf32> to vector<256x128xf32>
    %12 = arith.addf %10, %11 : vector<256x128xf32>
    %cst_5 = arith.constant dense<0.000000e+00> : vector<256xf32>
    %13 = vector.multi_reduction <add>, %12, %cst_5 [1] : vector<256x128xf32> to vector<256xf32>
    %14 = vector.shape_cast %13 : vector<256xf32> to vector<256x1xf32>
    %cst_6 = arith.constant 1.280000e+02 : f32
    %15 = vector.broadcast %cst_6 : f32 to vector<256x1xf32>
    %16 = arith.divf %14, %15 : vector<256x1xf32>
    %17 = vector.broadcast %16 : vector<256x1xf32> to vector<256x128xf32>
    %18 = arith.subf %12, %17 : vector<256x128xf32>
    %19 = arith.mulf %18, %18 : vector<256x128xf32>
    %cst_7 = arith.constant dense<0.000000e+00> : vector<256xf32>
    %20 = vector.multi_reduction <add>, %19, %cst_7 [1] : vector<256x128xf32> to vector<256xf32>
    %21 = vector.shape_cast %20 : vector<256xf32> to vector<256x1xf32>
    %cst_8 = arith.constant 1.280000e+02 : f32
    %22 = vector.broadcast %cst_8 : f32 to vector<256x1xf32>
    %23 = arith.divf %21, %22 : vector<256x1xf32>
    %cst_9 = arith.constant 9.99999974E-6 : f32
    %24 = vector.broadcast %cst_9 : f32 to vector<256x1xf32>
    %25 = arith.addf %23, %24 : vector<256x1xf32>
    %26 = math.rsqrt %25 : vector<256x1xf32>
    %27 = vector.broadcast %26 : vector<256x1xf32> to vector<256x128xf32>
    %28 = arith.mulf %18, %27 : vector<256x128xf32>
    %29 = vector.broadcast %2 : vector<1x128xf32> to vector<256x128xf32>
    %30 = arith.mulf %28, %29 : vector<256x128xf32>
    %31 = vector.broadcast %3 : vector<1x128xf32> to vector<256x128xf32>
    %32 = arith.addf %30, %31 : vector<256x128xf32>
    %cst_10 = arith.constant 0.000000e+00 : f32
    %33 = vector.broadcast %cst_10 : f32 to vector<256x128xf32>
    %34 = arith.maximumf %32, %33 : vector<256x128xf32>
    %35 = arith.truncf %34 : vector<256x128xf32> to vector<256x128xbf16>
    %c0_11 = arith.constant 0 : index
    %c0_12 = arith.constant 0 : index
    %36 = vector.load %arg3[%c0_11, %c0_12] : memref<128x128xbf16, #tpu.memory_space<vmem>>, vector<128x128xbf16>
    %cst_13 = arith.constant dense<0.000000e+00> : vector<256x128xf32>
    %37 = tpu.matmul %35, %36, %cst_13 {dimension_numbers = #tpu.dot_dimension_numbers<[1], [0], [0], [1], [0, 0, 1, 1], [], []>} : vector<256x128xbf16>, vector<128x128xbf16>, vector<256x128xf32> -> vector<256x128xf32>
    %38 = vector.broadcast %4 : vector<1x128xf32> to vector<256x128xf32>
    %39 = arith.addf %37, %38 : vector<256x128xf32>
    %cst_14 = arith.constant dense<0.000000e+00> : vector<256xf32>
    %40 = vector.multi_reduction <add>, %39, %cst_14 [1] : vector<256x128xf32> to vector<256xf32>
    %41 = vector.shape_cast %40 : vector<256xf32> to vector<256x1xf32>
    %cst_15 = arith.constant 1.280000e+02 : f32
    %42 = vector.broadcast %cst_15 : f32 to vector<256x1xf32>
    %43 = arith.divf %41, %42 : vector<256x1xf32>
    %44 = vector.broadcast %43 : vector<256x1xf32> to vector<256x128xf32>
    %45 = arith.subf %39, %44 : vector<256x128xf32>
    %46 = arith.mulf %45, %45 : vector<256x128xf32>
    %cst_16 = arith.constant dense<0.000000e+00> : vector<256xf32>
    %47 = vector.multi_reduction <add>, %46, %cst_16 [1] : vector<256x128xf32> to vector<256xf32>
    %48 = vector.shape_cast %47 : vector<256xf32> to vector<256x1xf32>
    %cst_17 = arith.constant 1.280000e+02 : f32
    %49 = vector.broadcast %cst_17 : f32 to vector<256x1xf32>
    %50 = arith.divf %48, %49 : vector<256x1xf32>
    %cst_18 = arith.constant 9.99999974E-6 : f32
    %51 = vector.broadcast %cst_18 : f32 to vector<256x1xf32>
    %52 = arith.addf %50, %51 : vector<256x1xf32>
    %53 = math.rsqrt %52 : vector<256x1xf32>
    %54 = vector.broadcast %53 : vector<256x1xf32> to vector<256x128xf32>
    %55 = arith.mulf %45, %54 : vector<256x128xf32>
    %56 = vector.broadcast %5 : vector<1x128xf32> to vector<256x128xf32>
    %57 = arith.mulf %55, %56 : vector<256x128xf32>
    %58 = vector.broadcast %6 : vector<1x128xf32> to vector<256x128xf32>
    %59 = arith.addf %57, %58 : vector<256x128xf32>
    %c0_19 = arith.constant 0 : index
    %c0_20 = arith.constant 0 : index
    %60 = vector.load %arg1[%c0_19, %c0_20] : memref<256x128xf32, #tpu.memory_space<vmem>>, vector<256x128xf32>
    %61 = arith.addf %59, %60 : vector<256x128xf32>
    %cst_21 = arith.constant 0.000000e+00 : f32
    %62 = vector.broadcast %cst_21 : f32 to vector<256x128xf32>
    %63 = arith.maximumf %61, %62 : vector<256x128xf32>
    %c0_22 = arith.constant 0 : index
    %c0_23 = arith.constant 0 : index
    %64 = vector.load %arg5[%c0_22, %c0_23] : memref<256x128xf32, #tpu.memory_space<vmem>>, vector<256x128xf32>
    tpu.vector_store %arg5[%c0_22, %c0_23], %63 {strides = array<i32>} : memref<256x128xf32, #tpu.memory_space<vmem>>, vector<256x128xf32>,
    return
  }
  func.func @transform_0(%arg0: i32) -> (i32, i32) {
    %c0_i32 = arith.constant 0 : i32
    %c0_i32_0 = arith.constant 0 : i32
    return %arg0, %c0_i32 : i32, i32
  }
  func.func @transform_1(%arg0: i32) -> (i32, i32) {
    %c0_i32 = arith.constant 0 : i32
    %c0_i32_0 = arith.constant 0 : i32
    %c0_i32_1 = arith.constant 0 : i32
    return %c0_i32, %c0_i32_0 : i32, i32
  }
  func.func @transform_2(%arg0: i32) -> (i32, i32) {
    %c0_i32 = arith.constant 0 : i32
    %c0_i32_0 = arith.constant 0 : i32
    %c0_i32_1 = arith.constant 0 : i32
    return %c0_i32, %c0_i32_0 : i32, i32
  }
  func.func @transform_3(%arg0: i32) -> (i32, i32) {
    %c0_i32 = arith.constant 0 : i32
    %c0_i32_0 = arith.constant 0 : i32
    %c0_i32_1 = arith.constant 0 : i32
    return %c0_i32, %c0_i32_0 : i32, i32
  }
  func.func @transform_4(%arg0: i32) -> (i32, i32) {
    %c0_i32 = arith.constant 0 : i32
    %c0_i32_0 = arith.constant 0 : i32
    return %arg0, %c0_i32 : i32, i32
  }
}

</mosaic_0001>

<bundles_post_ra>
// kernel: tpu_custom_call.1
= control target key start
LH: loop header
LB: loop body
LE: loop exit
PB: predicated region body
PF: predicated region fallthrough
CT: control target
= control target key end

     0   :  { %9 = vsyncpa [#allocation3], 0  ;;  %s4055_s0 = inlined_call_operand.hbm [shape: f32[256,128], index: 0, kind: input, shape index: {}]   ;;  %s4056_s1 = inlined_call_operand.hbm [shape: bf16[128,128], index: 1, kind: input, shape index: {}]   ;;  %s4057_s2 = inlined_call_operand.hbm [shape: bf16[128,128], index: 2, kind: input, shape index: {}]   ;;  %s4058_s3 = inlined_call_operand.hbm [shape: f32[8,128], index: 3, kind: input, shape index: {}]   ;;  %s4059_s4 = inlined_call_operand.hbm [shape: f32[256,128], index: 4, kind: output, shape index: {}]  }
   0x1   :  { %10 = vsyncpa [#allocation6], 0 }
   0x2   :  { %11 = vsyncpa [#allocation9], 0  ;;  %s30_s17 = sshll.u32 %s4056_s1, 4  ;;  %s31_s17 = int_to_ptr.hbm [resolvable:$true] %s30_s17 }
   0x3   :  { %12 = vsyncpa [#allocation4], 0  ;;  %s2417_s18 = smov [#allocation5]   ;;  %s17_s22 = sshll.u32 %s4055_s0, 4  ;;  %s18_s22 = int_to_ptr.hbm [resolvable:$true] %s17_s22 }
   0x4   :  { %s32_s19 = sshll.u32 %s2417_s18, 4  ;;  %s2418_s23 = smov 64   ;;  %s33_s19 = int_to_ptr.vmem [resolvable:$true] %s32_s19 }
   0x5   :  { %s2419_s24 = smov 4   ;;  %s2420_s25 = smov [#allocation2]  }
   0x6   :  { %38 = dma.hbm_to_vmem [thread:$0]  %s31_s17, 1024, %s33_s19, [#allocation6], %s2418_s23, %s2418_s23, %s2419_s24  }
   0x7   :  { %s19_s26 = sshll.u32 %s2420_s25, 4  ;;  %s2421_s27 = smov 128   ;;  %s20_s26 = int_to_ptr.vmem [resolvable:$true] %s19_s26 }
   0x8   :  { %s2422_s28 = smov 8   ;;  %s43_s30 = sshll.u32 %s4057_s2, 4  ;;  %s44_s30 = int_to_ptr.hbm [resolvable:$true] %s43_s30 }
   0x9   :  { %25 = dma.hbm_to_vmem [thread:$0]  %s18_s22, 4096, %s20_s26, [#allocation3], %s2421_s27, %s2421_s27, %s2422_s28  }
   0xa   :  { %s2423_s5 = smov [#allocation7]   ;;  %s57_s8 = sshll.u32 %s4058_s3, 4  ;;  %s58_s8 = int_to_ptr.hbm [resolvable:$true] %s57_s8 }
   0xb   :  { %s45_s0 = sshll.u32 %s2423_s5, 4  ;;  %s2424_s9 = smov [#allocation8]   ;;  %s46_s0 = int_to_ptr.vmem [resolvable:$true] %s45_s0 }
   0xc   :  { %51 = dma.hbm_to_vmem [thread:$0]  %s44_s30, 1024, %s46_s0, [#allocation6], %s2418_s23, %s2418_s23, %s2419_s24  }
   0xd   :  { %s59_s10 = sshll.u32 %s2424_s9, 4  ;;  %s60_s10 = int_to_ptr.vmem [resolvable:$true] %s59_s10 }
   0xe   :  { %62 = dma.hbm_to_vmem [thread:$0]  %s58_s8, 128, %s60_s10, [#allocation9]  }
   0xf   :  { %2409 = dma.done.wait [#allocation3], 4096  }
  0x10   :  { %2410 = vsyncadd [#allocation3], 4294963200 }
  0x11   :  { %2411 = dma.done.wait [#allocation6], 2048  }
  0x12   :  { %2412 = vsyncadd [#allocation6], 4294965248 }
  0x13   :  { %2413 = dma.done.wait [#allocation9], 128  }
  0x14   :  { %2414 = vsyncadd [#allocation9], 4294967168  ;;  %v2091_v0 = vld [vmem:[#allocation5 + $0x38] sm:$0xff]  ;;  %v2090_v1 = vld [vmem:[#allocation5 + $0x30] sm:$0xff]  ;;  %s2426_s2 = smov [#allocation10]   ;;  %s2005_s13 = sshll.u32 %s4059_s4, 4  ;;  %s2006_s13 = int_to_ptr.hbm [resolvable:$true] %s2005_s13 }
  0x15   :  { %193 = vmatpush.bf16.msra.mxu0 %v2091_v0  ;;  %2100 = vmatpush.bf16.msra.mxu2 %v2091_v0  ;;  %v2089_v2 = vld [vmem:[#allocation5 + $0x28] sm:$0xff]  ;;  %v2088_v3 = vld [vmem:[#allocation5 + $0x20] sm:$0xff]  ;;  %v2087_v4 = vld [vmem:[#allocation5 + $0x18] sm:$0xff]  ;;  %s2003_s3 = sshll.u32 %s2426_s2, 4  ;;  %s2004_s3 = int_to_ptr.vmem [resolvable:$true] %s2003_s3 }
  0x16   :  { %v2086_v5 = vld [vmem:[#allocation5 + $0x10] sm:$0xff]  ;;  %v2085_v6 = vld [vmem:[#allocation5 + $0x8] sm:$0xff]  ;;  %v2084_v7 = vld [vmem:[#allocation5] sm:$0xff] }
  0x17   :  { %v80_v8 = vld [vmem:[#allocation2] sm:$0xff]  ;;  %v81_v9 = vld [vmem:[#allocation2 + $0x8] sm:$0xff]  ;;  %v82_v14 = vld [vmem:[#allocation2 + $0x10] sm:$0xff] }
  0x18   :  { %v96_v10 = vld [vmem:[#allocation2 + $0x80] sm:$0xff]  ;;  %v97_v11 = vld [vmem:[#allocation2 + $0x88] sm:$0xff]  ;;  %v112_v12 = vpack.c.bf16 %v81_v9, %v80_v8  ;;  %v83_v15 = vld [vmem:[#allocation2 + $0x18] sm:$0xff] }
  0x19   :  { %194 = vmatpush.bf16.msra.mxu0 %v2090_v1  ;;  %2101 = vmatpush.bf16.msra.mxu2 %v2090_v1  ;;  %v120_v13 = vpack.c.bf16 %v97_v11, %v96_v10  ;;  %v98_v16 = vld [vmem:[#allocation2 + $0x90] sm:$0xff]  ;;  %v99_v17 = vld [vmem:[#allocation2 + $0x98] sm:$0xff]  ;;  %v113_v18 = vpack.c.bf16 %v83_v15, %v82_v14  ;;  %v84_v20 = vld [vmem:[#allocation2 + $0x20] sm:$0xff] }
  0x1a   :  { %v121_v19 = vpack.c.bf16 %v99_v17, %v98_v16  ;;  %v85_v21 = vld [vmem:[#allocation2 + $0x28] sm:$0xff]  ;;  %v100_v22 = vld [vmem:[#allocation2 + $0xa0] sm:$0xff]  ;;  %v86_v26 = vld [vmem:[#allocation2 + $0x30] sm:$0xff] }
  0x1b   :  { %v101_v23 = vld [vmem:[#allocation2 + $0xa8] sm:$0xff]  ;;  %v114_v24 = vpack.c.bf16 %v85_v21, %v84_v20  ;;  %v87_v27 = vld [vmem:[#allocation2 + $0x38] sm:$0xff]  ;;  %v102_v28 = vld [vmem:[#allocation2 + $0xb0] sm:$0xff] }
  0x1c   :  { %v122_v25 = vpack.c.bf16 %v101_v23, %v100_v22  ;;  %v103_v29 = vld [vmem:[#allocation2 + $0xb8] sm:$0xff]  ;;  %v115_v30 = vpack.c.bf16 %v87_v27, %v86_v26  ;;  %v88_v32 = vld [vmem:[#allocation2 + $0x40] sm:$0xff]  ;;  %v89_v33 = vld [vmem:[#allocation2 + $0x48] sm:$0xff] }
  0x1d   :  { %195 = vmatpush.bf16.msra.mxu0 %v2089_v2  ;;  %2102 = vmatpush.bf16.msra.mxu2 %v2089_v2  ;;  %v123_v31 = vpack.c.bf16 %v103_v29, %v102_v28  ;;  %v104_v34 = vld [vmem:[#allocation2 + $0xc0] sm:$0xff]  ;;  %v105_v35 = vld [vmem:[#allocation2 + $0xc8] sm:$0xff]  ;;  %v116_v36 = vpack.c.bf16 %v89_v33, %v88_v32  ;;  %v106_v38 = vld [vmem:[#allocation2 + $0xd0] sm:$0xff] }
  0x1e   :  { %v124_v37 = vpack.c.bf16 %v105_v35, %v104_v34  ;;  %v107_v39 = vld [vmem:[#allocation2 + $0xd8] sm:$0xff]  ;;  %v90_v41 = vld [vmem:[#allocation2 + $0x50] sm:$0xff]  ;;  %v2467_v44 = vld [vmem:[#allocation8] sm:$0xff] }
  0x1f   :  { %v125_v40 = vpack.c.bf16 %v107_v39, %v106_v38  ;;  %v91_v42 = vld [vmem:[#allocation2 + $0x58] sm:$0xff]  ;;  %v108_v45 = vld [vmem:[#allocation2 + $0xe0] sm:$0xff]  ;;  %v109_v46 = vld [vmem:[#allocation2 + $0xe8] sm:$0xff]  ;;  %v2470_v48 = vperm.slane %v2467_v44, 0 }
  0x20   :  { %v117_v43 = vpack.c.bf16 %v91_v42, %v90_v41  ;;  %v126_v47 = vpack.c.bf16 %v109_v46, %v108_v45  ;;  %v92_v58 = vld [vmem:[#allocation2 + $0x60] sm:$0xff]  ;;  %v93_v59 = vld [vmem:[#allocation2 + $0x68] sm:$0xff]  ;;  %v110_v61 = vld [vmem:[#allocation2 + $0xf0] sm:$0xff] }
  0x21   :  { %196 = vmatpush.bf16.msra.mxu0 %v2088_v3  ;;  %2103 = vmatpush.bf16.msra.mxu2 %v2088_v3  ;;  %v118_v60 = vpack.c.bf16 %v93_v59, %v92_v58  ;;  %v111_v62 = vld [vmem:[#allocation2 + $0xf8] sm:$0xff] }
  0x22   :  { %v127_v63 = vpack.c.bf16 %v111_v62, %v110_v61 }
  0x25   :  { %197 = vmatpush.bf16.msra.mxu0 %v2087_v4  ;;  %2104 = vmatpush.bf16.msra.mxu2 %v2087_v4 }
  0x29   :  { %198 = vmatpush.bf16.msra.mxu0 %v2086_v5  ;;  %2105 = vmatpush.bf16.msra.mxu2 %v2086_v5 }
  0x2d   :  { %199 = vmatpush.bf16.msra.mxu0 %v2085_v6  ;;  %2106 = vmatpush.bf16.msra.mxu2 %v2085_v6 }
  0x31   :  { %200 = vmatpush.bf16.msra.mxu0 %v2084_v7  ;;  %2107 = vmatpush.bf16.msra.mxu2 %v2084_v7 }
  0x34   :  { %201 = vmatmul.bf16.vlgmr.msra.gmra.mxu0 %v112_v12  ;;  %241 = vmatmul.bf16.vlgmr.msra.gmra.mxu2 %v120_v13  ;;  %v94_v12 = vld [vmem:[#allocation2 + $0x70] sm:$0xff]  ;;  %v95_v13 = vld [vmem:[#allocation2 + $0x78] sm:$0xff] }
  0x35   :  { %v119_v14 = vpack.c.bf16 %v95_v13, %v94_v12 }
  0x44   :  { %206 = vmatmul.bf16.gmra.mxu0 %v113_v18  ;;  %246 = vmatmul.bf16.gmra.mxu2 %v121_v19 }
  0x54   :  { %211 = vmatmul.bf16.gmra.mxu0 %v114_v24  ;;  %251 = vmatmul.bf16.gmra.mxu2 %v122_v25 }
  0x64   :  { %216 = vmatmul.bf16.gmra.mxu0 %v115_v30  ;;  %256 = vmatmul.bf16.gmra.mxu2 %v123_v31 }
  0x74   :  { %221 = vmatmul.bf16.gmra.mxu0 %v116_v36  ;;  %261 = vmatmul.bf16.gmra.mxu2 %v124_v37  ;;  %v2425_v36 = vmov 128.0  }
  0x75   :  { %2126 = vrcp.f32 %v2425_v36 }
  0x7b   :  { %v2127_v37 = vpop.eup %2126 }
  0x7c   :  { %v347_v38 = vmul.f32 128.0, %v2127_v37  ;;  %vm351_vm0 = vweird.f32 %v2127_v37 }
  0x7e   :  { %v348_v39 = vsub.f32 1.0, %v347_v38 }
  0x84   :  { %266 = vmatmul.bf16.gmra.mxu2 %v125_v40  ;;  %226 = vmatmul.bf16.gmra.mxu0 %v117_v43  ;;  %v349_v40 = vmul.f32 %v2127_v37, %v348_v39 }
  0x86   :  { %v350_v41 = vadd.f32 %v2127_v37, %v349_v40 }
  0x88   :  { %v2556_v42 = vsel %vm351_vm0, %v2127_v37, %v350_v41 }
  0x94   :  { %271 = vmatmul.bf16.gmra.mxu2 %v126_v47  ;;  %231 = vmatmul.bf16.gmra.mxu0 %v118_v60 }
  0xa4   :  { %276 = vmatmul.bf16.gmra.mxu2 %v127_v63  ;;  %236 = vmatmul.bf16.gmra.mxu0 %v119_v14 }
  0xb1   :  { %v202_v49 = vpop.f32.mrf.mxu0 }
  0xb2   :  { %v2473_v50 = vadd.f32 %v202_v49, %v2470_v48 }
  0xb4   :  { %282 = vadd.xlane.f32.xlu1 %v2473_v50 }
  0xb7   :  { %v242_v51 = vpop.f32.mrf.mxu2 }
  0xb8   :  { %v2477_v52 = vadd.f32 %v242_v51, %v2470_v48 }
  0xb9   :  { %v204_v53 = vpop.f32.mrf.mxu0 }
  0xba   :  { %v2480_v54 = vadd.f32 %v204_v53, %v2470_v48  ;;  %314 = vadd.xlane.f32.xlu0 %v2477_v52 }
  0xbc   :  { %284 = vadd.xlane.f32.xlu1 %v2480_v54 }
  0xbf   :  { %v244_v55 = vpop.f32.mrf.mxu2 }
  0xc0   :  { %v2485_v56 = vadd.f32 %v244_v55, %v2470_v48 }
  0xc1   :  { %v207_v57 = vpop.f32.mrf.mxu0 }
  0xc2   :  { %316 = vadd.xlane.f32.xlu0 %v2485_v56  ;;  %v2489_v0 = vadd.f32 %v207_v57, %v2470_v48 }
  0xc7   :  { %v247_v1 = vpop.f32.mrf.mxu2 }
  0xc8   :  { %v2492_v2 = vadd.f32 %v247_v1, %v2470_v48 }
  0xc9   :  { %v209_v3 = vpop.f32.mrf.mxu0 }
  0xca   :  { %v2495_v4 = vadd.f32 %v209_v3, %v2470_v48  ;;  %318 = vadd.xlane.f32.xlu2 %v2492_v2  ;;  %286 = vadd.xlane.f32.xlu0 %v2489_v0 }
  0xcc   :  { %288 = vadd.xlane.f32.xlu1 %v2495_v4 }
  0xcf   :  { %v249_v5 = vpop.f32.mrf.mxu2 }
  0xd0   :  { %v2501_v6 = vadd.f32 %v249_v5, %v2470_v48 }
  0xd1   :  { %v212_v7 = vpop.f32.mrf.mxu0 }
  0xd2   :  { %v2504_v8 = vadd.f32 %v212_v7, %v2470_v48  ;;  %320 = vadd.xlane.f32.xlu2 %v2501_v6 }
  0xd4   :  { %290 = vadd.xlane.f32.xlu1 %v2504_v8 }
  0xd7   :  { %v252_v9 = vpop.f32.mrf.mxu2 }
  0xd8   :  { %v2509_v10 = vadd.f32 %v252_v9, %v2470_v48 }
  0xd9   :  { %v214_v11 = vpop.f32.mrf.mxu0 }
  0xda   :  { %322 = vadd.xlane.f32.xlu2 %v2509_v10  ;;  %v2513_v16 = vadd.f32 %v214_v11, %v2470_v48 }
  0xdf   :  { %v254_v15 = vpop.f32.mrf.mxu2 }
  0xe0   :  { %v2516_v17 = vadd.f32 %v254_v15, %v2470_v48 }
  0xe1   :  { %v217_v18 = vpop.f32.mrf.mxu0 }
  0xe2   :  { %292 = vadd.xlane.f32.xlu2 %v2513_v16  ;;  %324 = vadd.xlane.f32.xlu0 %v2516_v17  ;;  %v2521_v19 = vadd.f32 %v217_v18, %v2470_v48 }
  0xe7   :  { %v257_v20 = vpop.f32.mrf.mxu2 }
  0xe8   :  { %v2524_v21 = vadd.f32 %v257_v20, %v2470_v48 }
  0xe9   :  { %v219_v22 = vpop.f32.mrf.mxu0 }
  0xea   :  { %v2527_v23 = vadd.f32 %v219_v22, %v2470_v48  ;;  %326 = vadd.xlane.f32.xlu2 %v2524_v21  ;;  %294 = vadd.xlane.f32.xlu0 %v2521_v19 }
  0xec   :  { %296 = vadd.xlane.f32.xlu1 %v2527_v23 }
  0xef   :  { %v259_v24 = vpop.f32.mrf.mxu2 }
  0xf0   :  { %v2533_v25 = vadd.f32 %v259_v24, %v2470_v48 }
  0xf1   :  { %v222_v26 = vpop.f32.mrf.mxu0 }
  0xf2   :  { %v2536_v27 = vadd.f32 %v222_v26, %v2470_v48  ;;  %328 = vadd.xlane.f32.xlu0 %v2533_v25 }
  0xf4   :  { %298 = vadd.xlane.f32.xlu2 %v2536_v27 }
  0xf7   :  { %v262_v28 = vpop.f32.mrf.mxu2 }
  0xf8   :  { %v2541_v29 = vadd.f32 %v262_v28, %v2470_v48 }
  0xf9   :  { %v224_v30 = vpop.f32.mrf.mxu0 }
  0xfa   :  { %v2544_v31 = vadd.f32 %v224_v30, %v2470_v48  ;;  %330 = vadd.xlane.f32.xlu1 %v2541_v29 }
  0xfc   :  { %300 = vadd.xlane.f32.xlu0 %v2544_v31 }
  0xff   :  { %v264_v32 = vpop.f32.mrf.mxu2 }
 0x100   :  { %v2549_v33 = vadd.f32 %v264_v32, %v2470_v48 }
 0x101   :  { %v227_v51 = vpop.f32.mrf.mxu0 }
 0x102   :  { %332 = vadd.xlane.f32.xlu2 %v2549_v33  ;;  %v2608_v26 = vadd.f32 %v227_v51, %v2470_v48 }
 0x107   :  { %v267_v34 = vpop.f32.mrf.mxu2 }
 0x108   :  { %v2553_v35 = vadd.f32 %v267_v34, %v2470_v48 }
 0x109   :  { %v229_v63 = vpop.f32.mrf.mxu0 }
 0x10a   :  { %334 = vadd.xlane.f32.xlu0 %v2553_v35  ;;  %v2581_v1 = vadd.f32 %v229_v63, %v2470_v48 }
 0x10f   :  { %v269_v11 = vpop.f32.mrf.mxu2 }
 0x110   :  { %v2595_v14 = vadd.f32 %v269_v11, %v2470_v48 }
 0x117   :  { %v272_v38 = vpop.f32.mrf.mxu2 }
 0x127   :  { %v283_v43 = vpop.xlane.xlu1 %282 }
 0x128   :  { %v353_v45 = vmul.f32 %v2556_v42, %v283_v43 }
 0x12a   :  { %v2560_v46 = vsub.f32 %v2473_v50, %v353_v45 }
 0x12c   :  { %v417_v47 = vmul.f32 %v2560_v46, %v2560_v46 }
 0x12d   :  { %v315_v49 = vpop.xlane.xlu0 %314 }
 0x12e   :  { %v369_v53 = vmul.f32 %v2556_v42, %v315_v49  ;;  %449 = vadd.xlane.f32.xlu1 %v417_v47 }
 0x12f   :  { %v285_v55 = vpop.xlane.xlu1 %284 }
 0x130   :  { %v2566_v57 = vsub.f32 %v2477_v52, %v369_v53  ;;  %v354_v58 = vmul.f32 %v2556_v42, %v285_v55  ;;  %v274_v53 = vpop.f32.mrf.mxu2 }
 0x132   :  { %v2570_v59 = vsub.f32 %v2480_v54, %v354_v58  ;;  %v433_v50 = vmul.f32 %v2566_v57, %v2566_v57 }
 0x134   :  { %481 = vadd.xlane.f32.xlu0 %v433_v50  ;;  %v418_v60 = vmul.f32 %v2570_v59, %v2570_v59  ;;  %v2647_v50 = vadd.f32 %v274_v53, %v2470_v48 }
 0x135   :  { %v317_v61 = vpop.xlane.xlu0 %316 }
 0x136   :  { %v370_v62 = vmul.f32 %v2556_v42, %v317_v61  ;;  %451 = vadd.xlane.f32.xlu2 %v418_v60  ;;  %v2652_v61 = vadd.f32 %v272_v38, %v2470_v48 }
 0x138   :  { %v2578_v52 = vsub.f32 %v2485_v56, %v370_v62  ;;  %v277_v63 = vpop.f32.mrf.mxu2 }
 0x13a   :  { %v434_v54 = vmul.f32 %v2578_v52, %v2578_v52 }
 0x13c   :  { %483 = vadd.xlane.f32.xlu1 %v434_v54  ;;  %v232_v54 = vpop.f32.mrf.mxu0 }
 0x13d   :  { %v319_v3 = vpop.xlane.xlu2 %318  ;;  %v287_v5 = vpop.xlane.xlu0 %286 }
 0x13e   :  { %v371_v7 = vmul.f32 %v2556_v42, %v319_v3  ;;  %v355_v9 = vmul.f32 %v2556_v42, %v287_v5  ;;  %304 = vadd.xlane.f32.xlu2 %v2581_v1 }
 0x13f   :  { %v289_v12 = vpop.xlane.xlu1 %288 }
 0x140   :  { %v2589_v56 = vsub.f32 %v2492_v2, %v371_v7  ;;  %v2592_v13 = vsub.f32 %v2489_v0, %v355_v9  ;;  %v356_v28 = vmul.f32 %v2556_v42, %v289_v12  ;;  %v2662_v9 = vadd.f32 %v232_v54, %v2470_v48  ;;  %v2098_v54 = vld [vmem:[#allocation7 + $0x30] sm:$0xff] }
 0x142   :  { %v419_v15 = vmul.f32 %v2592_v13, %v2592_v13  ;;  %v435_v18 = vmul.f32 %v2589_v56, %v2589_v56  ;;  %v2620_v36 = vsub.f32 %v2495_v4, %v356_v28 }
 0x144   :  { %453 = vadd.xlane.f32.xlu0 %v419_v15  ;;  %336 = vadd.xlane.f32.xlu1 %v2595_v14 }
 0x145   :  { %v321_v20 = vpop.xlane.xlu2 %320 }
 0x146   :  { %v372_v22 = vmul.f32 %v2556_v42, %v321_v20  ;;  %485 = vadd.xlane.f32.xlu2 %v435_v18  ;;  %v279_v20 = vpop.f32.mrf.mxu2 }
 0x147   :  { %v291_v2 = vpop.xlane.xlu1 %290 }
 0x148   :  { %v2604_v0 = vsub.f32 %v2501_v6, %v372_v22  ;;  %v357_v24 = vmul.f32 %v2556_v42, %v291_v2  ;;  %v234_v2 = vpop.f32.mrf.mxu0 }
 0x14a   :  { %v2612_v30 = vsub.f32 %v2504_v8, %v357_v24  ;;  %v436_v32 = vmul.f32 %v2604_v0, %v2604_v0  ;;  %v420_v8 = vmul.f32 %v2620_v36, %v2620_v36  ;;  %v2677_v24 = vadd.f32 %v279_v20, %v2470_v48  ;;  %v2092_v20 = vld [vmem:[#allocation7] sm:$0xff] }
 0x14c   :  { %487 = vadd.xlane.f32.xlu0 %v436_v32  ;;  %302 = vadd.xlane.f32.xlu1 %v2608_v26  ;;  %v421_v6 = vmul.f32 %v2612_v30, %v2612_v30  ;;  %v2681_v32 = vadd.f32 %v234_v2, %v2470_v48 }
 0x14d   :  { %v323_v34 = vpop.xlane.xlu2 %322 }
 0x14e   :  { %457 = vadd.xlane.f32.xlu2 %v421_v6  ;;  %v373_v37 = vmul.f32 %v2556_v42, %v323_v34 }
 0x150   :  { %v2626_v41 = vsub.f32 %v2509_v10, %v373_v37 }
 0x152   :  { %v437_v51 = vmul.f32 %v2626_v41, %v2626_v41 }
 0x154   :  { %455 = vadd.xlane.f32.xlu1 %v420_v8 }
 0x155   :  { %v293_v39 = vpop.xlane.xlu2 %292  ;;  %v325_v40 = vpop.xlane.xlu0 %324 }
 0x156   :  { %v358_v43 = vmul.f32 %v2556_v42, %v293_v39  ;;  %v374_v45 = vmul.f32 %v2556_v42, %v325_v40  ;;  %v2695_v39 = vadd.f32 %v277_v63, %v2470_v48  ;;  %v2099_v63 = vld [vmem:[#allocation7 + $0x38] sm:$0xff] }
 0x157   :  { %1108 = vmatpush.bf16.msra.mxu1 %v2099_v63  ;;  %2108 = vmatpush.bf16.msra.mxu3 %v2099_v63 }
 0x158   :  { %v2631_v4 = vsub.f32 %v2513_v16, %v358_v43  ;;  %v2634_v47 = vsub.f32 %v2516_v17, %v374_v45 }
 0x15a   :  { %v422_v49 = vmul.f32 %v2631_v4, %v2631_v4  ;;  %v438_v10 = vmul.f32 %v2634_v47, %v2634_v47 }
 0x15b   :  { %1109 = vmatpush.bf16.msra.mxu1 %v2098_v54  ;;  %2109 = vmatpush.bf16.msra.mxu3 %v2098_v54 }
 0x15c   :  { %459 = vadd.xlane.f32.xlu0 %v422_v49  ;;  %489 = vadd.xlane.f32.xlu1 %v437_v51 }
 0x15d   :  { %491 = vadd.xlane.f32.xlu2 %v438_v10  ;;  %v295_v55 = vpop.xlane.xlu0 %294  ;;  %v327_v5 = vpop.xlane.xlu2 %326 }
 0x15e   :  { %v359_v16 = vmul.f32 %v2556_v42, %v295_v55  ;;  %v375_v12 = vmul.f32 %v2556_v42, %v327_v5 }
 0x15f   :  { %v297_v17 = vpop.xlane.xlu1 %296 }
 0x160   :  { %v2644_v58 = vsub.f32 %v2521_v19, %v359_v16  ;;  %v360_v62 = vmul.f32 %v2556_v42, %v297_v17 }
 0x162   :  { %v423_v60 = vmul.f32 %v2644_v58, %v2644_v58  ;;  %v2659_v7 = vsub.f32 %v2527_v23, %v360_v62  ;;  %v2674_v23 = vsub.f32 %v2524_v21, %v375_v12 }
 0x164   :  { %340 = vadd.xlane.f32.xlu0 %v2647_v50  ;;  %461 = vadd.xlane.f32.xlu1 %v423_v60  ;;  %v424_v18 = vmul.f32 %v2659_v7, %v2659_v7  ;;  %v439_v6 = vmul.f32 %v2674_v23, %v2674_v23 }
 0x165   :  { %338 = vadd.xlane.f32.xlu2 %v2652_v61  ;;  %v329_v19 = vpop.xlane.xlu0 %328 }
 0x166   :  { %v376_v3 = vmul.f32 %v2556_v42, %v329_v19  ;;  %v2097_v19 = vld [vmem:[#allocation7 + $0x28] sm:$0xff] }
 0x167   :  { %v299_v22 = vpop.xlane.xlu2 %298  ;;  %1110 = vmatpush.bf16.msra.mxu1 %v2097_v19  ;;  %2110 = vmatpush.bf16.msra.mxu3 %v2097_v19 }
 0x168   :  { %v2665_v11 = vsub.f32 %v2533_v25, %v376_v3  ;;  %v361_v28 = vmul.f32 %v2556_v42, %v299_v22  ;;  %v2094_v3 = vld [vmem:[#allocation7 + $0x10] sm:$0xff] }
 0x16a   :  { %v440_v15 = vmul.f32 %v2665_v11, %v2665_v11  ;;  %v2689_v21 = vsub.f32 %v2536_v27, %v361_v28  ;;  %v237_v27 = vpop.f32.mrf.mxu0 }
 0x16b   :  { %v2711_v53 = vadd.f32 %v237_v27, %v2470_v48 }
 0x16c   :  { %306 = vadd.xlane.f32.xlu0 %v2662_v9  ;;  %495 = vadd.xlane.f32.xlu1 %v440_v15  ;;  %v425_v45 = vmul.f32 %v2689_v21, %v2689_v21  ;;  %v2093_v15 = vld [vmem:[#allocation7 + $0x8] sm:$0xff] }
 0x16d   :  { %463 = vadd.xlane.f32.xlu2 %v424_v18  ;;  %v331_v25 = vpop.xlane.xlu1 %330 }
 0x16e   :  { %v377_v34 = vmul.f32 %v2556_v42, %v331_v25 }
 0x16f   :  { %v301_v38 = vpop.xlane.xlu0 %300 }
 0x170   :  { %v2692_v37 = vsub.f32 %v2541_v29, %v377_v34  ;;  %v362_v40 = vmul.f32 %v2556_v42, %v301_v38 }
 0x172   :  { %v441_v49 = vmul.f32 %v2692_v37, %v2692_v37  ;;  %v2705_v29 = vsub.f32 %v2544_v31, %v362_v40 }
 0x174   :  { %493 = vadd.xlane.f32.xlu0 %v439_v6  ;;  %308 = vadd.xlane.f32.xlu1 %v2681_v32  ;;  %v426_v17 = vmul.f32 %v2705_v29, %v2705_v29 }
 0x175   :  { %344 = vadd.xlane.f32.xlu2 %v2677_v24  ;;  %v333_v8 = vpop.xlane.xlu2 %332 }
 0x176   :  { %v378_v43 = vmul.f32 %v2556_v42, %v333_v8 }
 0x178   :  { %v2708_v51 = vsub.f32 %v2549_v33, %v378_v43  ;;  %v239_v33 = vpop.f32.mrf.mxu0 }
 0x179   :  { %v2723_v60 = vadd.f32 %v239_v33, %v2470_v48  ;;  %v2095_v48 = vld [vmem:[#allocation7 + $0x18] sm:$0xff] }
 0x17a   :  { %v442_v16 = vmul.f32 %v2708_v51, %v2708_v51 }
 0x17c   :  { %465 = vadd.xlane.f32.xlu0 %v425_v45  ;;  %342 = vadd.xlane.f32.xlu1 %v2695_v39 }
 0x17d   :  { %497 = vadd.xlane.f32.xlu2 %v441_v49  ;;  %v335_v10 = vpop.xlane.xlu0 %334 }
 0x17e   :  { %v379_v55 = vmul.f32 %v2556_v42, %v335_v10 }
 0x180   :  { %v2720_v31 = vsub.f32 %v2553_v35, %v379_v55  ;;  %v2096_v35 = vld [vmem:[#allocation7 + $0x20] sm:$0xff] }
 0x181   :  { %1111 = vmatpush.bf16.msra.mxu1 %v2096_v35  ;;  %2111 = vmatpush.bf16.msra.mxu3 %v2096_v35 }
 0x182   :  { %v443_v62 = vmul.f32 %v2720_v31, %v2720_v31 }
 0x184   :  { %499 = vadd.xlane.f32.xlu0 %v442_v16  ;;  %467 = vadd.xlane.f32.xlu1 %v426_v17 }
 0x185   :  { %310 = vadd.xlane.f32.xlu2 %v2711_v53  ;;  %1112 = vmatpush.bf16.msra.mxu1 %v2095_v48 }
 0x186   :  { %2112 = vmatpush.bf16.msra.mxu3 %v2095_v48 }
 0x189   :  { %1113 = vmatpush.bf16.msra.mxu1 %v2094_v3 }
 0x18a   :  { %2113 = vmatpush.bf16.msra.mxu3 %v2094_v3 }
 0x18c   :  { %312 = vadd.xlane.f32.xlu0 %v2723_v60  ;;  %501 = vadd.xlane.f32.xlu1 %v443_v62 }
 0x18d   :  { %1114 = vmatpush.bf16.msra.mxu1 %v2093_v15 }
 0x18e   :  { %2114 = vmatpush.bf16.msra.mxu3 %v2093_v15 }
 0x191   :  { %1115 = vmatpush.bf16.msra.mxu1 %v2092_v20 }
 0x192   :  { %2115 = vmatpush.bf16.msra.mxu3 %v2092_v20 }
 0x1a1   :  { %v450_v5 = vpop.xlane.xlu1 %449 }
 0x1a2   :  { %v513_v12 = vmul.f32 %v450_v5, %v2556_v42 }
 0x1a4   :  { %v545_v18 = vadd.f32 1e-05, %v513_v12 }
 0x1a6   :  { %2128 = vrsqrt.f32 %v545_v18  ;;  %vm583_vm2 = vweird.f32 %v545_v18 }
 0x1a7   :  { %v482_v22 = vpop.xlane.xlu0 %481 }
 0x1a8   :  { %v529_v2 = vmul.f32 %v482_v22, %v2556_v42 }
 0x1a9   :  { %v452_v25 = vpop.xlane.xlu2 %451 }
 0x1aa   :  { %v561_v28 = vadd.f32 1e-05, %v529_v2  ;;  %v514_v6 = vmul.f32 %v452_v25, %v2556_v42 }
 0x1ac   :  { %v2129_v34 = vpop.eup %2128  ;;  %2130 = vrsqrt.f32 %v561_v28  ;;  %v546_v38 = vadd.f32 1e-05, %v514_v6  ;;  %vm743_vm4 = vweird.f32 %v561_v28 }
 0x1ad   :  { %v578_v8 = vmul.f32 %v2129_v34, %v545_v18  ;;  %vm584_vm1 = vweird.f32 %v2129_v34  ;;  %v2750_v18 = vperm.slane %v2467_v44, 1 }
 0x1ae   :  { %2132 = vrsqrt.f32 %v546_v38  ;;  %vm2741_vm3 = vmor %vm583_vm2, %vm584_vm1  ;;  %vm593_vm8 = vweird.f32 %v546_v38 }
 0x1af   :  { %v579_v40 = vmul.f32 %v2129_v34, %v578_v8  ;;  %v484_v43 = vpop.xlane.xlu1 %483 }
 0x1b0   :  { %v530_v45 = vmul.f32 %v484_v43, %v2556_v42 }
 0x1b1   :  { %v580_v49 = vmul.f32 0.5, %v579_v40  ;;  %v305_v27 = vpop.xlane.xlu2 %304 }
 0x1b2   :  { %v2131_v10 = vpop.eup %2130  ;;  %v2732_v55 = vadd.f32 1e-05, %v530_v45  ;;  %v364_v16 = vmul.f32 %v2556_v42, %v305_v27 }
 0x1b3   :  { %v581_v17 = vsub.f32 1.5, %v580_v49  ;;  %v738_v33 = vmul.f32 %v2131_v10, %v561_v28  ;;  %vm744_vm5 = vweird.f32 %v2131_v10 }
 0x1b4   :  { %v2133_v62 = vpop.eup %2132  ;;  %2134 = vrsqrt.f32 %v2732_v55  ;;  %v2737_v63 = vsub.f32 %v2581_v1, %v364_v16  ;;  %vm2760_vm7 = vmor %vm743_vm4, %vm744_vm5  ;;  %vm753_vm11 = vweird.f32 %v2732_v55 }
 0x1b5   :  { %v582_v54 = vmul.f32 %v2129_v34, %v581_v17  ;;  %v739_v19 = vmul.f32 %v2131_v10, %v738_v33  ;;  %v588_v35 = vmul.f32 %v2133_v62, %v546_v38  ;;  %vm594_vm6 = vweird.f32 %v2133_v62 }
 0x1b6   :  { %v428_v48 = vmul.f32 %v2737_v63, %v2737_v63  ;;  %vm595_vm9 = vmor %vm593_vm8, %vm594_vm6 }
 0x1b7   :  { %v740_v5 = vmul.f32 0.5, %v739_v19  ;;  %v589_v12 = vmul.f32 %v2133_v62, %v588_v35  ;;  %v454_v15 = vpop.xlane.xlu0 %453  ;;  %v337_v20 = vpop.xlane.xlu1 %336  ;;  %v586_v22 = vsel %vm2741_vm3, %v2129_v34, %v582_v54 }
 0x1b8   :  { %v515_v1 = vmul.f32 %v454_v15, %v2556_v42  ;;  %v380_v2 = vmul.f32 %v2556_v42, %v337_v20  ;;  %471 = vadd.xlane.f32.xlu1 %v428_v48  ;;  %v897_v17 = vmul.f32 %v586_v22, %v2560_v46  ;;  %v2775_v15 = vperm.slane %v2467_v44, 2 }
 0x1b9   :  { %v741_v25 = vsub.f32 1.5, %v740_v5  ;;  %v590_v6 = vmul.f32 0.5, %v589_v12  ;;  %v486_v8 = vpop.xlane.xlu2 %485 }
 0x1ba   :  { %v2135_v40 = vpop.eup %2134  ;;  %v2752_v43 = vadd.f32 1e-05, %v515_v1  ;;  %v2755_v45 = vsub.f32 %v2595_v14, %v380_v2  ;;  %v531_v34 = vmul.f32 %v486_v8, %v2556_v42  ;;  %v930_v12 = vmul.f32 %v2750_v18, %v897_v17 }
 0x1bb   :  { %v742_v49 = vmul.f32 %v2131_v10, %v741_v25  ;;  %v591_v27 = vsub.f32 1.5, %v590_v6  ;;  %v748_v16 = vmul.f32 %v2135_v40, %v2732_v55  ;;  %vm754_vm10 = vweird.f32 %v2135_v40 }
 0x1bc   :  { %2136 = vrsqrt.f32 %v2752_v43  ;;  %v2765_v33 = vadd.f32 1e-05, %v531_v34  ;;  %v444_v14 = vmul.f32 %v2755_v45, %v2755_v45  ;;  %vm755_vm12 = vmor %vm753_vm11, %vm754_vm10  ;;  %vm603_vm0 = vweird.f32 %v2752_v43 }
 0x1bd   :  { %v746_v54 = vsel %vm2760_vm7, %v2131_v10, %v742_v49  ;;  %v592_v19 = vmul.f32 %v2133_v62, %v591_v27  ;;  %v749_v35 = vmul.f32 %v2135_v40, %v748_v16 }
 0x1be   :  { %2138 = vrsqrt.f32 %v2765_v33  ;;  %503 = vadd.xlane.f32.xlu2 %v444_v14  ;;  %v913_v22 = vmul.f32 %v746_v54, %v2566_v57  ;;  %vm763_vm15 = vweird.f32 %v2765_v33 }
 0x1bf   :  { %v596_v46 = vsel %vm595_vm9, %v2133_v62, %v592_v19  ;;  %v750_v48 = vmul.f32 0.5, %v749_v35  ;;  %v488_v3 = vpop.xlane.xlu0 %487  ;;  %v303_v5 = vpop.xlane.xlu1 %302 }
 0x1c0   :  { %v532_v20 = vmul.f32 %v488_v3, %v2556_v42  ;;  %v363_v10 = vmul.f32 %v2556_v42, %v303_v5  ;;  %v898_v38 = vmul.f32 %v596_v46, %v2570_v59  ;;  %v963_v59 = vadd.f32 %v2775_v15, %v930_v12 }
 0x1c1   :  { %v751_v1 = vsub.f32 1.5, %v750_v48  ;;  %v458_v2 = vpop.xlane.xlu2 %457  ;;  %v946_v16 = vmul.f32 %v2750_v18, %v913_v22 }
 0x1c2   :  { %v2781_v62 = vpop.eup %2136  ;;  %v2783_v25 = vadd.f32 1e-05, %v532_v20  ;;  %v2786_v6 = vsub.f32 %v2608_v26, %v363_v10  ;;  %v517_v44 = vmul.f32 %v458_v2, %v2556_v42  ;;  %v931_v8 = vmul.f32 %v2750_v18, %v898_v38 }
 0x1c3   :  { %v752_v34 = vmul.f32 %v2135_v40, %v751_v1  ;;  %v598_v57 = vmul.f32 %v2781_v62, %v2752_v43  ;;  %v995_v48 = vmax.f32 %v963_v59, 0.0  ;;  %v979_v12 = vadd.f32 %v2775_v15, %v946_v16 }
 0x1c4   :  { %v2139_v49 = vpop.eup %2138  ;;  %2140 = vrsqrt.f32 %v2783_v25  ;;  %v2795_v27 = vadd.f32 1e-05, %v517_v44  ;;  %v427_v26 = vmul.f32 %v2786_v6, %v2786_v6  ;;  %v964_v14 = vadd.f32 %v2775_v15, %v931_v8 }
 0x1c5   :  { %v756_v17 = vsel %vm755_vm12, %v2135_v40, %v752_v34  ;;  %v599_v28 = vmul.f32 %v2781_v62, %v598_v57  ;;  %v758_v55 = vmul.f32 %v2139_v49, %v2765_v33  ;;  %vm604_vm13 = vweird.f32 %v2781_v62 }
 0x1c6   :  { %2142 = vrsqrt.f32 %v2795_v27  ;;  %469 = vadd.xlane.f32.xlu0 %v427_v26  ;;  %v914_v54 = vmul.f32 %v756_v17, %v2578_v52  ;;  %v996_v5 = vmax.f32 %v964_v14, 0.0  ;;  %vm764_vm14 = vweird.f32 %v2139_v49  ;;  %vm2827_vm2 = vmor %vm603_vm0, %vm604_vm13 }
 0x1c7   :  { %v600_v19 = vmul.f32 0.5, %v599_v28  ;;  %v759_v35 = vmul.f32 %v2139_v49, %v758_v55  ;;  %v456_v46 = vpop.xlane.xlu1 %455  ;;  %v1011_v57 = vmax.f32 %v979_v12, 0.0  ;;  %vm2821_vm1 = vmor %vm763_vm15, %vm764_vm14  ;;  %vm773_vm4 = vweird.f32 %v2783_v25 }
 0x1c8   :  { %v516_v3 = vmul.f32 %v456_v46, %v2556_v42  ;;  %v947_v40 = vmul.f32 %v2750_v18, %v914_v54  ;;  %v1027_v1 = vpack.c.bf16 %v996_v5, %v995_v48  ;;  %vm623_vm6 = vweird.f32 %v2795_v27 }
 0x1c9   :  { %v601_v20 = vsub.f32 1.5, %v600_v19  ;;  %v760_v10 = vmul.f32 0.5, %v759_v35 }
 0x1ca   :  { %v2141_v38 = vpop.eup %2140  ;;  %v2808_v22 = vadd.f32 1e-05, %v516_v3  ;;  %v980_v2 = vadd.f32 %v2775_v15, %v947_v40  ;;  %1116 = vmatmul.bf16.vlgmr.msra.gmra.mxu1 %v1027_v1 }
 0x1cb   :  { %v761_v52 = vsub.f32 1.5, %v760_v10  ;;  %v768_v44 = vmul.f32 %v2141_v38, %v2783_v25  ;;  %v602_v34 = vmul.f32 %v2781_v62, %v601_v20  ;;  %vm774_vm3 = vweird.f32 %v2141_v38 }
 0x1cc   :  { %v2813_v8 = vpop.eup %2142  ;;  %2144 = vrsqrt.f32 %v2808_v22  ;;  %v1012_v59 = vmax.f32 %v980_v2, 0.0  ;;  %vm775_vm5 = vmor %vm773_vm4, %vm774_vm3  ;;  %vm613_vm9 = vweird.f32 %v2808_v22 }
 0x1cd   :  { %v762_v26 = vmul.f32 %v2139_v49, %v761_v52  ;;  %v769_v16 = vmul.f32 %v2141_v38, %v768_v44  ;;  %v618_v17 = vmul.f32 %v2813_v8, %v2795_v27  ;;  %v606_v43 = vsel %vm2827_vm2, %v2781_v62, %v602_v34 }
 0x1ce   :  { %v1035_v55 = vpack.c.bf16 %v1012_v59, %v1011_v57  ;;  %v899_v44 = vmul.f32 %v606_v43, %v2592_v13  ;;  %vm624_vm7 = vweird.f32 %v2813_v8 }
 0x1cf   :  { %v766_v33 = vsel %vm2821_vm1, %v2139_v49, %v762_v26  ;;  %v770_v54 = vmul.f32 0.5, %v769_v16  ;;  %v619_v19 = vmul.f32 %v2813_v8, %v618_v17  ;;  %v460_v35 = vpop.xlane.xlu0 %459  ;;  %v490_v46 = vpop.xlane.xlu1 %489  ;;  %vm2887_vm10 = vmor %vm623_vm6, %vm624_vm7 }
 0x1d0   :  { %v518_v48 = vmul.f32 %v460_v35, %v2556_v42  ;;  %v492_v3 = vpop.xlane.xlu2 %491  ;;  %v533_v5 = vmul.f32 %v490_v46, %v2556_v42  ;;  %1156 = vmatmul.bf16.vlgmr.msra.gmra.mxu3 %v1035_v55  ;;  %v915_v20 = vmul.f32 %v766_v33, %v2589_v56  ;;  %v932_v28 = vmul.f32 %v2750_v18, %v899_v44 }
 0x1d1   :  { %v771_v40 = vsub.f32 1.5, %v770_v54  ;;  %v620_v12 = vmul.f32 0.5, %v619_v19  ;;  %v534_v49 = vmul.f32 %v492_v3, %v2556_v42 }
 0x1d2   :  { %v2841_v10 = vpop.eup %2144  ;;  %v2843_v1 = vadd.f32 1e-05, %v518_v48  ;;  %v2845_v2 = vadd.f32 1e-05, %v533_v5  ;;  %v948_v26 = vmul.f32 %v2750_v18, %v915_v20 }
 0x1d3   :  { %v772_v62 = vmul.f32 %v2141_v38, %v771_v40  ;;  %v608_v52 = vmul.f32 %v2841_v10, %v2808_v22  ;;  %v621_v34 = vsub.f32 1.5, %v620_v12  ;;  %v2853_v56 = vadd.f32 1e-05, %v534_v49 }
 0x1d4   :  { %2146 = vrsqrt.f32 %v2843_v1  ;;  %vm614_vm8 = vweird.f32 %v2841_v10  ;;  %v981_v35 = vadd.f32 %v2775_v15, %v948_v26  ;;  %v2898_v49 = vadd.f32 %v2775_v15, %v932_v28 }
 0x1d5   :  { %v776_v57 = vsel %vm775_vm5, %v2141_v38, %v772_v62  ;;  %v609_v59 = vmul.f32 %v2841_v10, %v608_v52  ;;  %2148 = vrsqrt.f32 %v2845_v2  ;;  %v2864_v38 = vmul.f32 %v2813_v8, %v621_v34  ;;  %vm2908_vm11 = vmor %vm613_vm9, %vm614_vm8 }
 0x1d6   :  { %2150 = vrsqrt.f32 %v2853_v56  ;;  %v916_v25 = vmul.f32 %v776_v57, %v2604_v0  ;;  %vm633_vm12 = vweird.f32 %v2843_v1  ;;  %v1013_v34 = vmax.f32 %v981_v35, 0.0 }
 0x1d7   :  { %v610_v13 = vmul.f32 0.5, %v609_v59  ;;  %v341_v16 = vpop.xlane.xlu0 %340  ;;  %v462_v17 = vpop.xlane.xlu1 %461  ;;  %v626_v27 = vsel %vm2887_vm10, %v2813_v8, %v2864_v38  ;;  %vm783_vm1 = vweird.f32 %v2845_v2  ;;  %vm793_vm2 = vweird.f32 %v2853_v56 }
 0x1d8   :  { %v382_v55 = vmul.f32 %v2556_v42, %v341_v16  ;;  %v339_v14 = vpop.xlane.xlu2 %338  ;;  %v519_v33 = vmul.f32 %v462_v17, %v2556_v42  ;;  %v949_v54 = vmul.f32 %v2750_v18, %v916_v25 }
 0x1d9   :  { %v611_v0 = vsub.f32 1.5, %v610_v13  ;;  %v381_v19 = vmul.f32 %v2556_v42, %v339_v14 }
 0x1da   :  { %v2872_v46 = vpop.eup %2146  ;;  %v2876_v43 = vsub.f32 %v2647_v50, %v382_v55  ;;  %v2878_v48 = vadd.f32 1e-05, %v519_v33  ;;  %v982_v3 = vadd.f32 %v2775_v15, %v949_v54 }
 0x1db   :  { %v2881_v5 = vpop.eup %2148  ;;  %v612_v12 = vmul.f32 %v2841_v10, %v611_v0  ;;  %v628_v50 = vmul.f32 %v2872_v46, %v2843_v1  ;;  %v2895_v22 = vsub.f32 %v2652_v61, %v381_v19  ;;  %vm634_vm13 = vweird.f32 %v2872_v46 }
 0x1dc   :  { %v2900_v20 = vpop.eup %2150  ;;  %v778_v61 = vmul.f32 %v2881_v5, %v2845_v2  ;;  %2152 = vrsqrt.f32 %v2878_v48  ;;  %v446_v26 = vmul.f32 %v2876_v43, %v2876_v43  ;;  %v1014_v25 = vmax.f32 %v982_v3, 0.0  ;;  %vm2950_vm0 = vmor %vm633_vm12, %vm634_vm13 }
 0x1dd   :  { %v616_v52 = vsel %vm2908_vm11, %v2841_v10, %v612_v12  ;;  %v629_v44 = vmul.f32 %v2872_v46, %v628_v50  ;;  %v788_v8 = vmul.f32 %v2900_v20, %v2853_v56  ;;  %v445_v59 = vmul.f32 %v2895_v22, %v2895_v22 }
 0x1de   :  { %v779_v57 = vmul.f32 %v2881_v5, %v778_v61  ;;  %v900_v28 = vmul.f32 %v616_v52, %v2620_v36  ;;  %507 = vadd.xlane.f32.xlu0 %v446_v26  ;;  %v1036_v54 = vpack.c.bf16 %v1014_v25, %v1013_v34  ;;  %vm784_vm14 = vweird.f32 %v2881_v5 }
 0x1df   :  { %v630_v13 = vmul.f32 0.5, %v629_v44  ;;  %v789_v10 = vmul.f32 %v2900_v20, %v788_v8  ;;  %v307_v16 = vpop.xlane.xlu0 %306  ;;  %v496_v17 = vpop.xlane.xlu1 %495  ;;  %505 = vadd.xlane.f32.xlu2 %v445_v59  ;;  %vm794_vm15 = vweird.f32 %v2900_v20  ;;  %vm785_vm3 = vmor %vm783_vm1, %vm784_vm14  ;;  %vm643_vm12 = vweird.f32 %v2878_v48 }
 0x1e0   :  { %v780_v38 = vmul.f32 0.5, %v779_v57  ;;  %v365_v55 = vmul.f32 %v2556_v42, %v307_v16  ;;  %v464_v14 = vpop.xlane.xlu2 %463  ;;  %v536_v33 = vmul.f32 %v496_v17, %v2556_v42  ;;  %1161 = vmatmul.bf16.gmra.mxu3 %v1036_v54  ;;  %v933_v50 = vmul.f32 %v2750_v18, %v900_v28  ;;  %vm795_vm4 = vmor %vm793_vm2, %vm794_vm15 }
 0x1e1   :  { %v631_v0 = vsub.f32 1.5, %v630_v13  ;;  %v790_v19 = vmul.f32 0.5, %v789_v10  ;;  %v520_v35 = vmul.f32 %v464_v14, %v2556_v42  ;;  %v901_v57 = vmul.f32 %v626_v27, %v2612_v30 }
 0x1e2   :  { %v2934_v3 = vpop.eup %2152  ;;  %v781_v40 = vsub.f32 1.5, %v780_v38  ;;  %v2937_v36 = vsub.f32 %v2662_v9, %v365_v55  ;;  %v2939_v12 = vadd.f32 1e-05, %v536_v33  ;;  %v966_v26 = vadd.f32 %v2775_v15, %v933_v50 }
 0x1e3   :  { %v632_v62 = vmul.f32 %v2872_v46, %v631_v0  ;;  %v791_v61 = vsub.f32 1.5, %v790_v19  ;;  %v638_v52 = vmul.f32 %v2934_v3, %v2878_v48  ;;  %v2956_v8 = vadd.f32 1e-05, %v520_v35 }
 0x1e4   :  { %v782_v44 = vmul.f32 %v2881_v5, %v781_v40  ;;  %2154 = vrsqrt.f32 %v2939_v12  ;;  %v429_v1 = vmul.f32 %v2937_v36, %v2937_v36  ;;  %v997_v30 = vmax.f32 %v2898_v49, 0.0 }
 0x1e5   :  { %v792_v34 = vmul.f32 %v2900_v20, %v791_v61  ;;  %v636_v2 = vsel %vm2950_vm0, %v2872_v46, %v632_v62  ;;  %2156 = vrsqrt.f32 %v2956_v8  ;;  %v639_v25 = vmul.f32 %v2934_v3, %v638_v52 }
 0x1e6   :  { %v786_v59 = vsel %vm785_vm3, %v2881_v5, %v782_v44  ;;  %473 = vadd.xlane.f32.xlu1 %v429_v1  ;;  %v998_v17 = vmax.f32 %v966_v26, 0.0  ;;  %v902_v55 = vmul.f32 %v636_v2, %v2631_v4  ;;  %v934_v14 = vmul.f32 %v2750_v18, %v901_v57 }
 0x1e7   :  { %v796_v56 = vsel %vm795_vm4, %v2900_v20, %v792_v34  ;;  %v494_v13 = vpop.xlane.xlu0 %493  ;;  %v309_v10 = vpop.xlane.xlu1 %308  ;;  %v917_v27 = vmul.f32 %v786_v59, %v2626_v41  ;;  %v640_v4 = vmul.f32 0.5, %v639_v25  ;;  %vm644_vm5 = vweird.f32 %v2934_v3 }
 0x1e8   :  { %v535_v46 = vmul.f32 %v494_v13, %v2556_v42  ;;  %v345_v16 = vpop.xlane.xlu2 %344  ;;  %v366_v5 = vmul.f32 %v2556_v42, %v309_v10  ;;  %v918_v28 = vmul.f32 %v796_v56, %v2634_v47  ;;  %v1028_v54 = vpack.c.bf16 %v998_v17, %v997_v30  ;;  %vm3056_vm13 = vmor %vm643_vm12, %vm644_vm5 }
 0x1e9   :  { %v384_v38 = vmul.f32 %v2556_v42, %v345_v16  ;;  %v950_v20 = vmul.f32 %v2750_v18, %v917_v27  ;;  %v3006_v61 = vadd.f32 %v2775_v15, %v934_v14  ;;  %v935_v44 = vmul.f32 %v2750_v18, %v902_v55 }
 0x1ea   :  { %v2983_v33 = vpop.eup %2154  ;;  %v2985_v49 = vadd.f32 1e-05, %v535_v46  ;;  %v2988_v41 = vsub.f32 %v2681_v32, %v366_v5  ;;  %v951_v0 = vmul.f32 %v2750_v18, %v918_v28  ;;  %1121 = vmatmul.bf16.gmra.mxu1 %v1028_v54  ;;  %vm813_vm6 = vweird.f32 %v2939_v12 }
 0x1eb   :  { %v808_v47 = vmul.f32 %v2983_v33, %v2939_v12  ;;  %v2994_v19 = vsub.f32 %v2677_v24, %v384_v38  ;;  %v2996_v35 = vpop.eup %2156  ;;  %v983_v32 = vadd.f32 %v2775_v15, %v950_v20  ;;  %v641_v59 = vsub.f32 1.5, %v640_v4 }
 0x1ec   :  { %2158 = vrsqrt.f32 %v2985_v49  ;;  %v430_v40 = vmul.f32 %v2988_v41, %v2988_v41  ;;  %v648_v50 = vmul.f32 %v2996_v35, %v2956_v8  ;;  %v984_v52 = vadd.f32 %v2775_v15, %v951_v0 }
 0x1ed   :  { %v809_v62 = vmul.f32 %v2983_v33, %v808_v47  ;;  %v448_v24 = vmul.f32 %v2994_v19, %v2994_v19  ;;  %v1015_v9 = vmax.f32 %v983_v32, 0.0  ;;  %vm814_vm7 = vweird.f32 %v2983_v33 }
 0x1ee   :  { %475 = vadd.xlane.f32.xlu2 %v430_v40  ;;  %v649_v34 = vmul.f32 %v2996_v35, %v648_v50  ;;  %v1016_v13 = vmax.f32 %v984_v52, 0.0  ;;  %v968_v28 = vadd.f32 %v2775_v15, %v935_v44  ;;  %vm654_vm8 = vweird.f32 %v2996_v35  ;;  %vm3031_vm10 = vmor %vm813_vm6, %vm814_vm7 }
 0x1ef   :  { %v810_v1 = vmul.f32 0.5, %v809_v62  ;;  %v466_v57 = vpop.xlane.xlu0 %465  ;;  %v343_v2 = vpop.xlane.xlu1 %342  ;;  %511 = vadd.xlane.f32.xlu1 %v448_v24  ;;  %vm653_vm9 = vweird.f32 %v2956_v8  ;;  %v642_v0 = vmul.f32 %v2934_v3, %v641_v59  ;;  %v999_v48 = vmax.f32 %v3006_v61, 0.0 }
 0x1f0   :  { %v521_v26 = vmul.f32 %v466_v57, %v2556_v42  ;;  %v498_v56 = vpop.xlane.xlu2 %497  ;;  %v383_v25 = vmul.f32 %v2556_v42, %v343_v2  ;;  %v650_v10 = vmul.f32 0.5, %v649_v34  ;;  %v1037_v17 = vpack.c.bf16 %v1016_v13, %v1015_v9  ;;  %vm3045_vm11 = vmor %vm653_vm9, %vm654_vm8 }
 0x1f1   :  { %v811_v30 = vsub.f32 1.5, %v810_v1  ;;  %v537_v27 = vmul.f32 %v498_v56, %v2556_v42  ;;  %v1000_v40 = vmax.f32 %v968_v28, 0.0  ;;  %vm803_vm15 = vweird.f32 %v2985_v49 }
 0x1f2   :  { %v2159_v46 = vpop.eup %2158  ;;  %v3019_v16 = vadd.f32 1e-05, %v521_v26  ;;  %v3022_v5 = vsub.f32 %v2695_v39, %v383_v25  ;;  %v651_v38 = vsub.f32 1.5, %v650_v10  ;;  %1166 = vmatmul.bf16.gmra.mxu3 %v1037_v17 }
 0x1f3   :  { %v812_v20 = vmul.f32 %v2983_v33, %v811_v30  ;;  %v798_v55 = vmul.f32 %v2159_v46, %v2985_v49  ;;  %v3036_v39 = vadd.f32 1e-05, %v537_v27  ;;  %vm804_vm14 = vweird.f32 %v2159_v46 }
 0x1f4   :  { %2160 = vrsqrt.f32 %v3019_v16  ;;  %v447_v54 = vmul.f32 %v3022_v5, %v3022_v5  ;;  %v652_v47 = vmul.f32 %v2996_v35, %v651_v38  ;;  %v1029_v56 = vpack.c.bf16 %v1000_v40, %v999_v48  ;;  %vm805_vm0 = vmor %vm803_vm15, %vm804_vm14 }
 0x1f5   :  { %v816_v12 = vsel %vm3031_vm10, %v2983_v33, %v812_v20  ;;  %v799_v8 = vmul.f32 %v2159_v46, %v798_v55  ;;  %2162 = vrsqrt.f32 %v3036_v39  ;;  %vm663_vm1 = vweird.f32 %v3019_v16 }
 0x1f6   :  { %509 = vadd.xlane.f32.xlu0 %v447_v54  ;;  %v656_v32 = vsel %vm3045_vm11, %v2996_v35, %v652_v47  ;;  %v920_v34 = vmul.f32 %v816_v12, %v2665_v11  ;;  %v646_v35 = vsel %vm3056_vm13, %v2934_v3, %v642_v0  ;;  %vm823_vm5 = vweird.f32 %v3036_v39 }
 0x1f7   :  { %v800_v50 = vmul.f32 0.5, %v799_v8  ;;  %v500_v62 = vpop.xlane.xlu0 %499  ;;  %v468_v24 = vpop.xlane.xlu1 %467  ;;  %v904_v25 = vmul.f32 %v656_v32, %v2659_v7  ;;  %v903_v10 = vmul.f32 %v646_v35, %v2644_v58 }
 0x1f8   :  { %v538_v52 = vmul.f32 %v500_v62, %v2556_v42  ;;  %v311_v9 = vpop.xlane.xlu2 %310  ;;  %v522_v44 = vmul.f32 %v468_v24, %v2556_v42  ;;  %v953_v30 = vmul.f32 %v2750_v18, %v920_v34 }
 0x1f9   :  { %v801_v1 = vsub.f32 1.5, %v800_v50  ;;  %v367_v57 = vmul.f32 %v2556_v42, %v311_v9  ;;  %v937_v17 = vmul.f32 %v2750_v18, %v904_v25 }
 0x1fa   :  { %v3068_v2 = vpop.eup %2160  ;;  %v3070_v59 = vadd.f32 1e-05, %v538_v52  ;;  %v3072_v26 = vadd.f32 1e-05, %v522_v44  ;;  %1126 = vmatmul.bf16.gmra.mxu1 %v1029_v56  ;;  %v986_v54 = vadd.f32 %v2775_v15, %v953_v30 }
 0x1fb   :  { %v802_v61 = vmul.f32 %v2159_v46, %v801_v1  ;;  %v658_v11 = vmul.f32 %v3068_v2, %v3019_v16  ;;  %v3079_v3 = vsub.f32 %v2711_v53, %v367_v57  ;;  %v2163_v13 = vpop.eup %2162  ;;  %vm664_vm2 = vweird.f32 %v3068_v2 }
 0x1fc   :  { %2164 = vrsqrt.f32 %v3070_v59  ;;  %v818_v49 = vmul.f32 %v2163_v13, %v3036_v39  ;;  %v970_v8 = vadd.f32 %v2775_v15, %v937_v17  ;;  %vm824_vm3 = vweird.f32 %v2163_v13  ;;  %vm3109_vm4 = vmor %vm663_vm1, %vm664_vm2 }
 0x1fd   :  { %v806_v27 = vsel %vm805_vm0, %v2159_v46, %v802_v61  ;;  %v659_v7 = vmul.f32 %v3068_v2, %v658_v11  ;;  %2166 = vrsqrt.f32 %v3072_v26  ;;  %v431_v53 = vmul.f32 %v3079_v3, %v3079_v3  ;;  %vm825_vm6 = vmor %vm823_vm5, %vm824_vm3 }
 0x1fe   :  { %v919_v28 = vmul.f32 %v806_v27, %v2674_v23  ;;  %v819_v20 = vmul.f32 %v2163_v13, %v818_v49  ;;  %v936_v46 = vmul.f32 %v2750_v18, %v903_v10  ;;  %v1018_v9 = vmax.f32 %v986_v54, 0.0 }
 0x1ff   :  { %v660_v38 = vmul.f32 0.5, %v659_v7  ;;  %v313_v55 = vpop.xlane.xlu0 %312  ;;  %477 = vadd.xlane.f32.xlu2 %v431_v53  ;;  %v1002_v35 = vmax.f32 %v970_v8, 0.0  ;;  %vm833_vm8 = vweird.f32 %v3070_v59  ;;  %vm673_vm11 = vweird.f32 %v3072_v26 }
 0x200   :  { %v368_v58 = vmul.f32 %v2556_v42, %v313_v55  ;;  %v952_v14 = vmul.f32 %v2750_v18, %v919_v28  ;;  %v820_v47 = vmul.f32 0.5, %v819_v20  ;;  %v969_v33 = vadd.f32 %v2775_v15, %v936_v46 }
 0x201   :  { %v661_v0 = vsub.f32 1.5, %v660_v38 }
 0x202   :  { %v2165_v12 = vpop.eup %2164  ;;  %v3098_v23 = vsub.f32 %v2723_v60, %v368_v58  ;;  %v985_v4 = vadd.f32 %v2775_v15, %v952_v14  ;;  %v821_v32 = vsub.f32 1.5, %v820_v47  ;;  %v1001_v61 = vmax.f32 %v969_v33, 0.0  ;;  %v502_v47 = vpop.xlane.xlu1 %501 }
 0x203   :  { %v662_v40 = vmul.f32 %v3068_v2, %v661_v0  ;;  %v828_v50 = vmul.f32 %v2165_v12, %v3070_v59  ;;  %v2167_v62 = vpop.eup %2166  ;;  %vm834_vm7 = vweird.f32 %v2165_v12 }
 0x204   :  { %v432_v24 = vmul.f32 %v3098_v23, %v3098_v23  ;;  %v1017_v52 = vmax.f32 %v985_v4, 0.0  ;;  %v822_v44 = vmul.f32 %v2163_v13, %v821_v32  ;;  %v668_v34 = vmul.f32 %v2167_v62, %v3072_v26  ;;  %vm835_vm10 = vmor %vm833_vm8, %vm834_vm7 }
 0x205   :  { %v829_v48 = vmul.f32 %v2165_v12, %v828_v50  ;;  %v666_v57 = vsel %vm3109_vm4, %v3068_v2, %v662_v40  ;;  %v1030_v30 = vpack.c.bf16 %v1002_v35, %v1001_v61  ;;  %vm674_vm9 = vweird.f32 %v2167_v62 }
 0x206   :  { %479 = vadd.xlane.f32.xlu0 %v432_v24  ;;  %v1038_v1 = vpack.c.bf16 %v1018_v9, %v1017_v52  ;;  %v826_v56 = vsel %vm825_vm6, %v2163_v13, %v822_v44  ;;  %v669_v25 = vmul.f32 %v2167_v62, %v668_v34  ;;  %v905_v27 = vmul.f32 %v666_v57, %v2689_v21  ;;  %vm675_vm12 = vmor %vm673_vm11, %vm674_vm9 }
 0x207   :  { %v830_v16 = vmul.f32 0.5, %v829_v48  ;;  %v921_v11 = vmul.f32 %v826_v56, %v2692_v37 }
 0x208   :  { %1171 = vmatmul.bf16.gmra.mxu3 %v1038_v1  ;;  %v670_v39 = vmul.f32 0.5, %v669_v25  ;;  %v938_v37 = vmul.f32 %v2750_v18, %v905_v27 }
 0x209   :  { %v831_v10 = vsub.f32 1.5, %v830_v16  ;;  %v954_v2 = vmul.f32 %v2750_v18, %v921_v11 }
 0x20a   :  { %v671_v49 = vsub.f32 1.5, %v670_v39  ;;  %1131 = vmatmul.bf16.gmra.mxu1 %v1030_v30  ;;  %v971_v55 = vadd.f32 %v2775_v15, %v938_v37 }
 0x20b   :  { %v832_v7 = vmul.f32 %v2165_v12, %v831_v10  ;;  %v987_v38 = vadd.f32 %v2775_v15, %v954_v2 }
 0x20c   :  { %v672_v53 = vmul.f32 %v2167_v62, %v671_v49  ;;  %v1003_v54 = vmax.f32 %v971_v55, 0.0 }
 0x20d   :  { %v836_v13 = vsel %vm835_vm10, %v2165_v12, %v832_v7  ;;  %v1019_v46 = vmax.f32 %v987_v38, 0.0 }
 0x20e   :  { %v922_v17 = vmul.f32 %v836_v13, %v2708_v51  ;;  %v676_v28 = vsel %vm675_vm12, %v2167_v62, %v672_v53 }
 0x20f   :  { %v906_v21 = vmul.f32 %v676_v28, %v2705_v29  ;;  %v539_v29 = vmul.f32 %v502_v47, %v2556_v42  ;;  %v3141_v28 = vld [vmem:[#allocation8] sm:$0xff] }
 0x210   :  { %v955_v59 = vmul.f32 %v2750_v18, %v922_v17 }
 0x211   :  { %v939_v20 = vmul.f32 %v2750_v18, %v906_v21  ;;  %v571_v8 = vadd.f32 1e-05, %v539_v29  ;;  %v3144_v21 = vperm.slane %v3141_v28, 3 }
 0x212   :  { %v988_v58 = vadd.f32 %v2775_v15, %v955_v59 }
 0x213   :  { %v972_v26 = vadd.f32 %v2775_v15, %v939_v20  ;;  %2168 = vrsqrt.f32 %v571_v8  ;;  %vm843_vm14 = vweird.f32 %v571_v8 }
 0x214   :  { %v1020_v14 = vmax.f32 %v988_v58, 0.0 }
 0x215   :  { %v1004_v0 = vmax.f32 %v972_v26, 0.0 }
 0x216   :  { %v1039_v51 = vpack.c.bf16 %v1020_v14, %v1019_v46 }
 0x217   :  { %v1031_v12 = vpack.c.bf16 %v1004_v0, %v1003_v54 }
 0x218   :  { %1176 = vmatmul.bf16.gmra.mxu3 %v1039_v51 }
 0x219   :  { %v2169_v4 = vpop.eup %2168 }
 0x21a   :  { %1136 = vmatmul.bf16.gmra.mxu1 %v1031_v12  ;;  %v838_v40 = vmul.f32 %v2169_v4, %v571_v8  ;;  %vm844_vm13 = vweird.f32 %v2169_v4 }
 0x21b   :  { %vm845_vm15 = vmor %vm843_vm14, %vm844_vm13 }
 0x21c   :  { %v839_v24 = vmul.f32 %v2169_v4, %v838_v40 }
 0x21e   :  { %v840_v9 = vmul.f32 0.5, %v839_v24 }
 0x220   :  { %v841_v48 = vsub.f32 1.5, %v840_v9 }
 0x222   :  { %v842_v56 = vmul.f32 %v2169_v4, %v841_v48 }
 0x224   :  { %v846_v10 = vsel %vm845_vm15, %v2169_v4, %v842_v56 }
 0x225   :  { %v923_v7 = vmul.f32 %v846_v10, %v2720_v31 }
 0x227   :  { %v956_v31 = vmul.f32 %v2750_v18, %v923_v7 }
 0x229   :  { %v989_v54 = vadd.f32 %v2775_v15, %v956_v31 }
 0x22b   :  { %v472_v32 = vpop.xlane.xlu1 %471 }
 0x22c   :  { %v524_v50 = vmul.f32 %v472_v32, %v2556_v42 }
 0x22e   :  { %v556_v62 = vadd.f32 1e-05, %v524_v50 }
 0x230   :  { %2170 = vrsqrt.f32 %v556_v62  ;;  %vm693_vm2 = vweird.f32 %v556_v62 }
 0x231   :  { %v504_v33 = vpop.xlane.xlu2 %503 }
 0x232   :  { %v540_v52 = vmul.f32 %v504_v33, %v2556_v42 }
 0x234   :  { %v572_v60 = vadd.f32 1e-05, %v540_v52 }
 0x236   :  { %v2171_v44 = vpop.eup %2170  ;;  %2172 = vrsqrt.f32 %v572_v60  ;;  %vm853_vm4 = vweird.f32 %v572_v60 }
 0x237   :  { %v688_v34 = vmul.f32 %v2171_v44, %v556_v62  ;;  %vm694_vm0 = vweird.f32 %v2171_v44 }
 0x238   :  { %vm3137_vm3 = vmor %vm693_vm2, %vm694_vm0 }
 0x239   :  { %v689_v35 = vmul.f32 %v2171_v44, %v688_v34  ;;  %v470_v1 = vpop.xlane.xlu0 %469 }
 0x23a   :  { %v523_v57 = vmul.f32 %v470_v1, %v2556_v42 }
 0x23b   :  { %v690_v16 = vmul.f32 0.5, %v689_v35 }
 0x23c   :  { %v2173_v25 = vpop.eup %2172  ;;  %v555_v61 = vadd.f32 1e-05, %v523_v57 }
 0x23d   :  { %v848_v11 = vmul.f32 %v2173_v25, %v572_v60  ;;  %v691_v39 = vsub.f32 1.5, %v690_v16  ;;  %vm854_vm1 = vweird.f32 %v2173_v25 }
 0x23e   :  { %2174 = vrsqrt.f32 %v555_v61  ;;  %vm855_vm5 = vmor %vm853_vm4, %vm854_vm1  ;;  %vm683_vm7 = vweird.f32 %v555_v61 }
 0x23f   :  { %v849_v30 = vmul.f32 %v2173_v25, %v848_v11  ;;  %v692_v49 = vmul.f32 %v2171_v44, %v691_v39 }
 0x241   :  { %v850_v27 = vmul.f32 0.5, %v849_v30  ;;  %v696_v59 = vsel %vm3137_vm3, %v2171_v44, %v692_v49 }
 0x242   :  { %v908_v0 = vmul.f32 %v696_v59, %v2737_v63 }
 0x243   :  { %v851_v2 = vsub.f32 1.5, %v850_v27 }
 0x244   :  { %v2175_v13 = vpop.eup %2174  ;;  %v941_v8 = vmul.f32 %v2750_v18, %v908_v0 }
 0x245   :  { %v852_v37 = vmul.f32 %v2173_v25, %v851_v2  ;;  %v678_v17 = vmul.f32 %v2175_v13, %v555_v61  ;;  %vm684_vm6 = vweird.f32 %v2175_v13 }
 0x246   :  { %vm685_vm8 = vmor %vm683_vm7, %vm684_vm6  ;;  %v974_v24 = vadd.f32 %v2775_v15, %v941_v8 }
 0x247   :  { %v856_v38 = vsel %vm855_vm5, %v2173_v25, %v852_v37  ;;  %v679_v20 = vmul.f32 %v2175_v13, %v678_v17  ;;  %v1117_v26 = vpop.f32.mrf.mxu1 }
 0x248   :  { %v924_v55 = vmul.f32 %v856_v38, %v2755_v45  ;;  %v3151_v46 = vadd.f32 %v1117_v26, %v3144_v21  ;;  %v1021_v45 = vmax.f32 %v989_v54, 0.0  ;;  %v1006_v35 = vmax.f32 %v974_v24, 0.0 }
 0x249   :  { %v680_v58 = vmul.f32 0.5, %v679_v20 }
 0x24a   :  { %v957_v14 = vmul.f32 %v2750_v18, %v924_v55  ;;  %1197 = vadd.xlane.f32.xlu1 %v3151_v46 }
 0x24b   :  { %v681_v51 = vsub.f32 1.5, %v680_v58 }
 0x24c   :  { %v990_v47 = vadd.f32 %v2775_v15, %v957_v14 }
 0x24d   :  { %v682_v12 = vmul.f32 %v2175_v13, %v681_v51 }
 0x24e   :  { %v1022_v29 = vmax.f32 %v990_v47, 0.0 }
 0x24f   :  { %v686_v4 = vsel %vm685_vm8, %v2175_v13, %v682_v12  ;;  %v1119_v50 = vpop.f32.mrf.mxu1 }
 0x250   :  { %v1040_v40 = vpack.c.bf16 %v1022_v29, %v1021_v45  ;;  %v907_v32 = vmul.f32 %v686_v4, %v2786_v6  ;;  %v3161_v63 = vadd.f32 %v1119_v50, %v3144_v21 }
 0x251   :  { %v508_v52 = vpop.xlane.xlu0 %507 }
 0x252   :  { %1181 = vmatmul.bf16.gmra.mxu3 %v1040_v40  ;;  %v940_v62 = vmul.f32 %v2750_v18, %v907_v32  ;;  %v506_v33 = vpop.xlane.xlu2 %505  ;;  %v542_v60 = vmul.f32 %v508_v52, %v2556_v42  ;;  %1199 = vadd.xlane.f32.xlu2 %v3161_v63 }
 0x253   :  { %v541_v9 = vmul.f32 %v506_v33, %v2556_v42  ;;  %v1157_v1 = vpop.f32.mrf.mxu3 }
 0x254   :  { %v973_v44 = vadd.f32 %v2775_v15, %v940_v62  ;;  %v574_v48 = vadd.f32 1e-05, %v542_v60  ;;  %v3170_v56 = vadd.f32 %v1157_v1, %v3144_v21 }
 0x255   :  { %v573_v6 = vadd.f32 1e-05, %v541_v9 }
 0x256   :  { %v1005_v34 = vmax.f32 %v973_v44, 0.0  ;;  %vm873_vm13 = vweird.f32 %v574_v48 }
 0x257   :  { %2176 = vrsqrt.f32 %v573_v6  ;;  %vm863_vm11 = vweird.f32 %v573_v6 }
 0x258   :  { %v1032_v57 = vpack.c.bf16 %v1006_v35, %v1005_v34  ;;  %2178 = vrsqrt.f32 %v574_v48 }
 0x259   :  { %v474_v16 = vpop.xlane.xlu1 %473 }
 0x25a   :  { %1141 = vmatmul.bf16.gmra.mxu1 %v1032_v57  ;;  %v525_v25 = vmul.f32 %v474_v16, %v2556_v42  ;;  %1229 = vadd.xlane.f32.xlu2 %v3170_v56 }
 0x25b   :  { %v1159_v53 = vpop.f32.mrf.mxu3 }
 0x25c   :  { %v557_v61 = vadd.f32 1e-05, %v525_v25 }
 0x25d   :  { %v2177_v11 = vpop.eup %2176 }
 0x25e   :  { %v2179_v10 = vpop.eup %2178  ;;  %v858_v39 = vmul.f32 %v2177_v11, %v573_v6  ;;  %2180 = vrsqrt.f32 %v557_v61  ;;  %vm864_vm9 = vweird.f32 %v2177_v11  ;;  %vm703_vm0 = vweird.f32 %v557_v61 }
 0x25f   :  { %v868_v30 = vmul.f32 %v2179_v10, %v574_v48  ;;  %vm874_vm10 = vweird.f32 %v2179_v10  ;;  %vm865_vm12 = vmor %vm863_vm11, %vm864_vm9 }
 0x260   :  { %v859_v27 = vmul.f32 %v2177_v11, %v858_v39  ;;  %vm875_vm14 = vmor %vm873_vm13, %vm874_vm10 }
 0x261   :  { %v476_v7 = vpop.xlane.xlu2 %475  ;;  %v869_v49 = vmul.f32 %v2179_v10, %v868_v30 }
 0x262   :  { %v526_v2 = vmul.f32 %v476_v7, %v2556_v42  ;;  %v860_v13 = vmul.f32 0.5, %v859_v27  ;;  %v512_v37 = vpop.xlane.xlu1 %511 }
 0x263   :  { %v870_v17 = vmul.f32 0.5, %v869_v49  ;;  %v544_v59 = vmul.f32 %v512_v37, %v2556_v42  ;;  %v1162_v52 = vpop.f32.mrf.mxu3 }
 0x264   :  { %v3175_v31 = vadd.f32 1e-05, %v526_v2  ;;  %v2181_v38 = vpop.eup %2180  ;;  %v861_v20 = vsub.f32 1.5, %v860_v13 }
 0x265   :  { %v871_v55 = vsub.f32 1.5, %v870_v17  ;;  %v698_v58 = vmul.f32 %v2181_v38, %v557_v61  ;;  %v3179_v14 = vadd.f32 1e-05, %v544_v59  ;;  %vm704_vm15 = vweird.f32 %v2181_v38 }
 0x266   :  { %2182 = vrsqrt.f32 %v3175_v31  ;;  %v862_v26 = vmul.f32 %v2177_v11, %v861_v20  ;;  %vm3195_vm1 = vmor %vm703_vm0, %vm704_vm15  ;;  %vm713_vm3 = vweird.f32 %v3175_v31 }
 0x267   :  { %v872_v54 = vmul.f32 %v2179_v10, %v871_v55  ;;  %v699_v0 = vmul.f32 %v2181_v38, %v698_v58  ;;  %2184 = vrsqrt.f32 %v3179_v14  ;;  %v1122_v47 = vpop.f32.mrf.mxu1  ;;  %vm893_vm6 = vweird.f32 %v3179_v14 }
 0x268   :  { %v866_v51 = vsel %vm865_vm12, %v2177_v11, %v862_v26  ;;  %v3183_v8 = vadd.f32 %v1122_v47, %v3144_v21  ;;  %v3205_v11 = vadd.f32 %v1159_v53, %v3144_v21 }
 0x269   :  { %v510_v12 = vpop.xlane.xlu0 %509  ;;  %v876_v45 = vsel %vm875_vm14, %v2179_v10, %v872_v54  ;;  %v700_v29 = vmul.f32 0.5, %v699_v0  ;;  %v925_v40 = vmul.f32 %v866_v51, %v2895_v22 }
 0x26a   :  { %v543_v4 = vmul.f32 %v510_v12, %v2556_v42  ;;  %v926_v32 = vmul.f32 %v876_v45, %v2876_v43  ;;  %1201 = vadd.xlane.f32.xlu0 %v3183_v8 }
 0x26b   :  { %v701_v62 = vsub.f32 1.5, %v700_v29  ;;  %v958_v9 = vmul.f32 %v2750_v18, %v925_v40  ;;  %v1164_v58 = vpop.f32.mrf.mxu3 }
 0x26c   :  { %v2183_v50 = vpop.eup %2182  ;;  %v3189_v24 = vadd.f32 1e-05, %v543_v4  ;;  %v959_v60 = vmul.f32 %v2750_v18, %v926_v32 }
 0x26d   :  { %v708_v33 = vmul.f32 %v2183_v50, %v3175_v31  ;;  %v702_v44 = vmul.f32 %v2181_v38, %v701_v62  ;;  %v2185_v22 = vpop.eup %2184  ;;  %v991_v48 = vadd.f32 %v2775_v15, %v958_v9  ;;  %vm714_vm2 = vweird.f32 %v2183_v50 }
 0x26e   :  { %2186 = vrsqrt.f32 %v3189_v24  ;;  %v992_v34 = vadd.f32 %v2775_v15, %v959_v60  ;;  %v888_v1 = vmul.f32 %v2185_v22, %v3179_v14  ;;  %vm3216_vm4 = vmor %vm713_vm3, %vm714_vm2  ;;  %vm894_vm5 = vweird.f32 %v2185_v22 }
 0x26f   :  { %v709_v6 = vmul.f32 %v2183_v50, %v708_v33  ;;  %v706_v35 = vsel %vm3195_vm1, %v2181_v38, %v702_v44  ;;  %v1124_v16 = vpop.f32.mrf.mxu1  ;;  %v1023_v25 = vmax.f32 %v991_v48, 0.0  ;;  %vm895_vm7 = vmor %vm893_vm6, %vm894_vm5  ;;  %v3225_v31 = vadd.f32 %v1162_v52, %v3144_v21 }
 0x270   :  { %v1024_v61 = vmax.f32 %v992_v34, 0.0  ;;  %v889_v10 = vmul.f32 %v2185_v22, %v888_v1  ;;  %v3208_v39 = vadd.f32 %v1124_v16, %v3144_v21  ;;  %v909_v49 = vmul.f32 %v706_v35, %v2937_v36 }
 0x271   :  { %v710_v57 = vmul.f32 0.5, %v709_v6  ;;  %vm883_vm9 = vweird.f32 %v3189_v24  ;;  %v3242_v1 = vadd.f32 %v1164_v58, %v3144_v21 }
 0x272   :  { %v478_v27 = vpop.xlane.xlu2 %477  ;;  %v1041_v7 = vpack.c.bf16 %v1024_v61, %v1023_v25  ;;  %v890_v13 = vmul.f32 0.5, %v889_v10  ;;  %1203 = vadd.xlane.f32.xlu1 %v3208_v39  ;;  %1231 = vadd.xlane.f32.xlu0 %v3205_v11  ;;  %v942_v26 = vmul.f32 %v2750_v18, %v909_v49 }
 0x273   :  { %v711_v30 = vsub.f32 1.5, %v710_v57  ;;  %v527_v37 = vmul.f32 %v478_v27, %v2556_v42 }
 0x274   :  { %v2187_v2 = vpop.eup %2186  ;;  %1186 = vmatmul.bf16.gmra.mxu3 %v1041_v7  ;;  %v891_v38 = vsub.f32 1.5, %v890_v13  ;;  %v975_v32 = vadd.f32 %v2775_v15, %v942_v26 }
 0x275   :  { %v712_v53 = vmul.f32 %v2183_v50, %v711_v30  ;;  %v878_v17 = vmul.f32 %v2187_v2, %v3189_v24  ;;  %v559_v36 = vadd.f32 1e-05, %v527_v37  ;;  %vm884_vm8 = vweird.f32 %v2187_v2  ;;  %v1167_v48 = vpop.f32.mrf.mxu3 }
 0x276   :  { %v892_v54 = vmul.f32 %v2185_v22, %v891_v38  ;;  %vm885_vm10 = vmor %vm883_vm9, %vm884_vm8  ;;  %v3253_v59 = vadd.f32 %v1167_v48, %v3144_v21 }
 0x277   :  { %v716_v20 = vsel %vm3216_vm4, %v2183_v50, %v712_v53  ;;  %v879_v55 = vmul.f32 %v2187_v2, %v878_v17  ;;  %2188 = vrsqrt.f32 %v559_v36  ;;  %v1127_v51 = vpop.f32.mrf.mxu1  ;;  %vm723_vm12 = vweird.f32 %v559_v36 }
 0x278   :  { %v910_v12 = vmul.f32 %v716_v20, %v2988_v41  ;;  %v896_v45 = vsel %vm895_vm7, %v2185_v22, %v892_v54  ;;  %v3229_v29 = vadd.f32 %v1127_v51, %v3144_v21  ;;  %v1007_v22 = vmax.f32 %v975_v32, 0.0 }
 0x279   :  { %v880_v0 = vmul.f32 0.5, %v879_v55  ;;  %v480_v47 = vpop.xlane.xlu0 %479  ;;  %v928_v50 = vmul.f32 %v896_v45, %v2994_v19 }
 0x27a   :  { %v528_v4 = vmul.f32 %v480_v47, %v2556_v42  ;;  %v943_v14 = vmul.f32 %v2750_v18, %v910_v12  ;;  %1233 = vadd.xlane.f32.xlu1 %v3225_v31  ;;  %1205 = vadd.xlane.f32.xlu2 %v3229_v29 }
 0x27b   :  { %v881_v40 = vsub.f32 1.5, %v880_v0  ;;  %v961_v9 = vmul.f32 %v2750_v18, %v928_v50 }
 0x27c   :  { %v560_v62 = vadd.f32 1e-05, %v528_v4  ;;  %v976_v33 = vadd.f32 %v2775_v15, %v943_v14 }
 0x27d   :  { %v882_v41 = vmul.f32 %v2187_v2, %v881_v40  ;;  %v2189_v52 = vpop.eup %2188  ;;  %v994_v16 = vadd.f32 %v2775_v15, %v961_v9  ;;  %v1169_v58 = vpop.f32.mrf.mxu3 }
 0x27e   :  { %2190 = vrsqrt.f32 %v560_v62  ;;  %v718_v44 = vmul.f32 %v2189_v52, %v559_v36  ;;  %v1008_v43 = vmax.f32 %v976_v33, 0.0  ;;  %vm724_vm11 = vweird.f32 %v2189_v52 }
 0x27f   :  { %v886_v60 = vsel %vm885_vm10, %v2187_v2, %v882_v41  ;;  %v1129_v34 = vpop.f32.mrf.mxu1  ;;  %v1026_v7 = vmax.f32 %v994_v16, 0.0  ;;  %vm725_vm13 = vmor %vm723_vm12, %vm724_vm11  ;;  %vm733_vm15 = vweird.f32 %v560_v62  ;;  %v3264_v47 = vadd.f32 %v1169_v58, %v3144_v21 }
 0x280   :  { %v927_v19 = vmul.f32 %v886_v60, %v3022_v5  ;;  %v719_v6 = vmul.f32 %v2189_v52, %v718_v44  ;;  %v1033_v35 = vpack.c.bf16 %v1008_v43, %v1007_v22  ;;  %v3245_v24 = vadd.f32 %v1129_v34, %v3144_v21 }
 0x282   :  { %v960_v57 = vmul.f32 %v2750_v18, %v927_v19  ;;  %v720_v25 = vmul.f32 0.5, %v719_v6  ;;  %1146 = vmatmul.bf16.gmra.mxu1 %v1033_v35  ;;  %1235 = vadd.xlane.f32.xlu2 %v3242_v1 }
 0x283   :  { %1207 = vadd.xlane.f32.xlu0 %v3245_v24 }
 0x284   :  { %v2191_v61 = vpop.eup %2190  ;;  %v993_v5 = vadd.f32 %v2775_v15, %v960_v57  ;;  %v721_v10 = vsub.f32 1.5, %v720_v25 }
 0x285   :  { %v728_v30 = vmul.f32 %v2191_v61, %v560_v62  ;;  %vm734_vm14 = vweird.f32 %v2191_v61 }
 0x286   :  { %v1025_v27 = vmax.f32 %v993_v5, 0.0  ;;  %v722_v49 = vmul.f32 %v2189_v52, %v721_v10  ;;  %vm735_vm0 = vmor %vm733_vm15, %vm734_vm14 }
 0x287   :  { %v729_v2 = vmul.f32 %v2191_v61, %v728_v30  ;;  %v1132_v17 = vpop.f32.mrf.mxu1 }
 0x288   :  { %v1042_v13 = vpack.c.bf16 %v1026_v7, %v1025_v27  ;;  %v726_v37 = vsel %vm725_vm13, %v2189_v52, %v722_v49  ;;  %v3256_v38 = vadd.f32 %v1132_v17, %v3144_v21 }
 0x289   :  { %v730_v53 = vmul.f32 0.5, %v729_v2  ;;  %v911_v20 = vmul.f32 %v726_v37, %v3079_v3 }
 0x28a   :  { %1191 = vmatmul.bf16.gmra.mxu3 %v1042_v13  ;;  %1209 = vadd.xlane.f32.xlu1 %v3256_v38 }
 0x28b   :  { %v731_v55 = vsub.f32 1.5, %v730_v53  ;;  %1237 = vadd.xlane.f32.xlu0 %v3253_v59  ;;  %v944_v26 = vmul.f32 %v2750_v18, %v911_v20  ;;  %v1172_v4 = vpop.f32.mrf.mxu3 }
 0x28c   :  { %v3275_v62 = vadd.f32 %v1172_v4, %v3144_v21 }
 0x28d   :  { %v732_v36 = vmul.f32 %v2191_v61, %v731_v55  ;;  %v977_v45 = vadd.f32 %v2775_v15, %v944_v26 }
 0x28f   :  { %v736_v54 = vsel %vm735_vm0, %v2191_v61, %v732_v36  ;;  %v1134_v51 = vpop.f32.mrf.mxu1  ;;  %v1009_v14 = vmax.f32 %v977_v45, 0.0 }
 0x290   :  { %v912_v0 = vmul.f32 %v736_v54, %v3098_v23  ;;  %v3267_v3 = vadd.f32 %v1134_v51, %v3144_v21 }
 0x292   :  { %v945_v12 = vmul.f32 %v2750_v18, %v912_v0  ;;  %1239 = vadd.xlane.f32.xlu1 %v3264_v47  ;;  %1211 = vadd.xlane.f32.xlu2 %v3267_v3 }
 0x293   :  { %v1174_v18 = vpop.f32.mrf.mxu3 }
 0x294   :  { %v978_v40 = vadd.f32 %v2775_v15, %v945_v12  ;;  %v3283_v52 = vadd.f32 %v1174_v18, %v3144_v21 }
 0x296   :  { %v1010_v23 = vmax.f32 %v978_v40, 0.0 }
 0x297   :  { %v1137_v50 = vpop.f32.mrf.mxu1 }
 0x298   :  { %v1034_v32 = vpack.c.bf16 %v1010_v23, %v1009_v14  ;;  %v3278_v41 = vadd.f32 %v1137_v50, %v3144_v21 }
 0x29a   :  { %1151 = vmatmul.bf16.gmra.mxu1 %v1034_v32  ;;  %1241 = vadd.xlane.f32.xlu2 %v3275_v62 }
 0x29b   :  { %1213 = vadd.xlane.f32.xlu0 %v3278_v41  ;;  %v1177_v9 = vpop.f32.mrf.mxu3 }
 0x29c   :  { %v3291_v60 = vadd.f32 %v1177_v9, %v3144_v21 }
 0x29f   :  { %v1139_v33 = vpop.f32.mrf.mxu1 }
 0x2a0   :  { %v3286_v15 = vadd.f32 %v1139_v33, %v3144_v21 }
 0x2a2   :  { %1215 = vadd.xlane.f32.xlu1 %v3286_v15 }
 0x2a3   :  { %1243 = vadd.xlane.f32.xlu0 %v3283_v52  ;;  %v1179_v43 = vpop.f32.mrf.mxu3 }
 0x2a4   :  { %v3299_v6 = vadd.f32 %v1179_v43, %v3144_v21 }
 0x2aa   :  { %1245 = vadd.xlane.f32.xlu1 %v3291_v60 }
 0x2bd   :  { %v1198_v37 = vpop.xlane.xlu1 %1197 }
 0x2be   :  { %v1261_v51 = vmul.f32 %v1198_v37, %v2556_v42 }
 0x2c5   :  { %v1200_v36 = vpop.xlane.xlu2 %1199 }
 0x2c6   :  { %v1262_v50 = vmul.f32 %v1200_v36, %v2556_v42 }
 0x2cd   :  { %v1230_v32 = vpop.xlane.xlu2 %1229 }
 0x2d5   :  { %v1182_v34 = vpop.f32.mrf.mxu3 }
 0x2d6   :  { %v3307_v35 = vadd.f32 %v1182_v34, %v3144_v21 }
 0x2d7   :  { %v1142_v44 = vpop.f32.mrf.mxu1 }
 0x2d8   :  { %v3295_v22 = vadd.f32 %v1142_v44, %v3144_v21 }
 0x2da   :  { %1217 = vadd.xlane.f32.xlu2 %v3295_v22 }
 0x2dd   :  { %v1184_v57 = vpop.f32.mrf.mxu3  ;;  %v1202_v49 = vpop.xlane.xlu0 %1201 }
 0x2de   :  { %v3315_v30 = vadd.f32 %v1184_v57, %v3144_v21  ;;  %v1263_v55 = vmul.f32 %v1202_v49, %v2556_v42 }
 0x2df   :  { %v1144_v19 = vpop.f32.mrf.mxu1 }
 0x2e0   :  { %v3302_v48 = vadd.f32 %v1144_v19, %v3144_v21  ;;  %v3336_v26 = vsub.f32 %v3183_v8, %v1263_v55  ;;  %v3351_v8 = vsub.f32 %v3151_v46, %v1261_v51 }
 0x2e2   :  { %1219 = vadd.xlane.f32.xlu0 %v3302_v48  ;;  %1247 = vadd.xlane.f32.xlu2 %v3299_v6  ;;  %v1327_v40 = vmul.f32 %v3336_v26, %v3336_v26  ;;  %v1325_v9 = vmul.f32 %v3351_v8, %v3351_v8 }
 0x2e5   :  { %v1232_v58 = vpop.xlane.xlu0 %1231  ;;  %v1204_v54 = vpop.xlane.xlu1 %1203 }
 0x2e6   :  { %v1278_v4 = vmul.f32 %v1232_v58, %v2556_v42  ;;  %v1264_v18 = vmul.f32 %v1204_v54, %v2556_v42 }
 0x2e8   :  { %v3354_v23 = vsub.f32 %v3205_v11, %v1278_v4  ;;  %v3368_v11 = vsub.f32 %v3161_v63, %v1262_v50  ;;  %v3371_v19 = vsub.f32 %v3208_v39, %v1264_v18 }
 0x2ea   :  { %1249 = vadd.xlane.f32.xlu0 %v3307_v35  ;;  %v1342_v46 = vmul.f32 %v3354_v23, %v3354_v23 }
 0x2ed   :  { %v1234_v44 = vpop.xlane.xlu1 %1233  ;;  %v1206_v57 = vpop.xlane.xlu2 %1205 }
 0x2f5   :  { %v1236_v54 = vpop.xlane.xlu2 %1235 }
 0x2f6   :  { %v1208_v14 = vpop.xlane.xlu0 %1207 }
 0x2f7   :  { %v1187_v16 = vpop.f32.mrf.mxu3  ;;  %v1266_v43 = vmul.f32 %v1208_v14, %v2556_v42  ;;  %v1280_v14 = vmul.f32 %v1236_v54, %v2556_v42 }
 0x2f8   :  { %v3323_v2 = vadd.f32 %v1187_v16, %v3144_v21  ;;  %v1277_v16 = vmul.f32 %v1230_v32, %v2556_v42 }
 0x2f9   :  { %v3374_v34 = vsub.f32 %v3245_v24, %v1266_v43 }
 0x2fa   :  { %v3386_v24 = vsub.f32 %v3170_v56, %v1277_v16 }
 0x2fb   :  { %v1330_v39 = vmul.f32 %v3374_v34, %v3374_v34 }
 0x2fc   :  { %v1341_v58 = vmul.f32 %v3386_v24, %v3386_v24 }
 0x2ff   :  { %v1147_v25 = vpop.f32.mrf.mxu1  ;;  %v1189_v5 = vpop.f32.mrf.mxu3 }
 0x300   :  { %v3311_v61 = vadd.f32 %v1147_v25, %v3144_v21  ;;  %v3340_v12 = vadd.f32 %v1189_v5, %v3144_v21  ;;  %v1279_v25 = vmul.f32 %v1234_v44, %v2556_v42  ;;  %v1326_v5 = vmul.f32 %v3368_v11, %v3368_v11 }
 0x301   :  { %v3422_v44 = vsub.f32 %v3242_v1, %v1280_v14 }
 0x302   :  { %1221 = vadd.xlane.f32.xlu1 %v3311_v61  ;;  %v3389_v49 = vsub.f32 %v3225_v31, %v1279_v25 }
 0x303   :  { %v1344_v16 = vmul.f32 %v3422_v44, %v3422_v44 }
 0x304   :  { %v1343_v36 = vmul.f32 %v3389_v49, %v3389_v49 }
 0x307   :  { %v1149_v10 = vpop.f32.mrf.mxu1 }
 0x308   :  { %v3318_v27 = vadd.f32 %v1149_v10, %v3144_v21  ;;  %v1328_v10 = vmul.f32 %v3371_v19, %v3371_v19 }
 0x30a   :  { %1223 = vadd.xlane.f32.xlu2 %v3318_v27  ;;  %1251 = vadd.xlane.f32.xlu1 %v3315_v30 }
 0x30d   :  { %v1192_v7 = vpop.f32.mrf.mxu3 }
 0x30e   :  { %v3359_v33 = vadd.f32 %v1192_v7, %v3144_v21  ;;  %v1210_v7 = vpop.xlane.xlu1 %1209 }
 0x30f   :  { %v1267_v55 = vmul.f32 %v1210_v7, %v2556_v42 }
 0x311   :  { %v3407_v51 = vsub.f32 %v3256_v38, %v1267_v55 }
 0x312   :  { %1253 = vadd.xlane.f32.xlu2 %v3323_v2 }
 0x313   :  { %v1331_v18 = vmul.f32 %v3407_v51, %v3407_v51 }
 0x315   :  { %v1194_v13 = vpop.f32.mrf.mxu3 }
 0x316   :  { %v3327_v17 = vadd.f32 %v1194_v13, %v3144_v21 }
 0x317   :  { %v1152_v53 = vpop.f32.mrf.mxu1 }
 0x318   :  { %v3330_v20 = vadd.f32 %v1152_v53, %v3144_v21  ;;  %v1265_v53 = vmul.f32 %v1206_v57, %v2556_v42 }
 0x31a   :  { %1225 = vadd.xlane.f32.xlu0 %v3330_v20  ;;  %1259 = vadd.xlane.f32.xlu2 %v3327_v17 }
 0x31f   :  { %v1154_v0 = vpop.f32.mrf.mxu1 }
 0x320   :  { %v3343_v45 = vadd.f32 %v1154_v0, %v3144_v21  ;;  %v1238_v21 = vpop.xlane.xlu0 %1237  ;;  %v3404_v0 = vsub.f32 %v3229_v29, %v1265_v53 }
 0x321   :  { %v1281_v63 = vmul.f32 %v1238_v21, %v2556_v42 }
 0x322   :  { %1255 = vadd.xlane.f32.xlu0 %v3340_v12  ;;  %1227 = vadd.xlane.f32.xlu1 %v3343_v45  ;;  %v1329_v50 = vmul.f32 %v3404_v0, %v3404_v0 }
 0x323   :  { %1361 = vadd.xlane.f32.xlu2 %v1327_v40  ;;  %v3392_v37 = vsub.f32 %v3253_v59, %v1281_v63  ;;  %v1240_v59 = vpop.xlane.xlu1 %1239 }
 0x324   :  { %v1282_v32 = vmul.f32 %v1240_v59, %v2556_v42 }
 0x325   :  { %v1345_v31 = vmul.f32 %v3392_v37, %v3392_v37 }
 0x326   :  { %v3425_v43 = vsub.f32 %v3264_v47, %v1282_v32 }
 0x328   :  { %v1214_v13 = vpop.xlane.xlu0 %1213  ;;  %v1346_v25 = vmul.f32 %v3425_v43, %v3425_v43 }
 0x329   :  { %v1269_v56 = vmul.f32 %v1214_v13, %v2556_v42 }
 0x32a   :  { %1257 = vadd.xlane.f32.xlu1 %v3359_v33  ;;  %1357 = vadd.xlane.f32.xlu0 %v1325_v9  ;;  %v1212_v9 = vpop.xlane.xlu2 %1211 }
 0x32b   :  { %1391 = vadd.xlane.f32.xlu2 %v1342_v46  ;;  %v3410_v4 = vsub.f32 %v3278_v41, %v1269_v56  ;;  %v1216_v41 = vpop.xlane.xlu1 %1215  ;;  %v1268_v21 = vmul.f32 %v1212_v9, %v2556_v42 }
 0x32c   :  { %v1270_v57 = vmul.f32 %v1216_v41, %v2556_v42 }
 0x32d   :  { %v1333_v38 = vmul.f32 %v3410_v4, %v3410_v4 }
 0x330   :  { %v1244_v40 = vpop.xlane.xlu0 %1243 }
 0x331   :  { %v1284_v29 = vmul.f32 %v1244_v40, %v2556_v42 }
 0x332   :  { %1359 = vadd.xlane.f32.xlu1 %v1326_v5  ;;  %1363 = vadd.xlane.f32.xlu0 %v1328_v10  ;;  %v1242_v47 = vpop.xlane.xlu2 %1241  ;;  %v3442_v5 = vsub.f32 %v3286_v15, %v1270_v57 }
 0x333   :  { %1367 = vadd.xlane.f32.xlu2 %v1330_v39  ;;  %v3428_v46 = vsub.f32 %v3283_v52, %v1284_v29  ;;  %v3439_v52 = vsub.f32 %v3267_v3, %v1268_v21  ;;  %v1246_v10 = vpop.xlane.xlu1 %1245  ;;  %v1283_v63 = vmul.f32 %v1242_v47, %v2556_v42 }
 0x334   :  { %v1285_v7 = vmul.f32 %v1246_v10, %v2556_v42  ;;  %v1334_v13 = vmul.f32 %v3442_v5, %v3442_v5 }
 0x335   :  { %v1348_v1 = vmul.f32 %v3428_v46, %v3428_v46  ;;  %v1332_v39 = vmul.f32 %v3439_v52, %v3439_v52  ;;  %v3451_v3 = vsub.f32 %v3275_v62, %v1283_v63 }
 0x336   :  { %v3454_v15 = vsub.f32 %v3291_v60, %v1285_v7 }
 0x337   :  { %v1347_v56 = vmul.f32 %v3451_v3, %v3451_v3 }
 0x33a   :  { %1389 = vadd.xlane.f32.xlu1 %v1341_v58  ;;  %1393 = vadd.xlane.f32.xlu0 %v1343_v36 }
 0x33b   :  { %1397 = vadd.xlane.f32.xlu2 %v1345_v31  ;;  %v1349_v31 = vmul.f32 %v3454_v15, %v3454_v15 }
 0x342   :  { %1365 = vadd.xlane.f32.xlu1 %v1329_v50  ;;  %1369 = vadd.xlane.f32.xlu0 %v1331_v18 }
 0x343   :  { %1373 = vadd.xlane.f32.xlu2 %v1333_v38 }
 0x34a   :  { %1395 = vadd.xlane.f32.xlu1 %v1344_v16  ;;  %1399 = vadd.xlane.f32.xlu0 %v1346_v25 }
 0x34b   :  { %1403 = vadd.xlane.f32.xlu2 %v1348_v1 }
 0x34d   :  { %v1218_v53 = vpop.xlane.xlu2 %1217 }
 0x34e   :  { %v1271_v54 = vmul.f32 %v1218_v53, %v2556_v42 }
 0x350   :  { %v3468_v60 = vsub.f32 %v3295_v22, %v1271_v54 }
 0x352   :  { %1371 = vadd.xlane.f32.xlu1 %v1332_v39  ;;  %1375 = vadd.xlane.f32.xlu0 %v1334_v13  ;;  %v1335_v50 = vmul.f32 %v3468_v60, %v3468_v60 }
 0x355   :  { %v1220_v55 = vpop.xlane.xlu0 %1219 }
 0x356   :  { %v1272_v58 = vmul.f32 %v1220_v55, %v2556_v42 }
 0x358   :  { %v3458_v36 = vsub.f32 %v3302_v48, %v1272_v58  ;;  %v1248_v48 = vpop.xlane.xlu2 %1247 }
 0x359   :  { %v1286_v32 = vmul.f32 %v1248_v48, %v2556_v42 }
 0x35a   :  { %v1336_v62 = vmul.f32 %v3458_v36, %v3458_v36  ;;  %1401 = vadd.xlane.f32.xlu1 %v1347_v56  ;;  %1405 = vadd.xlane.f32.xlu0 %v1349_v31 }
 0x35b   :  { %v3480_v22 = vsub.f32 %v3299_v6, %v1286_v32 }
 0x35c   :  { %1379 = vadd.xlane.f32.xlu2 %v1336_v62 }
 0x35d   :  { %v1250_v59 = vpop.xlane.xlu0 %1249  ;;  %v1350_v9 = vmul.f32 %v3480_v22, %v3480_v22 }
 0x35e   :  { %v1287_v40 = vmul.f32 %v1250_v59, %v2556_v42 }
 0x360   :  { %v3472_v14 = vsub.f32 %v3307_v35, %v1287_v40 }
 0x362   :  { %v1351_v18 = vmul.f32 %v3472_v14, %v3472_v14  ;;  %1377 = vadd.xlane.f32.xlu1 %v1335_v50 }
 0x364   :  { %1409 = vadd.xlane.f32.xlu2 %v1351_v18 }
 0x36a   :  { %1407 = vadd.xlane.f32.xlu1 %v1350_v9 }
 0x375   :  { %v1222_v29 = vpop.xlane.xlu1 %1221 }
 0x376   :  { %v1273_v35 = vmul.f32 %v1222_v29, %v2556_v42 }
 0x378   :  { %v3486_v38 = vsub.f32 %v3311_v61, %v1273_v35 }
 0x37a   :  { %v1337_v41 = vmul.f32 %v3486_v38, %v3486_v38 }
 0x37c   :  { %1381 = vadd.xlane.f32.xlu0 %v1337_v41 }
 0x37d   :  { %v1224_v21 = vpop.xlane.xlu2 %1223  ;;  %v1252_v57 = vpop.xlane.xlu1 %1251 }
 0x37e   :  { %v1274_v16 = vmul.f32 %v1224_v21, %v2556_v42  ;;  %v1288_v6 = vmul.f32 %v1252_v57, %v2556_v42 }
 0x380   :  { %v3493_v25 = vsub.f32 %v3318_v27, %v1274_v16  ;;  %v3496_v1 = vsub.f32 %v3315_v30, %v1288_v6 }
 0x382   :  { %v1338_v61 = vmul.f32 %v3493_v25, %v3493_v25  ;;  %v1352_v47 = vmul.f32 %v3496_v1, %v3496_v1 }
 0x384   :  { %1383 = vadd.xlane.f32.xlu1 %v1338_v61  ;;  %1411 = vadd.xlane.f32.xlu0 %v1352_v47 }
 0x385   :  { %v1254_v10 = vpop.xlane.xlu2 %1253 }
 0x386   :  { %v1289_v63 = vmul.f32 %v1254_v10, %v2556_v42 }
 0x388   :  { %v3504_v7 = vsub.f32 %v3323_v2, %v1289_v63 }
 0x38a   :  { %v1353_v27 = vmul.f32 %v3504_v7, %v3504_v7 }
 0x38c   :  { %1413 = vadd.xlane.f32.xlu1 %v1353_v27 }
 0x38d   :  { %v1226_v30 = vpop.xlane.xlu0 %1225  ;;  %v1260_v39 = vpop.xlane.xlu2 %1259 }
 0x38e   :  { %v1275_v13 = vmul.f32 %v1226_v30, %v2556_v42  ;;  %v1292_v53 = vmul.f32 %v1260_v39, %v2556_v42 }
 0x390   :  { %v3511_v55 = vsub.f32 %v3330_v20, %v1275_v13  ;;  %v3514_v58 = vsub.f32 %v3327_v17, %v1292_v53 }
 0x392   :  { %v1339_v2 = vmul.f32 %v3511_v55, %v3511_v55  ;;  %v1356_v54 = vmul.f32 %v3514_v58, %v3514_v58 }
 0x394   :  { %1385 = vadd.xlane.f32.xlu2 %v1339_v2  ;;  %1419 = vadd.xlane.f32.xlu1 %v1356_v54 }
 0x395   :  { %v1256_v56 = vpop.xlane.xlu0 %1255  ;;  %v1228_v31 = vpop.xlane.xlu1 %1227 }
 0x396   :  { %v1290_v62 = vmul.f32 %v1256_v56, %v2556_v42  ;;  %v1362_v59 = vpop.xlane.xlu2 %1361  ;;  %v1276_v48 = vmul.f32 %v1228_v31, %v2556_v42 }
 0x397   :  { %v1423_v20 = vmul.f32 %v1362_v59, %v2556_v42 }
 0x398   :  { %v3524_v17 = vsub.f32 %v3340_v12, %v1290_v62  ;;  %v3527_v40 = vsub.f32 %v3343_v45, %v1276_v48 }
 0x399   :  { %v1455_v32 = vadd.f32 1e-05, %v1423_v20 }
 0x39a   :  { %v1354_v50 = vmul.f32 %v3524_v17, %v3524_v17  ;;  %v1340_v18 = vmul.f32 %v3527_v40, %v3527_v40 }
 0x39b   :  { %2192 = vrsqrt.f32 %v1455_v32  ;;  %vm1511_vm2 = vweird.f32 %v1455_v32 }
 0x39c   :  { %1415 = vadd.xlane.f32.xlu2 %v1354_v50  ;;  %1387 = vadd.xlane.f32.xlu0 %v1340_v18  ;;  %v3556_v18 = vperm.slane %v3141_v28, 4 }
 0x39d   :  { %v1358_v9 = vpop.xlane.xlu0 %1357  ;;  %v1258_v29 = vpop.xlane.xlu1 %1257 }
 0x39e   :  { %v1392_v35 = vpop.xlane.xlu2 %1391  ;;  %v1421_v41 = vmul.f32 %v1358_v9, %v2556_v42  ;;  %v1291_v12 = vmul.f32 %v1258_v29, %v2556_v42 }
 0x39f   :  { %v1438_v45 = vmul.f32 %v1392_v35, %v2556_v42 }
 0x3a0   :  { %v1453_v21 = vadd.f32 1e-05, %v1421_v41  ;;  %v3537_v57 = vsub.f32 %v3359_v33, %v1291_v12  ;;  %v3561_v41 = vperm.slane %v3141_v28, 5 }
 0x3a1   :  { %v2193_v16 = vpop.eup %2192  ;;  %v3539_v6 = vadd.f32 1e-05, %v1438_v45 }
 0x3a2   :  { %v1506_v61 = vmul.f32 %v2193_v16, %v1455_v32  ;;  %2194 = vrsqrt.f32 %v1453_v21  ;;  %v1355_v47 = vmul.f32 %v3537_v57, %v3537_v57  ;;  %vm1512_vm1 = vweird.f32 %v2193_v16 }
 0x3a3   :  { %2196 = vrsqrt.f32 %v3539_v6  ;;  %vm1513_vm3 = vmor %vm1511_vm2, %vm1512_vm1  ;;  %vm1491_vm4 = vweird.f32 %v1453_v21  ;;  %vm1661_vm6 = vweird.f32 %v3539_v6 }
 0x3a4   :  { %v1507_v10 = vmul.f32 %v2193_v16, %v1506_v61  ;;  %1417 = vadd.xlane.f32.xlu0 %v1355_v47 }
 0x3a5   :  { %v1364_v63 = vpop.xlane.xlu0 %1363  ;;  %v1360_v27 = vpop.xlane.xlu1 %1359 }
 0x3a6   :  { %v1508_v30 = vmul.f32 0.5, %v1507_v10  ;;  %v1368_v39 = vpop.xlane.xlu2 %1367  ;;  %v1424_v13 = vmul.f32 %v1364_v63, %v2556_v42  ;;  %v1422_v33 = vmul.f32 %v1360_v27, %v2556_v42 }
 0x3a7   :  { %v1426_v53 = vmul.f32 %v1368_v39, %v2556_v42 }
 0x3a8   :  { %v2195_v2 = vpop.eup %2194  ;;  %v1509_v54 = vsub.f32 1.5, %v1508_v30  ;;  %v3547_v56 = vadd.f32 1e-05, %v1424_v13  ;;  %v3549_v31 = vadd.f32 1e-05, %v1422_v33 }
 0x3a9   :  { %v2197_v62 = vpop.eup %2196  ;;  %v1486_v59 = vmul.f32 %v2195_v2, %v1453_v21  ;;  %v3551_v48 = vadd.f32 1e-05, %v1426_v53  ;;  %vm1492_vm5 = vweird.f32 %v2195_v2 }
 0x3aa   :  { %v1510_v20 = vmul.f32 %v2193_v16, %v1509_v54  ;;  %v1656_v50 = vmul.f32 %v2197_v62, %v3539_v6  ;;  %2198 = vrsqrt.f32 %v3547_v56  ;;  %vm1662_vm7 = vweird.f32 %v2197_v62  ;;  %vm1493_vm9 = vmor %vm1491_vm4, %vm1492_vm5 }
 0x3ab   :  { %v1487_v9 = vmul.f32 %v2195_v2, %v1486_v59  ;;  %2200 = vrsqrt.f32 %v3551_v48  ;;  %vm1521_vm8 = vweird.f32 %v3547_v56  ;;  %vm1541_vm10 = vweird.f32 %v3551_v48  ;;  %vm1663_vm11 = vmor %vm1661_vm6, %vm1662_vm7 }
 0x3ac   :  { %v1514_v29 = vsel %vm1513_vm3, %v2193_v16, %v1510_v20  ;;  %v1657_v35 = vmul.f32 %v2197_v62, %v1656_v50  ;;  %2202 = vrsqrt.f32 %v3549_v31  ;;  %vm1501_vm0 = vweird.f32 %v3549_v31 }
 0x3ad   :  { %v1807_v32 = vmul.f32 %v1514_v29, %v3336_v26  ;;  %v1488_v12 = vmul.f32 0.5, %v1487_v9  ;;  %v1394_v45 = vpop.xlane.xlu0 %1393  ;;  %v1390_v61 = vpop.xlane.xlu1 %1389 }
 0x3ae   :  { %v1658_v47 = vmul.f32 0.5, %v1657_v35  ;;  %v1398_v10 = vpop.xlane.xlu2 %1397  ;;  %v1439_v63 = vmul.f32 %v1394_v45, %v2556_v42  ;;  %v1437_v26 = vmul.f32 %v1390_v61, %v2556_v42  ;;  %v2257_v35 = vld [vmem:[#allocation2 + $0x10] sm:$0xff] }
 0x3af   :  { %v1840_v27 = vmul.f32 %v3556_v18, %v1807_v32  ;;  %v1489_v30 = vsub.f32 1.5, %v1488_v12  ;;  %v1441_v16 = vmul.f32 %v1398_v10, %v2556_v42 }
 0x3b0   :  { %v3567_v39 = vpop.eup %2198  ;;  %v1659_v28 = vsub.f32 1.5, %v1658_v47  ;;  %v3585_v29 = vadd.f32 1e-05, %v1439_v63 }
 0x3b1   :  { %v3571_v13 = vpop.eup %2200  ;;  %v1873_v33 = vadd.f32 %v3561_v41, %v1840_v27  ;;  %v1490_v53 = vmul.f32 %v2195_v2, %v1489_v30  ;;  %v1516_v54 = vmul.f32 %v3567_v39, %v3547_v56  ;;  %v3583_v9 = vadd.f32 1e-05, %v1441_v16 }
 0x3b2   :  { %v3577_v59 = vpop.eup %2202  ;;  %v1660_v20 = vmul.f32 %v2197_v62, %v1659_v28  ;;  %v1536_v50 = vmul.f32 %v3571_v13, %v3551_v48  ;;  %v3595_v27 = vadd.f32 1e-05, %v1437_v26  ;;  %vm1522_vm12 = vweird.f32 %v3567_v39 }
 0x3b3   :  { %v1905_v32 = vadd.f32 %v2257_v35, %v1873_v33  ;;  %v1494_v12 = vsel %vm1493_vm9, %v2195_v2, %v1490_v53  ;;  %v1517_v45 = vmul.f32 %v3567_v39, %v1516_v54  ;;  %v1496_v21 = vmul.f32 %v3577_v59, %v3549_v31  ;;  %vm1523_vm15 = vmor %vm1521_vm8, %vm1522_vm12 }
 0x3b4   :  { %v1664_v61 = vsel %vm1663_vm11, %v2197_v62, %v1660_v20  ;;  %v1805_v47 = vmul.f32 %v1494_v12, %v3351_v8  ;;  %v1537_v10 = vmul.f32 %v3571_v13, %v1536_v50  ;;  %2204 = vrsqrt.f32 %v3583_v9  ;;  %v2258_v12 = vld [vmem:[#allocation2] sm:$0xff] }
 0x3b5   :  { %v1937_v63 = vmax.f32 %v1905_v32, 0.0  ;;  %v1822_v30 = vmul.f32 %v1664_v61, %v3354_v23  ;;  %v1518_v16 = vmul.f32 0.5, %v1517_v45  ;;  %v1497_v6 = vmul.f32 %v3577_v59, %v1496_v21  ;;  %v1370_v28 = vpop.xlane.xlu0 %1369  ;;  %v1366_v2 = vpop.xlane.xlu1 %1365 }
 0x3b6   :  { %v1838_v33 = vmul.f32 %v3556_v18, %v1805_v47  ;;  %v1538_v53 = vmul.f32 0.5, %v1537_v10  ;;  %2206 = vrsqrt.f32 %v3585_v29  ;;  %v1374_v23 = vpop.xlane.xlu2 %1373  ;;  %vm1542_vm13 = vweird.f32 %v3571_v13  ;;  %v2259_v47 = vld [vmem:[#allocation2 + $0x88] sm:$0xff] }
 0x3b7   :  { %1969 = vst [vmem:[#allocation10 + $0x10] sm:$0xff] %v1937_v63  ;;  %v1855_v8 = vmul.f32 %v3556_v18, %v1822_v30  ;;  %v1519_v62 = vsub.f32 1.5, %v1518_v16  ;;  %v1498_v26 = vmul.f32 0.5, %v1497_v6  ;;  %2208 = vrsqrt.f32 %v3595_v27  ;;  %vm1543_vm1 = vmor %vm1541_vm10, %vm1542_vm13 }
 0x3b8   :  { %v1871_v54 = vadd.f32 %v3561_v41, %v1838_v33  ;;  %v1539_v20 = vsub.f32 1.5, %v1538_v53  ;;  %vm1502_vm14 = vweird.f32 %v3577_v59  ;;  %v1429_v61 = vmul.f32 %v1374_v23, %v2556_v42 }
 0x3b9   :  { %v1888_v50 = vadd.f32 %v3561_v41, %v1855_v8  ;;  %v1520_v35 = vmul.f32 %v3567_v39, %v1519_v62  ;;  %v1499_v32 = vsub.f32 1.5, %v1498_v26  ;;  %v1427_v16 = vmul.f32 %v1370_v28, %v2556_v42  ;;  %vm1503_vm2 = vmor %vm1501_vm0, %vm1502_vm14 }
 0x3ba   :  { %v1903_v45 = vadd.f32 %v2258_v12, %v1871_v54  ;;  %v1540_v21 = vmul.f32 %v3571_v13, %v1539_v20  ;;  %v3622_v6 = vpop.eup %2204  ;;  %v3628_v53 = vadd.f32 1e-05, %v1429_v61  ;;  %vm1691_vm3 = vweird.f32 %v3583_v9  ;;  %v2260_v61 = vld [vmem:[#allocation2 + $0x18] sm:$0xff] }
 0x3bb   :  { %v1920_v10 = vadd.f32 %v2259_v47, %v1888_v50  ;;  %v1524_v63 = vsel %vm1523_vm15, %v3567_v39, %v1520_v35  ;;  %v1500_v30 = vmul.f32 %v3577_v59, %v1499_v32  ;;  %v1686_v28 = vmul.f32 %v3622_v6, %v3583_v9 }
 0x3bc   :  { %v1935_v33 = vmax.f32 %v1903_v45, 0.0  ;;  %v1544_v56 = vsel %vm1543_vm1, %v3571_v13, %v1540_v21  ;;  %v1808_v31 = vmul.f32 %v1524_v63, %v3371_v19  ;;  %v3630_v48 = vpop.eup %2206  ;;  %v1425_v54 = vmul.f32 %v1366_v2, %v2556_v42 }
 0x3bd   :  { %v1952_v8 = vmax.f32 %v1920_v10, 0.0  ;;  %v1810_v39 = vmul.f32 %v1544_v56, %v3374_v34  ;;  %v1504_v62 = vsel %vm1503_vm2, %v3577_v59, %v1500_v30  ;;  %v3637_v13 = vpop.eup %2208  ;;  %v1666_v23 = vmul.f32 %v3630_v48, %v3585_v29  ;;  %v1400_v34 = vpop.xlane.xlu0 %1399  ;;  %v2261_v30 = vld [vmem:[#allocation2 + $0x28] sm:$0xff] }
 0x3be   :  { %1967 = vst [vmem:[#allocation10] sm:$0xff] %v1935_v33  ;;  %v1841_v19 = vmul.f32 %v3556_v18, %v1808_v31  ;;  %v1806_v26 = vmul.f32 %v1504_v62, %v3368_v11  ;;  %v1687_v20 = vmul.f32 %v3622_v6, %v1686_v28  ;;  %vm1692_vm4 = vweird.f32 %v3622_v6  ;;  %v3649_v35 = vpop.xlane.xlu1 %1395  ;;  %v2262_v62 = vld [vmem:[#allocation2 + $0x8] sm:$0xff] }
 0x3bf   :  { %1984 = vst [vmem:[#allocation10 + $0x88] sm:$0xff] %v1952_v8  ;;  %v1843_v59 = vmul.f32 %v3556_v18, %v1810_v39  ;;  %v1646_v50 = vmul.f32 %v3637_v13, %v3595_v27  ;;  %v1667_v12 = vmul.f32 %v3630_v48, %v1666_v23  ;;  %vm1672_vm5 = vweird.f32 %v3630_v48  ;;  %v1404_v23 = vpop.xlane.xlu2 %1403  ;;  %vm1693_vm7 = vmor %vm1691_vm3, %vm1692_vm4 }
 0x3c0   :  { %v1874_v11 = vadd.f32 %v3561_v41, %v1841_v19  ;;  %v1839_v32 = vmul.f32 %v3556_v18, %v1806_v26  ;;  %v1688_v45 = vmul.f32 0.5, %v1687_v20  ;;  %2210 = vrsqrt.f32 %v3628_v53 }
 0x3c1   :  { %v1876_v2 = vadd.f32 %v3561_v41, %v1843_v59  ;;  %v1647_v21 = vmul.f32 %v3637_v13, %v1646_v50  ;;  %v1668_v63 = vmul.f32 0.5, %v1667_v12  ;;  %vm1652_vm6 = vweird.f32 %v3637_v13 }
 0x3c2   :  { %v1906_v47 = vadd.f32 %v2260_v61, %v1874_v11  ;;  %v1872_v10 = vadd.f32 %v3561_v41, %v1839_v32  ;;  %v1689_v56 = vsub.f32 1.5, %v1688_v45  ;;  %v3660_v8 = vadd.f32 1e-05, %v1427_v16 }
 0x3c3   :  { %v1908_v33 = vadd.f32 %v2261_v30, %v1876_v2  ;;  %v1648_v31 = vmul.f32 0.5, %v1647_v21  ;;  %v1669_v19 = vsub.f32 1.5, %v1668_v63  ;;  %v3662_v26 = vadd.f32 1e-05, %v1425_v54 }
 0x3c4   :  { %v1938_v39 = vmax.f32 %v1906_v47, 0.0  ;;  %v1904_v28 = vadd.f32 %v2262_v62, %v1872_v10  ;;  %v1690_v20 = vmul.f32 %v3622_v6, %v1689_v56  ;;  %2212 = vrsqrt.f32 %v3660_v8 }
 0x3c5   :  { %v1940_v59 = vmax.f32 %v1908_v33, 0.0  ;;  %v1649_v50 = vsub.f32 1.5, %v1648_v31  ;;  %v1670_v16 = vmul.f32 %v3630_v48, %v1669_v19  ;;  %vm1671_vm8 = vweird.f32 %v3585_v29  ;;  %v1376_v45 = vpop.xlane.xlu0 %1375  ;;  %v2263_v19 = vld [vmem:[#allocation2 + $0xa0] sm:$0xff] }
 0x3c6   :  { %1970 = vst [vmem:[#allocation10 + $0x18] sm:$0xff] %v1938_v39  ;;  %v1936_v11 = vmax.f32 %v1904_v28, 0.0  ;;  %2214 = vrsqrt.f32 %v3662_v26  ;;  %v3673_v54 = vpop.eup %2210  ;;  %v1694_v32 = vsel %vm1693_vm7, %v3622_v6, %v1690_v20  ;;  %vm1673_vm9 = vmor %vm1671_vm8, %vm1672_vm5  ;;  %vm1651_vm10 = vweird.f32 %v3595_v27  ;;  %v1372_v10 = vpop.xlane.xlu1 %1371 }
 0x3c7   :  { %1972 = vst [vmem:[#allocation10 + $0x28] sm:$0xff] %v1940_v59  ;;  %v1650_v12 = vmul.f32 %v3637_v13, %v1649_v50  ;;  %v1444_v9 = vmul.f32 %v1404_v23, %v2556_v42  ;;  %v1825_v2 = vmul.f32 %v1694_v32, %v3392_v37  ;;  %v1674_v29 = vsel %vm1673_vm9, %v3630_v48, %v1670_v16  ;;  %vm1653_vm11 = vmor %vm1651_vm10, %vm1652_vm6 }
 0x3c8   :  { %1968 = vst [vmem:[#allocation10 + $0x8] sm:$0xff] %v1936_v11  ;;  %v1566_v6 = vmul.f32 %v3673_v54, %v3628_v53  ;;  %v1823_v21 = vmul.f32 %v1674_v29, %v3389_v49  ;;  %v1442_v27 = vmul.f32 %v1400_v34, %v2556_v42  ;;  %vm1571_vm12 = vweird.f32 %v3628_v53  ;;  %v2264_v11 = vld [vmem:[#allocation2 + $0x90] sm:$0xff] }
 0x3c9   :  { %v1654_v61 = vsel %vm1653_vm11, %v3637_v13, %v1650_v12  ;;  %v3689_v47 = vadd.f32 1e-05, %v1444_v9  ;;  %v1858_v37 = vmul.f32 %v3556_v18, %v1825_v2  ;;  %vm1551_vm13 = vweird.f32 %v3660_v8  ;;  %v2265_v9 = vld [vmem:[#allocation2 + $0x80] sm:$0xff] }
 0x3ca   :  { %v1821_v48 = vmul.f32 %v1654_v61, %v3386_v24  ;;  %v1567_v63 = vmul.f32 %v3673_v54, %v1566_v6  ;;  %v3695_v30 = vpop.eup %2212  ;;  %v1856_v33 = vmul.f32 %v3556_v18, %v1823_v21  ;;  %v3700_v49 = vadd.f32 1e-05, %v1442_v27 }
 0x3cb   :  { %2216 = vrsqrt.f32 %v3689_v47  ;;  %v1891_v34 = vadd.f32 %v3561_v41, %v1858_v37  ;;  %v1546_v24 = vmul.f32 %v3695_v30, %v3660_v8  ;;  %vm1572_vm14 = vweird.f32 %v3673_v54 }
 0x3cc   :  { %v3702_v13 = vpop.eup %2214  ;;  %v1854_v56 = vmul.f32 %v3556_v18, %v1821_v48  ;;  %v1568_v31 = vmul.f32 0.5, %v1567_v63  ;;  %v1889_v39 = vadd.f32 %v3561_v41, %v1856_v33  ;;  %vm1531_vm15 = vweird.f32 %v3662_v26  ;;  %vm1573_vm1 = vmor %vm1571_vm12, %vm1572_vm14 }
 0x3cd   :  { %v1526_v62 = vmul.f32 %v3702_v13, %v3662_v26  ;;  %v1440_v28 = vmul.f32 %v3649_v35, %v2556_v42  ;;  %v1923_v23 = vadd.f32 %v2263_v19, %v1891_v34  ;;  %v1547_v50 = vmul.f32 %v3695_v30, %v1546_v24 }
 0x3ce   :  { %v1887_v59 = vadd.f32 %v3561_v41, %v1854_v56  ;;  %v1569_v20 = vsub.f32 1.5, %v1568_v31  ;;  %v1921_v16 = vadd.f32 %v2264_v11, %v1889_v39  ;;  %vm1552_vm0 = vweird.f32 %v3695_v30  ;;  %v1406_v56 = vpop.xlane.xlu0 %1405  ;;  %v3737_v53 = vpop.xlane.xlu1 %1401 }
 0x3cf   :  { %v1527_v32 = vmul.f32 %v3702_v13, %v1526_v62  ;;  %2218 = vrsqrt.f32 %v3700_v49  ;;  %v1955_v12 = vmax.f32 %v1923_v23, 0.0  ;;  %v1548_v29 = vmul.f32 0.5, %v1547_v50  ;;  %vm1553_vm4 = vmor %vm1551_vm13, %vm1552_vm0 }
 0x3d0   :  { %v1919_v2 = vadd.f32 %v2265_v9, %v1887_v59  ;;  %v1570_v35 = vmul.f32 %v3673_v54, %v1569_v20  ;;  %v1953_v21 = vmax.f32 %v1921_v16, 0.0  ;;  %v3728_v27 = vadd.f32 1e-05, %v1440_v28 }
 0x3d1   :  { %v3722_v6 = vpop.eup %2216  ;;  %v1528_v61 = vmul.f32 0.5, %v1527_v32  ;;  %v1430_v37 = vmul.f32 %v1376_v45, %v2556_v42  ;;  %1987 = vst [vmem:[#allocation10 + $0xa0] sm:$0xff] %v1955_v12  ;;  %v1549_v33 = vsub.f32 1.5, %v1548_v29  ;;  %vm1532_vm2 = vweird.f32 %v3702_v13  ;;  %v2266_v12 = vld [vmem:[#allocation2 + $0x40] sm:$0xff] }
 0x3d2   :  { %v1951_v48 = vmax.f32 %v1919_v2, 0.0  ;;  %v1574_v63 = vsel %vm1573_vm1, %v3673_v54, %v1570_v35  ;;  %v1716_v34 = vmul.f32 %v3722_v6, %v3689_v47  ;;  %1985 = vst [vmem:[#allocation10 + $0x90] sm:$0xff] %v1953_v21  ;;  %2220 = vrsqrt.f32 %v3728_v27  ;;  %vm1533_vm5 = vmor %vm1531_vm15, %vm1532_vm2 }
 0x3d3   :  { %v1813_v31 = vmul.f32 %v1574_v63, %v3410_v4  ;;  %v1529_v24 = vsub.f32 1.5, %v1528_v61  ;;  %v1550_v45 = vmul.f32 %v3695_v30, %v1549_v33  ;;  %vm1721_vm3 = vweird.f32 %v3689_v47  ;;  %v1380_v47 = vpop.xlane.xlu2 %1379 }
 0x3d4   :  { %1983 = vst [vmem:[#allocation10 + $0x80] sm:$0xff] %v1951_v48  ;;  %v1717_v54 = vmul.f32 %v3722_v6, %v1716_v34  ;;  %v3742_v39 = vadd.f32 1e-05, %v1430_v37  ;;  %v1428_v19 = vmul.f32 %v1372_v10, %v2556_v42  ;;  %v1445_v23 = vmul.f32 %v1406_v56, %v2556_v42 }
 0x3d5   :  { %v3744_v62 = vpop.eup %2218  ;;  %v1846_v4 = vmul.f32 %v3556_v18, %v1813_v31  ;;  %v1530_v28 = vmul.f32 %v3702_v13, %v1529_v24  ;;  %v1554_v59 = vsel %vm1553_vm4, %v3695_v30, %v1550_v45  ;;  %vm1701_vm6 = vweird.f32 %v3700_v49  ;;  %v2267_v31 = vld [vmem:[#allocation2 + $0x30] sm:$0xff] }
 0x3d6   :  { %v1718_v20 = vmul.f32 0.5, %v1717_v54  ;;  %v1696_v50 = vmul.f32 %v3744_v62, %v3700_v49  ;;  %v1811_v11 = vmul.f32 %v1554_v59, %v3407_v51  ;;  %2222 = vrsqrt.f32 %v3742_v39  ;;  %v1378_v54 = vpop.xlane.xlu1 %1377 }
 0x3d7   :  { %v1879_v8 = vadd.f32 %v3561_v41, %v1846_v4  ;;  %v1534_v10 = vsel %vm1533_vm5, %v3702_v13, %v1530_v28  ;;  %vm1722_vm7 = vweird.f32 %v3722_v6  ;;  %v3772_v35 = vadd.f32 1e-05, %v1428_v19  ;;  %v2268_v4 = vld [vmem:[#allocation2 + $0x20] sm:$0xff] }
 0x3d8   :  { %v1809_v30 = vmul.f32 %v1534_v10, %v3404_v0  ;;  %v1719_v16 = vsub.f32 1.5, %v1718_v20  ;;  %v1697_v26 = vmul.f32 %v3744_v62, %v1696_v50  ;;  %v3769_v32 = vpop.eup %2220  ;;  %v1844_v2 = vmul.f32 %v3556_v18, %v1811_v11  ;;  %vm1723_vm8 = vmor %vm1721_vm3, %vm1722_vm7 }
 0x3d9   :  { %v1911_v9 = vadd.f32 %v2266_v12, %v1879_v8  ;;  %v3774_v51 = vadd.f32 1e-05, %v1445_v23  ;;  %v1676_v21 = vmul.f32 %v3769_v32, %v3728_v27  ;;  %vm1702_vm9 = vweird.f32 %v3744_v62 }
 0x3da   :  { %v1842_v13 = vmul.f32 %v3556_v18, %v1809_v30  ;;  %v1720_v29 = vmul.f32 %v3722_v6, %v1719_v16  ;;  %v1698_v0 = vmul.f32 0.5, %v1697_v26  ;;  %v1877_v37 = vadd.f32 %v3561_v41, %v1844_v2  ;;  %vm1703_vm11 = vmor %vm1701_vm6, %vm1702_vm9 }
 0x3db   :  { %v1943_v61 = vmax.f32 %v1911_v9, 0.0  ;;  %2224 = vrsqrt.f32 %v3772_v35  ;;  %v1677_v34 = vmul.f32 %v3769_v32, %v1676_v21  ;;  %vm1681_vm10 = vweird.f32 %v3728_v27 }
 0x3dc   :  { %v1875_v48 = vadd.f32 %v3561_v41, %v1842_v13  ;;  %v1724_v63 = vsel %vm1723_vm8, %v3722_v6, %v1720_v29  ;;  %v1699_v33 = vsub.f32 1.5, %v1698_v0  ;;  %v3788_v56 = vpop.eup %2222  ;;  %v1909_v24 = vadd.f32 %v2267_v31, %v1877_v37  ;;  %v2269_v13 = vld [vmem:[#allocation2 + $0xb8] sm:$0xff] }
 0x3dd   :  { %1975 = vst [vmem:[#allocation10 + $0x40] sm:$0xff] %v1943_v61  ;;  %v1828_v45 = vmul.f32 %v1724_v63, %v3428_v46  ;;  %2226 = vrsqrt.f32 %v3774_v51  ;;  %v1678_v19 = vmul.f32 0.5, %v1677_v34  ;;  %v1576_v23 = vmul.f32 %v3788_v56, %v3742_v39 }
 0x3de   :  { %v1907_v28 = vadd.f32 %v2268_v4, %v1875_v48  ;;  %v1700_v6 = vmul.f32 %v3744_v62, %v1699_v33  ;;  %v1941_v59 = vmax.f32 %v1909_v24, 0.0  ;;  %vm1682_vm12 = vweird.f32 %v3769_v32  ;;  %v1408_v4 = vpop.xlane.xlu1 %1407 }
 0x3df   :  { %v1861_v20 = vmul.f32 %v3556_v18, %v1828_v45  ;;  %vm1581_vm13 = vweird.f32 %v3742_v39  ;;  %v1679_v8 = vsub.f32 1.5, %v1678_v19  ;;  %v1577_v11 = vmul.f32 %v3788_v56, %v1576_v23  ;;  %vm1683_vm15 = vmor %vm1681_vm10, %vm1682_vm12 }
 0x3e0   :  { %v1939_v46 = vmax.f32 %v1907_v28, 0.0  ;;  %v1704_v50 = vsel %vm1703_vm11, %v3744_v62, %v1700_v6  ;;  %1973 = vst [vmem:[#allocation10 + $0x30] sm:$0xff] %v1941_v59  ;;  %v1443_v49 = vmul.f32 %v3737_v53, %v2556_v42  ;;  %v1432_v26 = vmul.f32 %v1380_v47, %v2556_v42 }
 0x3e1   :  { %v3805_v10 = vpop.eup %2224  ;;  %v1894_v30 = vadd.f32 %v3561_v41, %v1861_v20  ;;  %v1826_v16 = vmul.f32 %v1704_v50, %v3425_v43  ;;  %v1680_v12 = vmul.f32 %v3769_v32, %v1679_v8  ;;  %v1578_v9 = vmul.f32 0.5, %v1577_v11 }
 0x3e2   :  { %1971 = vst [vmem:[#allocation10 + $0x20] sm:$0xff] %v1939_v46  ;;  %vm1582_vm14 = vweird.f32 %v3788_v56  ;;  %v1556_v62 = vmul.f32 %v3805_v10, %v3772_v35  ;;  %v3823_v53 = vadd.f32 1e-05, %v1443_v49  ;;  %v3825_v0 = vadd.f32 1e-05, %v1432_v26 }
 0x3e3   :  { %v3816_v2 = vpop.eup %2226  ;;  %v1926_v29 = vadd.f32 %v2269_v13, %v1894_v30  ;;  %v1859_v43 = vmul.f32 %v3556_v18, %v1826_v16  ;;  %v1684_v21 = vsel %vm1683_vm15, %v3769_v32, %v1680_v12  ;;  %v1579_v61 = vsub.f32 1.5, %v1578_v9  ;;  %v2270_v32 = vld [vmem:[#allocation2 + $0xa8] sm:$0xff]  ;;  %vm1583_vm1 = vmor %vm1581_vm13, %vm1582_vm14 }
 0x3e4   :  { %v1557_v37 = vmul.f32 %v3805_v10, %v1556_v62  ;;  %v1726_v48 = vmul.f32 %v3816_v2, %v3774_v51  ;;  %v1824_v34 = vmul.f32 %v1684_v21, %v3422_v44  ;;  %vm1561_vm0 = vweird.f32 %v3772_v35  ;;  %v1410_v44 = vpop.xlane.xlu2 %1409  ;;  %v2272_v21 = vld [vmem:[#allocation2 + $0x48] sm:$0xff] }
 0x3e5   :  { %v1958_v63 = vmax.f32 %v1926_v29, 0.0  ;;  %v1892_v33 = vadd.f32 %v3561_v41, %v1859_v43  ;;  %v1580_v27 = vmul.f32 %v3788_v56, %v1579_v61  ;;  %2228 = vrsqrt.f32 %v3823_v53 }
 0x3e6   :  { %v1558_v31 = vmul.f32 0.5, %v1557_v37  ;;  %v1727_v24 = vmul.f32 %v3816_v2, %v1726_v48  ;;  %v1857_v47 = vmul.f32 %v3556_v18, %v1824_v34  ;;  %vm1562_vm2 = vweird.f32 %v3805_v10 }
 0x3e7   :  { %1990 = vst [vmem:[#allocation10 + $0xb8] sm:$0xff] %v1958_v63  ;;  %v1924_v45 = vadd.f32 %v2270_v32, %v1892_v33  ;;  %2230 = vrsqrt.f32 %v3825_v0  ;;  %v1584_v28 = vsel %vm1583_vm1, %v3788_v56, %v1580_v27  ;;  %vm1732_vm3 = vweird.f32 %v3816_v2  ;;  %v2271_v56 = vld [vmem:[#allocation2 + $0x98] sm:$0xff]  ;;  %vm1563_vm4 = vmor %vm1561_vm0, %vm1562_vm2 }
 0x3e8   :  { %v1559_v6 = vsub.f32 1.5, %v1558_v31  ;;  %v1728_v19 = vmul.f32 0.5, %v1727_v24  ;;  %v1890_v59 = vadd.f32 %v3561_v41, %v1857_v47  ;;  %v1814_v20 = vmul.f32 %v1584_v28, %v3442_v5 }
 0x3e9   :  { %v1956_v23 = vmax.f32 %v1924_v45, 0.0  ;;  %v1431_v39 = vmul.f32 %v1378_v54, %v2556_v42  ;;  %v1447_v8 = vmul.f32 %v1410_v44, %v2556_v42  ;;  %v1446_v11 = vmul.f32 %v1408_v4, %v2556_v42  ;;  %v2273_v45 = vld [vmem:[#allocation2 + $0x38] sm:$0xff] }
 0x3ea   :  { %v1560_v46 = vmul.f32 %v3805_v10, %v1559_v6  ;;  %v1729_v50 = vsub.f32 1.5, %v1728_v19  ;;  %v1922_v30 = vadd.f32 %v2271_v56, %v1890_v59  ;;  %v1847_v16 = vmul.f32 %v3556_v18, %v1814_v20  ;;  %v2274_v19 = vld [vmem:[#allocation2 + $0xc0] sm:$0xff] }
 0x3eb   :  { %1988 = vst [vmem:[#allocation10 + $0xa8] sm:$0xff] %v1956_v23  ;;  %v2229_v5 = vpop.eup %2228  ;;  %vm1731_vm5 = vweird.f32 %v3774_v51  ;;  %v3860_v26 = vadd.f32 1e-05, %v1431_v39  ;;  %v3869_v43 = vadd.f32 1e-05, %v1447_v8  ;;  %vm1711_vm9 = vweird.f32 %v3823_v53 }
 0x3ec   :  { %v1564_v54 = vsel %vm1563_vm4, %v3805_v10, %v1560_v46  ;;  %v1730_v49 = vmul.f32 %v3816_v2, %v1729_v50  ;;  %v1954_v9 = vmax.f32 %v1922_v30, 0.0  ;;  %v1880_v62 = vadd.f32 %v3561_v41, %v1847_v16  ;;  %vm1733_vm6 = vmor %vm1731_vm5, %vm1732_vm3 }
 0x3ed   :  { %v2231_v12 = vpop.eup %2230  ;;  %v1812_v13 = vmul.f32 %v1564_v54, %v3439_v52  ;;  %v1706_v35 = vmul.f32 %v2229_v5, %v3823_v53  ;;  %v3871_v51 = vadd.f32 1e-05, %v1446_v11  ;;  %2232 = vrsqrt.f32 %v3860_v26 }
 0x3ee   :  { %v1734_v29 = vsel %vm1733_vm6, %v3816_v2, %v1730_v49  ;;  %v1596_v10 = vmul.f32 %v2231_v12, %v3825_v0  ;;  %1986 = vst [vmem:[#allocation10 + $0x98] sm:$0xff] %v1954_v9  ;;  %v1912_v61 = vadd.f32 %v2272_v21, %v1880_v62  ;;  %vm1712_vm7 = vweird.f32 %v2229_v5 }
 0x3ef   :  { %v1845_v37 = vmul.f32 %v3556_v18, %v1812_v13  ;;  %v1829_v52 = vmul.f32 %v1734_v29, %v3454_v15  ;;  %v1707_v48 = vmul.f32 %v2229_v5, %v1706_v35  ;;  %v1382_v63 = vpop.xlane.xlu0 %1381  ;;  %2234 = vrsqrt.f32 %v3869_v43  ;;  %vm1713_vm10 = vmor %vm1711_vm9, %vm1712_vm7 }
 0x3f0   :  { %v1597_v33 = vmul.f32 %v2231_v12, %v1596_v10  ;;  %v1944_v34 = vmax.f32 %v1912_v61, 0.0  ;;  %v1433_v32 = vmul.f32 %v1382_v63, %v2556_v42  ;;  %2236 = vrsqrt.f32 %v3871_v51 }
 0x3f1   :  { %v1878_v2 = vadd.f32 %v3561_v41, %v1845_v37  ;;  %v1862_v27 = vmul.f32 %v3556_v18, %v1829_v52  ;;  %v1708_v31 = vmul.f32 0.5, %v1707_v48  ;;  %vm1602_vm8 = vweird.f32 %v2231_v12 }
 0x3f2   :  { %v1598_v24 = vmul.f32 0.5, %v1597_v33  ;;  %1976 = vst [vmem:[#allocation10 + $0x48] sm:$0xff] %v1944_v34  ;;  %v3882_v28 = vadd.f32 1e-05, %v1433_v32  ;;  %vm1601_vm11 = vweird.f32 %v3825_v0  ;;  %vm1591_vm13 = vweird.f32 %v3860_v26  ;;  %v2275_v34 = vld [vmem:[#allocation2 + $0xb0] sm:$0xff] }
 0x3f3   :  { %v1910_v15 = vadd.f32 %v2273_v45, %v1878_v2  ;;  %v1895_v47 = vadd.f32 %v3561_v41, %v1862_v27  ;;  %v1709_v44 = vsub.f32 1.5, %v1708_v31  ;;  %v3885_v20 = vpop.eup %2232  ;;  %vm1603_vm12 = vmor %vm1601_vm11, %vm1602_vm8  ;;  %vm1751_vm14 = vweird.f32 %v3869_v43  ;;  %v2276_v31 = vld [vmem:[#allocation2 + $0x58] sm:$0xff] }
 0x3f4   :  { %v1599_v4 = vsub.f32 1.5, %v1598_v24  ;;  %2238 = vrsqrt.f32 %v3882_v28  ;;  %v1586_v8 = vmul.f32 %v3885_v20, %v3860_v26  ;;  %vm1741_vm15 = vweird.f32 %v3871_v51 }
 0x3f5   :  { %v1942_v6 = vmax.f32 %v1910_v15, 0.0  ;;  %v1927_v23 = vadd.f32 %v2274_v19, %v1895_v47  ;;  %v1710_v59 = vmul.f32 %v2229_v5, %v1709_v44  ;;  %v3894_v56 = vpop.eup %2234  ;;  %vm1592_vm0 = vweird.f32 %v3885_v20 }
 0x3f6   :  { %v1600_v39 = vmul.f32 %v2231_v12, %v1599_v4  ;;  %v3899_v49 = vpop.eup %2236  ;;  %v1587_v9 = vmul.f32 %v3885_v20, %v1586_v8  ;;  %v1746_v62 = vmul.f32 %v3894_v56, %v3869_v43  ;;  %vm1752_vm1 = vweird.f32 %v3894_v56  ;;  %vm1593_vm2 = vmor %vm1591_vm13, %vm1592_vm0 }
 0x3f7   :  { %1974 = vst [vmem:[#allocation10 + $0x38] sm:$0xff] %v1942_v6  ;;  %v1959_v46 = vmax.f32 %v1927_v23, 0.0  ;;  %v1714_v50 = vsel %vm1713_vm10, %v2229_v5, %v1710_v59  ;;  %v1412_v53 = vpop.xlane.xlu0 %1411  ;;  %v1384_v11 = vpop.xlane.xlu1 %1383  ;;  %vm1742_vm3 = vweird.f32 %v3899_v49  ;;  %vm1753_vm4 = vmor %vm1751_vm14, %vm1752_vm1  ;;  %vm1611_vm5 = vweird.f32 %v3882_v28 }
 0x3f8   :  { %v1827_v30 = vmul.f32 %v1714_v50, %v3451_v3  ;;  %v1604_v16 = vsel %vm1603_vm12, %v2231_v12, %v1600_v39  ;;  %v1448_v0 = vmul.f32 %v1412_v53, %v2556_v42  ;;  %v1434_v54 = vmul.f32 %v1384_v11, %v2556_v42  ;;  %vm1743_vm6 = vmor %vm1741_vm15, %vm1742_vm3 }
 0x3f9   :  { %1991 = vst [vmem:[#allocation10 + $0xc0] sm:$0xff] %v1959_v46  ;;  %v1816_v5 = vmul.f32 %v1604_v16, %v3458_v36  ;;  %v1736_v3 = vmul.f32 %v3899_v49, %v3871_v51  ;;  %v1588_v29 = vmul.f32 0.5, %v1587_v9  ;;  %v1747_v36 = vmul.f32 %v3894_v56, %v1746_v62 }
 0x3fa   :  { %v1860_v13 = vmul.f32 %v3556_v18, %v1827_v30  ;;  %v3910_v12 = vadd.f32 1e-05, %v1448_v0  ;;  %v3914_v10 = vadd.f32 1e-05, %v1434_v54  ;;  %v3916_v21 = vpop.eup %2238 }
 0x3fb   :  { %v1849_v35 = vmul.f32 %v3556_v18, %v1816_v5  ;;  %v1737_v37 = vmul.f32 %v3899_v49, %v1736_v3  ;;  %v1589_v48 = vsub.f32 1.5, %v1588_v29  ;;  %v1748_v63 = vmul.f32 0.5, %v1747_v36 }
 0x3fc   :  { %v1893_v61 = vadd.f32 %v3561_v41, %v1860_v13  ;;  %2240 = vrsqrt.f32 %v3910_v12  ;;  %v1606_v33 = vmul.f32 %v3916_v21, %v3882_v28  ;;  %vm1612_vm7 = vweird.f32 %v3916_v21 }
 0x3fd   :  { %v1882_v52 = vadd.f32 %v3561_v41, %v1849_v35  ;;  %v1738_v27 = vmul.f32 0.5, %v1737_v37  ;;  %2242 = vrsqrt.f32 %v3914_v10  ;;  %v1590_v32 = vmul.f32 %v3885_v20, %v1589_v48  ;;  %vm1613_vm9 = vmor %vm1611_vm5, %vm1612_vm7  ;;  %v2277_v35 = vld [vmem:[#allocation2 + $0x50] sm:$0xff] }
 0x3fe   :  { %v1925_v2 = vadd.f32 %v2275_v34, %v1893_v61  ;;  %v1749_v45 = vsub.f32 1.5, %v1748_v63  ;;  %v1607_v15 = vmul.f32 %v3916_v21, %v1606_v33  ;;  %vm1761_vm8 = vweird.f32 %v3910_v12  ;;  %v2278_v34 = vld [vmem:[#allocation2 + $0xd0] sm:$0xff] }
 0x3ff   :  { %v1914_v24 = vadd.f32 %v2276_v31, %v1882_v52  ;;  %v1414_v47 = vpop.xlane.xlu1 %1413  ;;  %v1739_v4 = vsub.f32 1.5, %v1738_v27  ;;  %v1594_v23 = vsel %vm1593_vm2, %v3885_v20, %v1590_v32  ;;  %vm1621_vm13 = vweird.f32 %v3914_v10 }
 0x400   :  { %v1957_v44 = vmax.f32 %v1925_v2, 0.0  ;;  %v1449_v6 = vmul.f32 %v1414_v47, %v2556_v42  ;;  %v1750_v59 = vmul.f32 %v3894_v56, %v1749_v45  ;;  %v1608_v39 = vmul.f32 0.5, %v1607_v15 }
 0x401   :  { %v1946_v19 = vmax.f32 %v1914_v24, 0.0  ;;  %v1815_v50 = vmul.f32 %v1594_v23, %v3468_v60  ;;  %v1740_v26 = vmul.f32 %v3899_v49, %v1739_v4  ;;  %v2279_v24 = vld [vmem:[#allocation2 + $0xc8] sm:$0xff] }
 0x402   :  { %v3937_v46 = vpop.eup %2240  ;;  %1989 = vst [vmem:[#allocation10 + $0xb0] sm:$0xff] %v1957_v44  ;;  %v3946_v8 = vadd.f32 1e-05, %v1449_v6  ;;  %v1754_v20 = vsel %vm1753_vm4, %v3894_v56, %v1750_v59  ;;  %v1609_v60 = vsub.f32 1.5, %v1608_v39  ;;  %v2280_v59 = vld [vmem:[#allocation2 + $0x60] sm:$0xff] }
 0x403   :  { %1978 = vst [vmem:[#allocation10 + $0x58] sm:$0xff] %v1946_v19  ;;  %v1756_v43 = vmul.f32 %v3937_v46, %v3910_v12  ;;  %v3957_v53 = vpop.eup %2242  ;;  %v1848_v11 = vmul.f32 %v3556_v18, %v1815_v50  ;;  %v1831_v30 = vmul.f32 %v1754_v20, %v3472_v14  ;;  %v1744_v56 = vsel %vm1743_vm6, %v3899_v49, %v1740_v26 }
 0x404   :  { %2244 = vrsqrt.f32 %v3946_v8  ;;  %v1830_v51 = vmul.f32 %v1744_v56, %v3480_v22  ;;  %v1610_v16 = vmul.f32 %v3916_v21, %v1609_v60  ;;  %v1616_v54 = vmul.f32 %v3957_v53, %v3914_v10 }
 0x405   :  { %v1757_v0 = vmul.f32 %v3937_v46, %v1756_v43  ;;  %v1881_v5 = vadd.f32 %v3561_v41, %v1848_v11  ;;  %v1864_v9 = vmul.f32 %v3556_v18, %v1831_v30  ;;  %vm1762_vm10 = vweird.f32 %v3937_v46 }
 0x406   :  { %vm1622_vm11 = vweird.f32 %v3957_v53  ;;  %v1863_v14 = vmul.f32 %v3556_v18, %v1830_v51  ;;  %v1614_v22 = vsel %vm1613_vm9, %v3916_v21, %v1610_v16  ;;  %v1617_v62 = vmul.f32 %v3957_v53, %v1616_v54  ;;  %vm1763_vm12 = vmor %vm1761_vm8, %vm1762_vm10 }
 0x407   :  { %v1758_v49 = vmul.f32 0.5, %v1757_v0  ;;  %v1386_v13 = vpop.xlane.xlu2 %1385  ;;  %v1420_v3 = vpop.xlane.xlu1 %1419  ;;  %v1913_v29 = vadd.f32 %v2277_v35, %v1881_v5  ;;  %v1897_v36 = vadd.f32 %v3561_v41, %v1864_v9  ;;  %v1817_v28 = vmul.f32 %v1614_v22, %v3486_v38  ;;  %vm1623_vm14 = vmor %vm1621_vm13, %vm1622_vm11  ;;  %v2281_v5 = vld [vmem:[#allocation2 + $0xd8] sm:$0xff]  ;;  %v2282_v35 = vld [vmem:[#allocation2 + $0x68] sm:$0xff] }
 0x408   :  { %v1435_v61 = vmul.f32 %v1386_v13, %v2556_v42  ;;  %v1896_v37 = vadd.f32 %v3561_v41, %v1863_v14  ;;  %v1618_v48 = vmul.f32 0.5, %v1617_v62  ;;  %v1452_v63 = vmul.f32 %v1420_v3, %v2556_v42 }
 0x409   :  { %v1759_v52 = vsub.f32 1.5, %v1758_v49  ;;  %v1945_v33 = vmax.f32 %v1913_v29, 0.0  ;;  %v1929_v2 = vadd.f32 %v2278_v34, %v1897_v36  ;;  %v1850_v27 = vmul.f32 %v3556_v18, %v1817_v28 }
 0x40a   :  { %v2245_v21 = vpop.eup %2244  ;;  %v3983_v31 = vadd.f32 1e-05, %v1435_v61  ;;  %v1928_v32 = vadd.f32 %v2279_v24, %v1896_v37  ;;  %v1619_v45 = vsub.f32 1.5, %v1618_v48  ;;  %v3999_v12 = vadd.f32 1e-05, %v1452_v63 }
 0x40b   :  { %v1760_v38 = vmul.f32 %v3937_v46, %v1759_v52  ;;  %v1766_v15 = vmul.f32 %v2245_v21, %v3946_v8  ;;  %1977 = vst [vmem:[#allocation10 + $0x50] sm:$0xff] %v1945_v33  ;;  %v1961_v47 = vmax.f32 %v1929_v2, 0.0  ;;  %v1883_v44 = vadd.f32 %v3561_v41, %v1850_v27 }
 0x40c   :  { %2246 = vrsqrt.f32 %v3983_v31  ;;  %v1960_v4 = vmax.f32 %v1928_v32, 0.0  ;;  %v1620_v19 = vmul.f32 %v3957_v53, %v1619_v45  ;;  %vm1772_vm15 = vweird.f32 %v2245_v21  ;;  %v2283_v32 = vld [vmem:[#allocation2 + $0xe0] sm:$0xff] }
 0x40d   :  { %v1764_v6 = vsel %vm1763_vm12, %v3937_v46, %v1760_v38  ;;  %v1767_v23 = vmul.f32 %v2245_v21, %v1766_v15  ;;  %1993 = vst [vmem:[#allocation10 + $0xd0] sm:$0xff] %v1961_v47  ;;  %v1915_v39 = vadd.f32 %v2280_v59, %v1883_v44  ;;  %2248 = vrsqrt.f32 %v3999_v12 }
 0x40e   :  { %v1832_v50 = vmul.f32 %v1764_v6, %v3496_v1  ;;  %1992 = vst [vmem:[#allocation10 + $0xc8] sm:$0xff] %v1960_v4  ;;  %v1624_v10 = vsel %vm1623_vm14, %v3957_v53, %v1620_v19  ;;  %vm1771_vm0 = vweird.f32 %v3946_v8  ;;  %vm1631_vm3 = vweird.f32 %v3983_v31 }
 0x40f   :  { %v1768_v26 = vmul.f32 0.5, %v1767_v23  ;;  %v1416_v20 = vpop.xlane.xlu2 %1415  ;;  %v1388_v60 = vpop.xlane.xlu0 %1387  ;;  %v1947_v46 = vmax.f32 %v1915_v39, 0.0  ;;  %v1818_v11 = vmul.f32 %v1624_v10, %v3493_v25  ;;  %vm1773_vm1 = vmor %vm1771_vm0, %vm1772_vm15  ;;  %vm1801_vm6 = vweird.f32 %v3999_v12 }
 0x410   :  { %v1865_v43 = vmul.f32 %v3556_v18, %v1832_v50  ;;  %v1450_v1 = vmul.f32 %v1416_v20, %v2556_v42  ;;  %v1436_v56 = vmul.f32 %v1388_v60, %v2556_v42 }
 0x411   :  { %v1769_v30 = vsub.f32 1.5, %v1768_v26  ;;  %1979 = vst [vmem:[#allocation10 + $0x60] sm:$0xff] %v1947_v46  ;;  %v1851_v16 = vmul.f32 %v3556_v18, %v1818_v11  ;;  %v2284_v46 = vld [vmem:[#allocation2 + $0x70] sm:$0xff] }
 0x412   :  { %v2247_v51 = vpop.eup %2246  ;;  %v1898_v53 = vadd.f32 %v3561_v41, %v1865_v43  ;;  %v4011_v25 = vadd.f32 1e-05, %v1450_v1  ;;  %v4014_v22 = vadd.f32 1e-05, %v1436_v56 }
 0x413   :  { %v1770_v0 = vmul.f32 %v2245_v21, %v1769_v30  ;;  %v1626_v54 = vmul.f32 %v2247_v51, %v3983_v31  ;;  %v1884_v14 = vadd.f32 %v3561_v41, %v1851_v16  ;;  %v2249_v13 = vpop.eup %2248  ;;  %vm1632_vm2 = vweird.f32 %v2247_v51 }
 0x414   :  { %v1930_v9 = vadd.f32 %v2281_v5, %v1898_v53  ;;  %2250 = vrsqrt.f32 %v4011_v25  ;;  %v1796_v28 = vmul.f32 %v2249_v13, %v3999_v12  ;;  %vm1633_vm4 = vmor %vm1631_vm3, %vm1632_vm2  ;;  %vm1802_vm5 = vweird.f32 %v2249_v13 }
 0x415   :  { %v1774_v49 = vsel %vm1773_vm1, %v2245_v21, %v1770_v0  ;;  %v1627_v62 = vmul.f32 %v2247_v51, %v1626_v54  ;;  %v1916_v29 = vadd.f32 %v2282_v35, %v1884_v14  ;;  %2252 = vrsqrt.f32 %v4014_v22  ;;  %vm1803_vm7 = vmor %vm1801_vm6, %vm1802_vm5  ;;  %v2285_v54 = vld [vmem:[#allocation2 + $0xf8] sm:$0xff] }
 0x416   :  { %v1962_v3 = vmax.f32 %v1930_v9, 0.0  ;;  %v1833_v8 = vmul.f32 %v1774_v49, %v3504_v7  ;;  %v1797_v63 = vmul.f32 %v2249_v13, %v1796_v28  ;;  %vm1781_vm10 = vweird.f32 %v4011_v25 }
 0x417   :  { %v1628_v36 = vmul.f32 0.5, %v1627_v62  ;;  %v1948_v61 = vmax.f32 %v1916_v29, 0.0  ;;  %v1418_v52 = vpop.xlane.xlu0 %1417  ;;  %vm1641_vm12 = vweird.f32 %v4014_v22 }
 0x418   :  { %1994 = vst [vmem:[#allocation10 + $0xd8] sm:$0xff] %v1962_v3  ;;  %v1866_v37 = vmul.f32 %v3556_v18, %v1833_v8  ;;  %v1451_v21 = vmul.f32 %v1418_v52, %v2556_v42  ;;  %v1798_v2 = vmul.f32 0.5, %v1797_v63  ;;  %v2286_v3 = vld [vmem:[#allocation2 + $0xe8] sm:$0xff]  ;;  %v2287_v8 = vld [vmem:[#allocation2 + $0x78] sm:$0xff]  ;;  %v2288_v63 = vld [vmem:[#allocation2 + $0xf0] sm:$0xff] }
 0x419   :  { %v1629_v48 = vsub.f32 1.5, %v1628_v36  ;;  %1980 = vst [vmem:[#allocation10 + $0x68] sm:$0xff] %v1948_v61 }
 0x41a   :  { %v1899_v33 = vadd.f32 %v3561_v41, %v1866_v37  ;;  %v2251_v34 = vpop.eup %2250  ;;  %v4024_v27 = vadd.f32 1e-05, %v1451_v21  ;;  %v1799_v47 = vsub.f32 1.5, %v1798_v2 }
 0x41b   :  { %v1630_v7 = vmul.f32 %v2247_v51, %v1629_v48  ;;  %v2253_v24 = vpop.eup %2252  ;;  %v1776_v45 = vmul.f32 %v2251_v34, %v4011_v25  ;;  %vm1782_vm8 = vweird.f32 %v2251_v34 }
 0x41c   :  { %v1931_v38 = vadd.f32 %v2283_v32, %v1899_v33  ;;  %v1636_v42 = vmul.f32 %v2253_v24, %v4014_v22  ;;  %2254 = vrsqrt.f32 %v4024_v27  ;;  %v1800_v31 = vmul.f32 %v2249_v13, %v1799_v47  ;;  %vm1783_vm11 = vmor %vm1781_vm10, %vm1782_vm8 }
 0x41d   :  { %v1634_v15 = vsel %vm1633_vm4, %v2247_v51, %v1630_v7  ;;  %v1777_v6 = vmul.f32 %v2251_v34, %v1776_v45  ;;  %vm1642_vm9 = vweird.f32 %v2253_v24  ;;  %vm1791_vm15 = vweird.f32 %v4024_v27 }
 0x41e   :  { %v1963_v44 = vmax.f32 %v1931_v38, 0.0  ;;  %v1819_v4 = vmul.f32 %v1634_v15, %v3511_v55  ;;  %v1637_v19 = vmul.f32 %v2253_v24, %v1636_v42  ;;  %v1804_v39 = vsel %vm1803_vm7, %v2249_v13, %v1800_v31  ;;  %vm1643_vm13 = vmor %vm1641_vm12, %vm1642_vm9 }
 0x41f   :  { %v1778_v59 = vmul.f32 0.5, %v1777_v6  ;;  %v1836_v26 = vmul.f32 %v1804_v39, %v3514_v58 }
 0x420   :  { %1995 = vst [vmem:[#allocation10 + $0xe0] sm:$0xff] %v1963_v44  ;;  %v1852_v23 = vmul.f32 %v3556_v18, %v1819_v4  ;;  %v1638_v50 = vmul.f32 0.5, %v1637_v19 }
 0x421   :  { %v1779_v20 = vsub.f32 1.5, %v1778_v59  ;;  %v1869_v12 = vmul.f32 %v3556_v18, %v1836_v26 }
 0x422   :  { %v1885_v10 = vadd.f32 %v3561_v41, %v1852_v23  ;;  %v1639_v55 = vsub.f32 1.5, %v1638_v50  ;;  %v2255_v60 = vpop.eup %2254 }
 0x423   :  { %v1780_v11 = vmul.f32 %v2251_v34, %v1779_v20  ;;  %v1786_v1 = vmul.f32 %v2255_v60, %v4024_v27  ;;  %v1902_v58 = vadd.f32 %v3561_v41, %v1869_v12  ;;  %vm1792_vm14 = vweird.f32 %v2255_v60 }
 0x424   :  { %v1917_v43 = vadd.f32 %v2284_v46, %v1885_v10  ;;  %v1640_v30 = vmul.f32 %v2253_v24, %v1639_v55  ;;  %vm1793_vm0 = vmor %vm1791_vm15, %vm1792_vm14 }
 0x425   :  { %v1784_v51 = vsel %vm1783_vm11, %v2251_v34, %v1780_v11  ;;  %v1787_v0 = vmul.f32 %v2255_v60, %v1786_v1  ;;  %v1934_v5 = vadd.f32 %v2285_v54, %v1902_v58 }
 0x426   :  { %v1949_v56 = vmax.f32 %v1917_v43, 0.0  ;;  %v1834_v53 = vmul.f32 %v1784_v51, %v3524_v17  ;;  %v1644_v16 = vsel %vm1643_vm13, %v2253_v24, %v1640_v30 }
 0x427   :  { %v1820_v25 = vmul.f32 %v1644_v16, %v3527_v40  ;;  %v1788_v14 = vmul.f32 0.5, %v1787_v0  ;;  %v1966_v22 = vmax.f32 %v1934_v5, 0.0 }
 0x428   :  { %1981 = vst [vmem:[#allocation10 + $0x70] sm:$0xff] %v1949_v56  ;;  %v1867_v9 = vmul.f32 %v3556_v18, %v1834_v53 }
 0x429   :  { %v1853_v49 = vmul.f32 %v3556_v18, %v1820_v25  ;;  %v1789_v13 = vsub.f32 1.5, %v1788_v14  ;;  %1998 = vst [vmem:[#allocation10 + $0xf8] sm:$0xff] %v1966_v22 }
 0x42a   :  { %v1900_v62 = vadd.f32 %v3561_v41, %v1867_v9 }
 0x42b   :  { %v1886_v17 = vadd.f32 %v3561_v41, %v1853_v49  ;;  %v1790_v29 = vmul.f32 %v2255_v60, %v1789_v13 }
 0x42c   :  { %v1932_v35 = vadd.f32 %v2286_v3, %v1900_v62 }
 0x42d   :  { %v1918_v40 = vadd.f32 %v2287_v8, %v1886_v17  ;;  %v1794_v28 = vsel %vm1793_vm0, %v2255_v60, %v1790_v29 }
 0x42e   :  { %v1964_v36 = vmax.f32 %v1932_v35, 0.0  ;;  %v1835_v37 = vmul.f32 %v1794_v28, %v3537_v57 }
 0x42f   :  { %v1950_v61 = vmax.f32 %v1918_v40, 0.0 }
 0x430   :  { %1996 = vst [vmem:[#allocation10 + $0xe8] sm:$0xff] %v1964_v36  ;;  %v1868_v52 = vmul.f32 %v3556_v18, %v1835_v37 }
 0x431   :  { %1982 = vst [vmem:[#allocation10 + $0x78] sm:$0xff] %v1950_v61 }
 0x432   :  { %v1901_v48 = vadd.f32 %v3561_v41, %v1868_v52 }
 0x434   :  { %v1933_v21 = vadd.f32 %v2288_v63, %v1901_v48 }
 0x436   :  { %v1965_v33 = vmax.f32 %v1933_v21, 0.0 }
 0x438   :  { %1997 = vst [vmem:[#allocation10 + $0xf0] sm:$0xff] %v1965_v33 }
 0x439   :  { %2011 = dma.vmem_to_hbm [thread:$0]  %s2004_s3, 4096, %s2006_s13, [#allocation4], %s2421_s27, %s2421_s27, %s2422_s28  }
 0x43a   :  { %2415 = dma.done.wait [#allocation4], 4096  }
 0x43b   :  { %2416 = vsyncadd [#allocation4], 4294963200 }
 0x43c   :  { %2016 = vsyncpa [#allocation3], 1 }
 0x43d   :  { %2017 = vsyncpa [#allocation6], 1 }
 0x43e   :  { %2018 = vsyncpa [#allocation9], 1 }
 0x43f   :  { %2019 = vsyncpa [#allocation4], 1 }

// kernel: tpu_custom_call.1
= control target key start
LH: loop header
LB: loop body
LE: loop exit
PB: predicated region body
PF: predicated region fallthrough
CT: control target
= control target key end

     0   :  { %9 = vsyncpa [#allocation3], 0  ;;  %s4055_s0 = inlined_call_operand.hbm [shape: f32[256,128], index: 0, kind: input, shape index: {}]   ;;  %s4056_s1 = inlined_call_operand.hbm [shape: bf16[128,128], index: 1, kind: input, shape index: {}]   ;;  %s4057_s2 = inlined_call_operand.hbm [shape: bf16[128,128], index: 2, kind: input, shape index: {}]   ;;  %s4058_s3 = inlined_call_operand.hbm [shape: f32[8,128], index: 3, kind: input, shape index: {}]   ;;  %s4059_s4 = inlined_call_operand.hbm [shape: f32[256,128], index: 4, kind: output, shape index: {}]  }
   0x1   :  { %10 = vsyncpa [#allocation6], 0 }
   0x2   :  { %11 = vsyncpa [#allocation9], 0  ;;  %s30_s17 = sshll.u32 %s4056_s1, 4  ;;  %s31_s17 = int_to_ptr.hbm [resolvable:$true] %s30_s17 }
   0x3   :  { %12 = vsyncpa [#allocation4], 0  ;;  %s2417_s18 = smov [#allocation5]   ;;  %s17_s22 = sshll.u32 %s4055_s0, 4  ;;  %s18_s22 = int_to_ptr.hbm [resolvable:$true] %s17_s22 }
   0x4   :  { %s32_s19 = sshll.u32 %s2417_s18, 4  ;;  %s2418_s23 = smov 64   ;;  %s33_s19 = int_to_ptr.vmem [resolvable:$true] %s32_s19 }
   0x5   :  { %s2419_s24 = smov 4   ;;  %s2420_s25 = smov [#allocation2]  }
   0x6   :  { %38 = dma.hbm_to_vmem [thread:$0]  %s31_s17, 1024, %s33_s19, [#allocation6], %s2418_s23, %s2418_s23, %s2419_s24  }
   0x7   :  { %s19_s26 = sshll.u32 %s2420_s25, 4  ;;  %s2421_s27 = smov 128   ;;  %s20_s26 = int_to_ptr.vmem [resolvable:$true] %s19_s26 }
   0x8   :  { %s2422_s28 = smov 8   ;;  %s43_s30 = sshll.u32 %s4057_s2, 4  ;;  %s44_s30 = int_to_ptr.hbm [resolvable:$true] %s43_s30 }
   0x9   :  { %25 = dma.hbm_to_vmem [thread:$0]  %s18_s22, 4096, %s20_s26, [#allocation3], %s2421_s27, %s2421_s27, %s2422_s28  }
   0xa   :  { %s2423_s5 = smov [#allocation7]   ;;  %s57_s8 = sshll.u32 %s4058_s3, 4  ;;  %s58_s8 = int_to_ptr.hbm [resolvable:$true] %s57_s8 }
   0xb   :  { %s45_s0 = sshll.u32 %s2423_s5, 4  ;;  %s2424_s9 = smov [#allocation8]   ;;  %s46_s0 = int_to_ptr.vmem [resolvable:$true] %s45_s0 }
   0xc   :  { %51 = dma.hbm_to_vmem [thread:$0]  %s44_s30, 1024, %s46_s0, [#allocation6], %s2418_s23, %s2418_s23, %s2419_s24  }
   0xd   :  { %s59_s10 = sshll.u32 %s2424_s9, 4  ;;  %s60_s10 = int_to_ptr.vmem [resolvable:$true] %s59_s10 }
   0xe   :  { %62 = dma.hbm_to_vmem [thread:$0]  %s58_s8, 128, %s60_s10, [#allocation9]  }
   0xf   :  { %2409 = dma.done.wait [#allocation3], 4096  }
  0x10   :  { %2410 = vsyncadd [#allocation3], 4294963200 }
  0x11   :  { %2411 = dma.done.wait [#allocation6], 2048  }
  0x12   :  { %2412 = vsyncadd [#allocation6], 4294965248 }
  0x13   :  { %2413 = dma.done.wait [#allocation9], 128  }
  0x14   :  { %2414 = vsyncadd [#allocation9], 4294967168  ;;  %v2091_v0 = vld [vmem:[#allocation5 + $0x38] sm:$0xff]  ;;  %v2090_v1 = vld [vmem:[#allocation5 + $0x30] sm:$0xff]  ;;  %s2426_s2 = smov [#allocation10]   ;;  %s2005_s13 = sshll.u32 %s4059_s4, 4  ;;  %s2006_s13 = int_to_ptr.hbm [resolvable:$true] %s2005_s13 }
  0x15   :  { %193 = vmatpush.bf16.msra.mxu0 %v2091_v0  ;;  %2100 = vmatpush.bf16.msra.mxu2 %v2091_v0  ;;  %v2089_v2 = vld [vmem:[#allocation5 + $0x28] sm:$0xff]  ;;  %v2088_v3 = vld [vmem:[#allocation5 + $0x20] sm:$0xff]  ;;  %v2087_v4 = vld [vmem:[#allocation5 + $0x18] sm:$0xff]  ;;  %s2003_s3 = sshll.u32 %s2426_s2, 4  ;;  %s2004_s3 = int_to_ptr.vmem [resolvable:$true] %s2003_s3 }
  0x16   :  { %v2086_v5 = vld [vmem:[#allocation5 + $0x10] sm:$0xff]  ;;  %v2085_v6 = vld [vmem:[#allocation5 + $0x8] sm:$0xff]  ;;  %v2084_v7 = vld [vmem:[#allocation5] sm:$0xff] }
  0x17   :  { %v80_v8 = vld [vmem:[#allocation2] sm:$0xff]  ;;  %v81_v9 = vld [vmem:[#allocation2 + $0x8] sm:$0xff]  ;;  %v82_v14 = vld [vmem:[#allocation2 + $0x10] sm:$0xff] }
  0x18   :  { %v96_v10 = vld [vmem:[#allocation2 + $0x80] sm:$0xff]  ;;  %v97_v11 = vld [vmem:[#allocation2 + $0x88] sm:$0xff]  ;;  %v112_v12 = vpack.c.bf16 %v81_v9, %v80_v8  ;;  %v83_v15 = vld [vmem:[#allocation2 + $0x18] sm:$0xff] }
  0x19   :  { %194 = vmatpush.bf16.msra.mxu0 %v2090_v1  ;;  %2101 = vmatpush.bf16.msra.mxu2 %v2090_v1  ;;  %v120_v13 = vpack.c.bf16 %v97_v11, %v96_v10  ;;  %v98_v16 = vld [vmem:[#allocation2 + $0x90] sm:$0xff]  ;;  %v99_v17 = vld [vmem:[#allocation2 + $0x98] sm:$0xff]  ;;  %v113_v18 = vpack.c.bf16 %v83_v15, %v82_v14  ;;  %v84_v20 = vld [vmem:[#allocation2 + $0x20] sm:$0xff] }
  0x1a   :  { %v121_v19 = vpack.c.bf16 %v99_v17, %v98_v16  ;;  %v85_v21 = vld [vmem:[#allocation2 + $0x28] sm:$0xff]  ;;  %v100_v22 = vld [vmem:[#allocation2 + $0xa0] sm:$0xff]  ;;  %v86_v26 = vld [vmem:[#allocation2 + $0x30] sm:$0xff] }
  0x1b   :  { %v101_v23 = vld [vmem:[#allocation2 + $0xa8] sm:$0xff]  ;;  %v114_v24 = vpack.c.bf16 %v85_v21, %v84_v20  ;;  %v87_v27 = vld [vmem:[#allocation2 + $0x38] sm:$0xff]  ;;  %v102_v28 = vld [vmem:[#allocation2 + $0xb0] sm:$0xff] }
  0x1c   :  { %v122_v25 = vpack.c.bf16 %v101_v23, %v100_v22  ;;  %v103_v29 = vld [vmem:[#allocation2 + $0xb8] sm:$0xff]  ;;  %v115_v30 = vpack.c.bf16 %v87_v27, %v86_v26  ;;  %v88_v32 = vld [vmem:[#allocation2 + $0x40] sm:$0xff]  ;;  %v89_v33 = vld [vmem:[#allocation2 + $0x48] sm:$0xff] }
  0x1d   :  { %195 = vmatpush.bf16.msra.mxu0 %v2089_v2  ;;  %2102 = vmatpush.bf16.msra.mxu2 %v2089_v2  ;;  %v123_v31 = vpack.c.bf16 %v103_v29, %v102_v28  ;;  %v104_v34 = vld [vmem:[#allocation2 + $0xc0] sm:$0xff]  ;;  %v105_v35 = vld [vmem:[#allocation2 + $0xc8] sm:$0xff]  ;;  %v116_v36 = vpack.c.bf16 %v89_v33, %v88_v32  ;;  %v106_v38 = vld [vmem:[#allocation2 + $0xd0] sm:$0xff] }
  0x1e   :  { %v124_v37 = vpack.c.bf16 %v105_v35, %v104_v34  ;;  %v107_v39 = vld [vmem:[#allocation2 + $0xd8] sm:$0xff]  ;;  %v90_v41 = vld [vmem:[#allocation2 + $0x50] sm:$0xff]  ;;  %v2467_v44 = vld [vmem:[#allocation8] sm:$0xff] }
  0x1f   :  { %v125_v40 = vpack.c.bf16 %v107_v39, %v106_v38  ;;  %v91_v42 = vld [vmem:[#allocation2 + $0x58] sm:$0xff]  ;;  %v108_v45 = vld [vmem:[#allocation2 + $0xe0] sm:$0xff]  ;;  %v109_v46 = vld [vmem:[#allocation2 + $0xe8] sm:$0xff]  ;;  %v2470_v48 = vperm.slane %v2467_v44, 0 }
  0x20   :  { %v117_v43 = vpack.c.bf16 %v91_v42, %v90_v41  ;;  %v126_v47 = vpack.c.bf16 %v109_v46, %v108_v45  ;;  %v92_v58 = vld [vmem:[#allocation2 + $0x60] sm:$0xff]  ;;  %v93_v59 = vld [vmem:[#allocation2 + $0x68] sm:$0xff]  ;;  %v110_v61 = vld [vmem:[#allocation2 + $0xf0] sm:$0xff] }
  0x21   :  { %196 = vmatpush.bf16.msra.mxu0 %v2088_v3  ;;  %2103 = vmatpush.bf16.msra.mxu2 %v2088_v3  ;;  %v118_v60 = vpack.c.bf16 %v93_v59, %v92_v58  ;;  %v111_v62 = vld [vmem:[#allocation2 + $0xf8] sm:$0xff] }
  0x22   :  { %v127_v63 = vpack.c.bf16 %v111_v62, %v110_v61 }
  0x25   :  { %197 = vmatpush.bf16.msra.mxu0 %v2087_v4  ;;  %2104 = vmatpush.bf16.msra.mxu2 %v2087_v4 }
  0x29   :  { %198 = vmatpush.bf16.msra.mxu0 %v2086_v5  ;;  %2105 = vmatpush.bf16.msra.mxu2 %v2086_v5 }
  0x2d   :  { %199 = vmatpush.bf16.msra.mxu0 %v2085_v6  ;;  %2106 = vmatpush.bf16.msra.mxu2 %v2085_v6 }
  0x31   :  { %200 = vmatpush.bf16.msra.mxu0 %v2084_v7  ;;  %2107 = vmatpush.bf16.msra.mxu2 %v2084_v7 }
  0x34   :  { %201 = vmatmul.bf16.vlgmr.msra.gmra.mxu0 %v112_v12  ;;  %241 = vmatmul.bf16.vlgmr.msra.gmra.mxu2 %v120_v13  ;;  %v94_v12 = vld [vmem:[#allocation2 + $0x70] sm:$0xff]  ;;  %v95_v13 = vld [vmem:[#allocation2 + $0x78] sm:$0xff] }
  0x35   :  { %v119_v14 = vpack.c.bf16 %v95_v13, %v94_v12 }
  0x44   :  { %206 = vmatmul.bf16.gmra.mxu0 %v113_v18  ;;  %246 = vmatmul.bf16.gmra.mxu2 %v121_v19 }
  0x54   :  { %211 = vmatmul.bf16.gmra.mxu0 %v114_v24  ;;  %251 = vmatmul.bf16.gmra.mxu2 %v122_v25 }
  0x64   :  { %216 = vmatmul.bf16.gmra.mxu0 %v115_v30  ;;  %256 = vmatmul.bf16.gmra.mxu2 %v123_v31 }
  0x74   :  { %221 = vmatmul.bf16.gmra.mxu0 %v116_v36  ;;  %261 = vmatmul.bf16.gmra.mxu2 %v124_v37  ;;  %v2425_v36 = vmov 128.0  }
  0x75   :  { %2126 = vrcp.f32 %v2425_v36 }
  0x7b   :  { %v2127_v37 = vpop.eup %2126 }
  0x7c   :  { %v347_v38 = vmul.f32 128.0, %v2127_v37  ;;  %vm351_vm0 = vweird.f32 %v2127_v37 }
  0x7e   :  { %v348_v39 = vsub.f32 1.0, %v347_v38 }
  0x84   :  { %266 = vmatmul.bf16.gmra.mxu2 %v125_v40  ;;  %226 = vmatmul.bf16.gmra.mxu0 %v117_v43  ;;  %v349_v40 = vmul.f32 %v2127_v37, %v348_v39 }
  0x86   :  { %v350_v41 = vadd.f32 %v2127_v37, %v349_v40 }
  0x88   :  { %v2556_v42 = vsel %vm351_vm0, %v2127_v37, %v350_v41 }
  0x94   :  { %271 = vmatmul.bf16.gmra.mxu2 %v126_v47  ;;  %231 = vmatmul.bf16.gmra.mxu0 %v118_v60 }
  0xa4   :  { %276 = vmatmul.bf16.gmra.mxu2 %v127_v63  ;;  %236 = vmatmul.bf16.gmra.mxu0 %v119_v14 }
  0xb1   :  { %v202_v49 = vpop.f32.mrf.mxu0 }
  0xb2   :  { %v2473_v50 = vadd.f32 %v202_v49, %v2470_v48 }
  0xb4   :  { %282 = vadd.xlane.f32.xlu1 %v2473_v50 }
  0xb7   :  { %v242_v51 = vpop.f32.mrf.mxu2 }
  0xb8   :  { %v2477_v52 = vadd.f32 %v242_v51, %v2470_v48 }
  0xb9   :  { %v204_v53 = vpop.f32.mrf.mxu0 }
  0xba   :  { %v2480_v54 = vadd.f32 %v204_v53, %v2470_v48  ;;  %314 = vadd.xlane.f32.xlu0 %v2477_v52 }
  0xbc   :  { %284 = vadd.xlane.f32.xlu1 %v2480_v54 }
  0xbf   :  { %v244_v55 = vpop.f32.mrf.mxu2 }
  0xc0   :  { %v2485_v56 = vadd.f32 %v244_v55, %v2470_v48 }
  0xc1   :  { %v207_v57 = vpop.f32.mrf.mxu0 }
  0xc2   :  { %316 = vadd.xlane.f32.xlu0 %v2485_v56  ;;  %v2489_v0 = vadd.f32 %v207_v57, %v2470_v48 }
  0xc7   :  { %v247_v1 = vpop.f32.mrf.mxu2 }
  0xc8   :  { %v2492_v2 = vadd.f32 %v247_v1, %v2470_v48 }
  0xc9   :  { %v209_v3 = vpop.f32.mrf.mxu0 }
  0xca   :  { %v2495_v4 = vadd.f32 %v209_v3, %v2470_v48  ;;  %318 = vadd.xlane.f32.xlu2 %v2492_v2  ;;  %286 = vadd.xlane.f32.xlu0 %v2489_v0 }
  0xcc   :  { %288 = vadd.xlane.f32.xlu1 %v2495_v4 }
  0xcf   :  { %v249_v5 = vpop.f32.mrf.mxu2 }
  0xd0   :  { %v2501_v6 = vadd.f32 %v249_v5, %v2470_v48 }
  0xd1   :  { %v212_v7 = vpop.f32.mrf.mxu0 }
  0xd2   :  { %v2504_v8 = vadd.f32 %v212_v7, %v2470_v48  ;;  %320 = vadd.xlane.f32.xlu2 %v2501_v6 }
  0xd4   :  { %290 = vadd.xlane.f32.xlu1 %v2504_v8 }
  0xd7   :  { %v252_v9 = vpop.f32.mrf.mxu2 }
  0xd8   :  { %v2509_v10 = vadd.f32 %v252_v9, %v2470_v48 }
  0xd9   :  { %v214_v11 = vpop.f32.mrf.mxu0 }
  0xda   :  { %322 = vadd.xlane.f32.xlu2 %v2509_v10  ;;  %v2513_v16 = vadd.f32 %v214_v11, %v2470_v48 }
  0xdf   :  { %v254_v15 = vpop.f32.mrf.mxu2 }
  0xe0   :  { %v2516_v17 = vadd.f32 %v254_v15, %v2470_v48 }
  0xe1   :  { %v217_v18 = vpop.f32.mrf.mxu0 }
  0xe2   :  { %292 = vadd.xlane.f32.xlu2 %v2513_v16  ;;  %324 = vadd.xlane.f32.xlu0 %v2516_v17  ;;  %v2521_v19 = vadd.f32 %v217_v18, %v2470_v48 }
  0xe7   :  { %v257_v20 = vpop.f32.mrf.mxu2 }
  0xe8   :  { %v2524_v21 = vadd.f32 %v257_v20, %v2470_v48 }
  0xe9   :  { %v219_v22 = vpop.f32.mrf.mxu0 }
  0xea   :  { %v2527_v23 = vadd.f32 %v219_v22, %v2470_v48  ;;  %326 = vadd.xlane.f32.xlu2 %v2524_v21  ;;  %294 = vadd.xlane.f32.xlu0 %v2521_v19 }
  0xec   :  { %296 = vadd.xlane.f32.xlu1 %v2527_v23 }
  0xef   :  { %v259_v24 = vpop.f32.mrf.mxu2 }
  0xf0   :  { %v2533_v25 = vadd.f32 %v259_v24, %v2470_v48 }
  0xf1   :  { %v222_v26 = vpop.f32.mrf.mxu0 }
  0xf2   :  { %v2536_v27 = vadd.f32 %v222_v26, %v2470_v48  ;;  %328 = vadd.xlane.f32.xlu0 %v2533_v25 }
  0xf4   :  { %298 = vadd.xlane.f32.xlu2 %v2536_v27 }
  0xf7   :  { %v262_v28 = vpop.f32.mrf.mxu2 }
  0xf8   :  { %v2541_v29 = vadd.f32 %v262_v28, %v2470_v48 }
  0xf9   :  { %v224_v30 = vpop.f32.mrf.mxu0 }
  0xfa   :  { %v2544_v31 = vadd.f32 %v224_v30, %v2470_v48  ;;  %330 = vadd.xlane.f32.xlu1 %v2541_v29 }
  0xfc   :  { %300 = vadd.xlane.f32.xlu0 %v2544_v31 }
  0xff   :  { %v264_v32 = vpop.f32.mrf.mxu2 }
 0x100   :  { %v2549_v33 = vadd.f32 %v264_v32, %v2470_v48 }
 0x101   :  { %v227_v51 = vpop.f32.mrf.mxu0 }
 0x102   :  { %332 = vadd.xlane.f32.xlu2 %v2549_v33  ;;  %v2608_v26 = vadd.f32 %v227_v51, %v2470_v48 }
 0x107   :  { %v267_v34 = vpop.f32.mrf.mxu2 }
 0x108   :  { %v2553_v35 = vadd.f32 %v267_v34, %v2470_v48 }
 0x109   :  { %v229_v63 = vpop.f32.mrf.mxu0 }
 0x10a   :  { %334 = vadd.xlane.f32.xlu0 %v2553_v35  ;;  %v2581_v1 = vadd.f32 %v229_v63, %v2470_v48 }
 0x10f   :  { %v269_v11 = vpop.f32.mrf.mxu2 }
 0x110   :  { %v2595_v14 = vadd.f32 %v269_v11, %v2470_v48 }
 0x117   :  { %v272_v38 = vpop.f32.mrf.mxu2 }
 0x127   :  { %v283_v43 = vpop.xlane.xlu1 %282 }
 0x128   :  { %v353_v45 = vmul.f32 %v2556_v42, %v283_v43 }
 0x12a   :  { %v2560_v46 = vsub.f32 %v2473_v50, %v353_v45 }
 0x12c   :  { %v417_v47 = vmul.f32 %v2560_v46, %v2560_v46 }
 0x12d   :  { %v315_v49 = vpop.xlane.xlu0 %314 }
 0x12e   :  { %v369_v53 = vmul.f32 %v2556_v42, %v315_v49  ;;  %449 = vadd.xlane.f32.xlu1 %v417_v47 }
 0x12f   :  { %v285_v55 = vpop.xlane.xlu1 %284 }
 0x130   :  { %v2566_v57 = vsub.f32 %v2477_v52, %v369_v53  ;;  %v354_v58 = vmul.f32 %v2556_v42, %v285_v55  ;;  %v274_v53 = vpop.f32.mrf.mxu2 }
 0x132   :  { %v2570_v59 = vsub.f32 %v2480_v54, %v354_v58  ;;  %v433_v50 = vmul.f32 %v2566_v57, %v2566_v57 }
 0x134   :  { %481 = vadd.xlane.f32.xlu0 %v433_v50  ;;  %v418_v60 = vmul.f32 %v2570_v59, %v2570_v59  ;;  %v2647_v50 = vadd.f32 %v274_v53, %v2470_v48 }
 0x135   :  { %v317_v61 = vpop.xlane.xlu0 %316 }
 0x136   :  { %v370_v62 = vmul.f32 %v2556_v42, %v317_v61  ;;  %451 = vadd.xlane.f32.xlu2 %v418_v60  ;;  %v2652_v61 = vadd.f32 %v272_v38, %v2470_v48 }
 0x138   :  { %v2578_v52 = vsub.f32 %v2485_v56, %v370_v62  ;;  %v277_v63 = vpop.f32.mrf.mxu2 }
 0x13a   :  { %v434_v54 = vmul.f32 %v2578_v52, %v2578_v52 }
 0x13c   :  { %483 = vadd.xlane.f32.xlu1 %v434_v54  ;;  %v232_v54 = vpop.f32.mrf.mxu0 }
 0x13d   :  { %v319_v3 = vpop.xlane.xlu2 %318  ;;  %v287_v5 = vpop.xlane.xlu0 %286 }
 0x13e   :  { %v371_v7 = vmul.f32 %v2556_v42, %v319_v3  ;;  %v355_v9 = vmul.f32 %v2556_v42, %v287_v5  ;;  %304 = vadd.xlane.f32.xlu2 %v2581_v1 }
 0x13f   :  { %v289_v12 = vpop.xlane.xlu1 %288 }
 0x140   :  { %v2589_v56 = vsub.f32 %v2492_v2, %v371_v7  ;;  %v2592_v13 = vsub.f32 %v2489_v0, %v355_v9  ;;  %v356_v28 = vmul.f32 %v2556_v42, %v289_v12  ;;  %v2662_v9 = vadd.f32 %v232_v54, %v2470_v48  ;;  %v2098_v54 = vld [vmem:[#allocation7 + $0x30] sm:$0xff] }
 0x142   :  { %v419_v15 = vmul.f32 %v2592_v13, %v2592_v13  ;;  %v435_v18 = vmul.f32 %v2589_v56, %v2589_v56  ;;  %v2620_v36 = vsub.f32 %v2495_v4, %v356_v28 }
 0x144   :  { %453 = vadd.xlane.f32.xlu0 %v419_v15  ;;  %336 = vadd.xlane.f32.xlu1 %v2595_v14 }
 0x145   :  { %v321_v20 = vpop.xlane.xlu2 %320 }
 0x146   :  { %v372_v22 = vmul.f32 %v2556_v42, %v321_v20  ;;  %485 = vadd.xlane.f32.xlu2 %v435_v18  ;;  %v279_v20 = vpop.f32.mrf.mxu2 }
 0x147   :  { %v291_v2 = vpop.xlane.xlu1 %290 }
 0x148   :  { %v2604_v0 = vsub.f32 %v2501_v6, %v372_v22  ;;  %v357_v24 = vmul.f32 %v2556_v42, %v291_v2  ;;  %v234_v2 = vpop.f32.mrf.mxu0 }
 0x14a   :  { %v2612_v30 = vsub.f32 %v2504_v8, %v357_v24  ;;  %v436_v32 = vmul.f32 %v2604_v0, %v2604_v0  ;;  %v420_v8 = vmul.f32 %v2620_v36, %v2620_v36  ;;  %v2677_v24 = vadd.f32 %v279_v20, %v2470_v48  ;;  %v2092_v20 = vld [vmem:[#allocation7] sm:$0xff] }
 0x14c   :  { %487 = vadd.xlane.f32.xlu0 %v436_v32  ;;  %302 = vadd.xlane.f32.xlu1 %v2608_v26  ;;  %v421_v6 = vmul.f32 %v2612_v30, %v2612_v30  ;;  %v2681_v32 = vadd.f32 %v234_v2, %v2470_v48 }
 0x14d   :  { %v323_v34 = vpop.xlane.xlu2 %322 }
 0x14e   :  { %457 = vadd.xlane.f32.xlu2 %v421_v6  ;;  %v373_v37 = vmul.f32 %v2556_v42, %v323_v34 }
 0x150   :  { %v2626_v41 = vsub.f32 %v2509_v10, %v373_v37 }
 0x152   :  { %v437_v51 = vmul.f32 %v2626_v41, %v2626_v41 }
 0x154   :  { %455 = vadd.xlane.f32.xlu1 %v420_v8 }
 0x155   :  { %v293_v39 = vpop.xlane.xlu2 %292  ;;  %v325_v40 = vpop.xlane.xlu0 %324 }
 0x156   :  { %v358_v43 = vmul.f32 %v2556_v42, %v293_v39  ;;  %v374_v45 = vmul.f32 %v2556_v42, %v325_v40  ;;  %v2695_v39 = vadd.f32 %v277_v63, %v2470_v48  ;;  %v2099_v63 = vld [vmem:[#allocation7 + $0x38] sm:$0xff] }
 0x157   :  { %1108 = vmatpush.bf16.msra.mxu1 %v2099_v63  ;;  %2108 = vmatpush.bf16.msra.mxu3 %v2099_v63 }
 0x158   :  { %v2631_v4 = vsub.f32 %v2513_v16, %v358_v43  ;;  %v2634_v47 = vsub.f32 %v2516_v17, %v374_v45 }
 0x15a   :  { %v422_v49 = vmul.f32 %v2631_v4, %v2631_v4  ;;  %v438_v10 = vmul.f32 %v2634_v47, %v2634_v47 }
 0x15b   :  { %1109 = vmatpush.bf16.msra.mxu1 %v2098_v54  ;;  %2109 = vmatpush.bf16.msra.mxu3 %v2098_v54 }
 0x15c   :  { %459 = vadd.xlane.f32.xlu0 %v422_v49  ;;  %489 = vadd.xlane.f32.xlu1 %v437_v51 }
 0x15d   :  { %491 = vadd.xlane.f32.xlu2 %v438_v10  ;;  %v295_v55 = vpop.xlane.xlu0 %294  ;;  %v327_v5 = vpop.xlane.xlu2 %326 }
 0x15e   :  { %v359_v16 = vmul.f32 %v2556_v42, %v295_v55  ;;  %v375_v12 = vmul.f32 %v2556_v42, %v327_v5 }
 0x15f   :  { %v297_v17 = vpop.xlane.xlu1 %296 }
 0x160   :  { %v2644_v58 = vsub.f32 %v2521_v19, %v359_v16  ;;  %v360_v62 = vmul.f32 %v2556_v42, %v297_v17 }
 0x162   :  { %v423_v60 = vmul.f32 %v2644_v58, %v2644_v58  ;;  %v2659_v7 = vsub.f32 %v2527_v23, %v360_v62  ;;  %v2674_v23 = vsub.f32 %v2524_v21, %v375_v12 }
 0x164   :  { %340 = vadd.xlane.f32.xlu0 %v2647_v50  ;;  %461 = vadd.xlane.f32.xlu1 %v423_v60  ;;  %v424_v18 = vmul.f32 %v2659_v7, %v2659_v7  ;;  %v439_v6 = vmul.f32 %v2674_v23, %v2674_v23 }
 0x165   :  { %338 = vadd.xlane.f32.xlu2 %v2652_v61  ;;  %v329_v19 = vpop.xlane.xlu0 %328 }
 0x166   :  { %v376_v3 = vmul.f32 %v2556_v42, %v329_v19  ;;  %v2097_v19 = vld [vmem:[#allocation7 + $0x28] sm:$0xff] }
 0x167   :  { %v299_v22 = vpop.xlane.xlu2 %298  ;;  %1110 = vmatpush.bf16.msra.mxu1 %v2097_v19  ;;  %2110 = vmatpush.bf16.msra.mxu3 %v2097_v19 }
 0x168   :  { %v2665_v11 = vsub.f32 %v2533_v25, %v376_v3  ;;  %v361_v28 = vmul.f32 %v2556_v42, %v299_v22  ;;  %v2094_v3 = vld [vmem:[#allocation7 + $0x10] sm:$0xff] }
 0x16a   :  { %v440_v15 = vmul.f32 %v2665_v11, %v2665_v11  ;;  %v2689_v21 = vsub.f32 %v2536_v27, %v361_v28  ;;  %v237_v27 = vpop.f32.mrf.mxu0 }
 0x16b   :  { %v2711_v53 = vadd.f32 %v237_v27, %v2470_v48 }
 0x16c   :  { %306 = vadd.xlane.f32.xlu0 %v2662_v9  ;;  %495 = vadd.xlane.f32.xlu1 %v440_v15  ;;  %v425_v45 = vmul.f32 %v2689_v21, %v2689_v21  ;;  %v2093_v15 = vld [vmem:[#allocation7 + $0x8] sm:$0xff] }
 0x16d   :  { %463 = vadd.xlane.f32.xlu2 %v424_v18  ;;  %v331_v25 = vpop.xlane.xlu1 %330 }
 0x16e   :  { %v377_v34 = vmul.f32 %v2556_v42, %v331_v25 }
 0x16f   :  { %v301_v38 = vpop.xlane.xlu0 %300 }
 0x170   :  { %v2692_v37 = vsub.f32 %v2541_v29, %v377_v34  ;;  %v362_v40 = vmul.f32 %v2556_v42, %v301_v38 }
 0x172   :  { %v441_v49 = vmul.f32 %v2692_v37, %v2692_v37  ;;  %v2705_v29 = vsub.f32 %v2544_v31, %v362_v40 }
 0x174   :  { %493 = vadd.xlane.f32.xlu0 %v439_v6  ;;  %308 = vadd.xlane.f32.xlu1 %v2681_v32  ;;  %v426_v17 = vmul.f32 %v2705_v29, %v2705_v29 }
 0x175   :  { %344 = vadd.xlane.f32.xlu2 %v2677_v24  ;;  %v333_v8 = vpop.xlane.xlu2 %332 }
 0x176   :  { %v378_v43 = vmul.f32 %v2556_v42, %v333_v8 }
 0x178   :  { %v2708_v51 = vsub.f32 %v2549_v33, %v378_v43  ;;  %v239_v33 = vpop.f32.mrf.mxu0 }
 0x179   :  { %v2723_v60 = vadd.f32 %v239_v33, %v2470_v48  ;;  %v2095_v48 = vld [vmem:[#allocation7 + $0x18] sm:$0xff] }
 0x17a   :  { %v442_v16 = vmul.f32 %v2708_v51, %v2708_v51 }
 0x17c   :  { %465 = vadd.xlane.f32.xlu0 %v425_v45  ;;  %342 = vadd.xlane.f32.xlu1 %v2695_v39 }
 0x17d   :  { %497 = vadd.xlane.f32.xlu2 %v441_v49  ;;  %v335_v10 = vpop.xlane.xlu0 %334 }
 0x17e   :  { %v379_v55 = vmul.f32 %v2556_v42, %v335_v10 }
 0x180   :  { %v2720_v31 = vsub.f32 %v2553_v35, %v379_v55  ;;  %v2096_v35 = vld [vmem:[#allocation7 + $0x20] sm:$0xff] }
 0x181   :  { %1111 = vmatpush.bf16.msra.mxu1 %v2096_v35  ;;  %2111 = vmatpush.bf16.msra.mxu3 %v2096_v35 }
 0x182   :  { %v443_v62 = vmul.f32 %v2720_v31, %v2720_v31 }
 0x184   :  { %499 = vadd.xlane.f32.xlu0 %v442_v16  ;;  %467 = vadd.xlane.f32.xlu1 %v426_v17 }
 0x185   :  { %310 = vadd.xlane.f32.xlu2 %v2711_v53  ;;  %1112 = vmatpush.bf16.msra.mxu1 %v2095_v48 }
 0x186   :  { %2112 = vmatpush.bf16.msra.mxu3 %v2095_v48 }
 0x189   :  { %1113 = vmatpush.bf16.msra.mxu1 %v2094_v3 }
 0x18a   :  { %2113 = vmatpush.bf16.msra.mxu3 %v2094_v3 }
 0x18c   :  { %312 = vadd.xlane.f32.xlu0 %v2723_v60  ;;  %501 = vadd.xlane.f32.xlu1 %v443_v62 }
 0x18d   :  { %1114 = vmatpush.bf16.msra.mxu1 %v2093_v15 }
 0x18e   :  { %2114 = vmatpush.bf16.msra.mxu3 %v2093_v15 }
 0x191   :  { %1115 = vmatpush.bf16.msra.mxu1 %v2092_v20 }
 0x192   :  { %2115 = vmatpush.bf16.msra.mxu3 %v2092_v20 }
 0x1a1   :  { %v450_v5 = vpop.xlane.xlu1 %449 }
 0x1a2   :  { %v513_v12 = vmul.f32 %v450_v5, %v2556_v42 }
 0x1a4   :  { %v545_v18 = vadd.f32 1e-05, %v513_v12 }
 0x1a6   :  { %2128 = vrsqrt.f32 %v545_v18  ;;  %vm583_vm2 = vweird.f32 %v545_v18 }
 0x1a7   :  { %v482_v22 = vpop.xlane.xlu0 %481 }
 0x1a8   :  { %v529_v2 = vmul.f32 %v482_v22, %v2556_v42 }
 0x1a9   :  { %v452_v25 = vpop.xlane.xlu2 %451 }
 0x1aa   :  { %v561_v28 = vadd.f32 1e-05, %v529_v2  ;;  %v514_v6 = vmul.f32 %v452_v25, %v2556_v42 }
 0x1ac   :  { %v2129_v34 = vpop.eup %2128  ;;  %2130 = vrsqrt.f32 %v561_v28  ;;  %v546_v38 = vadd.f32 1e-05, %v514_v6  ;;  %vm743_vm4 = vweird.f32 %v561_v28 }
 0x1ad   :  { %v578_v8 = vmul.f32 %v2129_v34, %v545_v18  ;;  %vm584_vm1 = vweird.f32 %v2129_v34  ;;  %v2750_v18 = vperm.slane %v2467_v44, 1 }
 0x1ae   :  { %2132 = vrsqrt.f32 %v546_v38  ;;  %vm2741_vm3 = vmor %vm583_vm2, %vm584_vm1  ;;  %vm593_vm8 = vweird.f32 %v546_v38 }
 0x1af   :  { %v579_v40 = vmul.f32 %v2129_v34, %v578_v8  ;;  %v484_v43 = vpop.xlane.xlu1 %483 }
 0x1b0   :  { %v530_v45 = vmul.f32 %v484_v43, %v2556_v42 }
 0x1b1   :  { %v580_v49 = vmul.f32 0.5, %v579_v40  ;;  %v305_v27 = vpop.xlane.xlu2 %304 }
 0x1b2   :  { %v2131_v10 = vpop.eup %2130  ;;  %v2732_v55 = vadd.f32 1e-05, %v530_v45  ;;  %v364_v16 = vmul.f32 %v2556_v42, %v305_v27 }
 0x1b3   :  { %v581_v17 = vsub.f32 1.5, %v580_v49  ;;  %v738_v33 = vmul.f32 %v2131_v10, %v561_v28  ;;  %vm744_vm5 = vweird.f32 %v2131_v10 }
 0x1b4   :  { %v2133_v62 = vpop.eup %2132  ;;  %2134 = vrsqrt.f32 %v2732_v55  ;;  %v2737_v63 = vsub.f32 %v2581_v1, %v364_v16  ;;  %vm2760_vm7 = vmor %vm743_vm4, %vm744_vm5  ;;  %vm753_vm11 = vweird.f32 %v2732_v55 }
 0x1b5   :  { %v582_v54 = vmul.f32 %v2129_v34, %v581_v17  ;;  %v739_v19 = vmul.f32 %v2131_v10, %v738_v33  ;;  %v588_v35 = vmul.f32 %v2133_v62, %v546_v38  ;;  %vm594_vm6 = vweird.f32 %v2133_v62 }
 0x1b6   :  { %v428_v48 = vmul.f32 %v2737_v63, %v2737_v63  ;;  %vm595_vm9 = vmor %vm593_vm8, %vm594_vm6 }
 0x1b7   :  { %v740_v5 = vmul.f32 0.5, %v739_v19  ;;  %v589_v12 = vmul.f32 %v2133_v62, %v588_v35  ;;  %v454_v15 = vpop.xlane.xlu0 %453  ;;  %v337_v20 = vpop.xlane.xlu1 %336  ;;  %v586_v22 = vsel %vm2741_vm3, %v2129_v34, %v582_v54 }
 0x1b8   :  { %v515_v1 = vmul.f32 %v454_v15, %v2556_v42  ;;  %v380_v2 = vmul.f32 %v2556_v42, %v337_v20  ;;  %471 = vadd.xlane.f32.xlu1 %v428_v48  ;;  %v897_v17 = vmul.f32 %v586_v22, %v2560_v46  ;;  %v2775_v15 = vperm.slane %v2467_v44, 2 }
 0x1b9   :  { %v741_v25 = vsub.f32 1.5, %v740_v5  ;;  %v590_v6 = vmul.f32 0.5, %v589_v12  ;;  %v486_v8 = vpop.xlane.xlu2 %485 }
 0x1ba   :  { %v2135_v40 = vpop.eup %2134  ;;  %v2752_v43 = vadd.f32 1e-05, %v515_v1  ;;  %v2755_v45 = vsub.f32 %v2595_v14, %v380_v2  ;;  %v531_v34 = vmul.f32 %v486_v8, %v2556_v42  ;;  %v930_v12 = vmul.f32 %v2750_v18, %v897_v17 }
 0x1bb   :  { %v742_v49 = vmul.f32 %v2131_v10, %v741_v25  ;;  %v591_v27 = vsub.f32 1.5, %v590_v6  ;;  %v748_v16 = vmul.f32 %v2135_v40, %v2732_v55  ;;  %vm754_vm10 = vweird.f32 %v2135_v40 }
 0x1bc   :  { %2136 = vrsqrt.f32 %v2752_v43  ;;  %v2765_v33 = vadd.f32 1e-05, %v531_v34  ;;  %v444_v14 = vmul.f32 %v2755_v45, %v2755_v45  ;;  %vm755_vm12 = vmor %vm753_vm11, %vm754_vm10  ;;  %vm603_vm0 = vweird.f32 %v2752_v43 }
 0x1bd   :  { %v746_v54 = vsel %vm2760_vm7, %v2131_v10, %v742_v49  ;;  %v592_v19 = vmul.f32 %v2133_v62, %v591_v27  ;;  %v749_v35 = vmul.f32 %v2135_v40, %v748_v16 }
 0x1be   :  { %2138 = vrsqrt.f32 %v2765_v33  ;;  %503 = vadd.xlane.f32.xlu2 %v444_v14  ;;  %v913_v22 = vmul.f32 %v746_v54, %v2566_v57  ;;  %vm763_vm15 = vweird.f32 %v2765_v33 }
 0x1bf   :  { %v596_v46 = vsel %vm595_vm9, %v2133_v62, %v592_v19  ;;  %v750_v48 = vmul.f32 0.5, %v749_v35  ;;  %v488_v3 = vpop.xlane.xlu0 %487  ;;  %v303_v5 = vpop.xlane.xlu1 %302 }
 0x1c0   :  { %v532_v20 = vmul.f32 %v488_v3, %v2556_v42  ;;  %v363_v10 = vmul.f32 %v2556_v42, %v303_v5  ;;  %v898_v38 = vmul.f32 %v596_v46, %v2570_v59  ;;  %v963_v59 = vadd.f32 %v2775_v15, %v930_v12 }
 0x1c1   :  { %v751_v1 = vsub.f32 1.5, %v750_v48  ;;  %v458_v2 = vpop.xlane.xlu2 %457  ;;  %v946_v16 = vmul.f32 %v2750_v18, %v913_v22 }
 0x1c2   :  { %v2781_v62 = vpop.eup %2136  ;;  %v2783_v25 = vadd.f32 1e-05, %v532_v20  ;;  %v2786_v6 = vsub.f32 %v2608_v26, %v363_v10  ;;  %v517_v44 = vmul.f32 %v458_v2, %v2556_v42  ;;  %v931_v8 = vmul.f32 %v2750_v18, %v898_v38 }
 0x1c3   :  { %v752_v34 = vmul.f32 %v2135_v40, %v751_v1  ;;  %v598_v57 = vmul.f32 %v2781_v62, %v2752_v43  ;;  %v995_v48 = vmax.f32 %v963_v59, 0.0  ;;  %v979_v12 = vadd.f32 %v2775_v15, %v946_v16 }
 0x1c4   :  { %v2139_v49 = vpop.eup %2138  ;;  %2140 = vrsqrt.f32 %v2783_v25  ;;  %v2795_v27 = vadd.f32 1e-05, %v517_v44  ;;  %v427_v26 = vmul.f32 %v2786_v6, %v2786_v6  ;;  %v964_v14 = vadd.f32 %v2775_v15, %v931_v8 }
 0x1c5   :  { %v756_v17 = vsel %vm755_vm12, %v2135_v40, %v752_v34  ;;  %v599_v28 = vmul.f32 %v2781_v62, %v598_v57  ;;  %v758_v55 = vmul.f32 %v2139_v49, %v2765_v33  ;;  %vm604_vm13 = vweird.f32 %v2781_v62 }
 0x1c6   :  { %2142 = vrsqrt.f32 %v2795_v27  ;;  %469 = vadd.xlane.f32.xlu0 %v427_v26  ;;  %v914_v54 = vmul.f32 %v756_v17, %v2578_v52  ;;  %v996_v5 = vmax.f32 %v964_v14, 0.0  ;;  %vm764_vm14 = vweird.f32 %v2139_v49  ;;  %vm2827_vm2 = vmor %vm603_vm0, %vm604_vm13 }
 0x1c7   :  { %v600_v19 = vmul.f32 0.5, %v599_v28  ;;  %v759_v35 = vmul.f32 %v2139_v49, %v758_v55  ;;  %v456_v46 = vpop.xlane.xlu1 %455  ;;  %v1011_v57 = vmax.f32 %v979_v12, 0.0  ;;  %vm2821_vm1 = vmor %vm763_vm15, %vm764_vm14  ;;  %vm773_vm4 = vweird.f32 %v2783_v25 }
 0x1c8   :  { %v516_v3 = vmul.f32 %v456_v46, %v2556_v42  ;;  %v947_v40 = vmul.f32 %v2750_v18, %v914_v54  ;;  %v1027_v1 = vpack.c.bf16 %v996_v5, %v995_v48  ;;  %vm623_vm6 = vweird.f32 %v2795_v27 }
 0x1c9   :  { %v601_v20 = vsub.f32 1.5, %v600_v19  ;;  %v760_v10 = vmul.f32 0.5, %v759_v35 }
 0x1ca   :  { %v2141_v38 = vpop.eup %2140  ;;  %v2808_v22 = vadd.f32 1e-05, %v516_v3  ;;  %v980_v2 = vadd.f32 %v2775_v15, %v947_v40  ;;  %1116 = vmatmul.bf16.vlgmr.msra.gmra.mxu1 %v1027_v1 }
 0x1cb   :  { %v761_v52 = vsub.f32 1.5, %v760_v10  ;;  %v768_v44 = vmul.f32 %v2141_v38, %v2783_v25  ;;  %v602_v34 = vmul.f32 %v2781_v62, %v601_v20  ;;  %vm774_vm3 = vweird.f32 %v2141_v38 }
 0x1cc   :  { %v2813_v8 = vpop.eup %2142  ;;  %2144 = vrsqrt.f32 %v2808_v22  ;;  %v1012_v59 = vmax.f32 %v980_v2, 0.0  ;;  %vm775_vm5 = vmor %vm773_vm4, %vm774_vm3  ;;  %vm613_vm9 = vweird.f32 %v2808_v22 }
 0x1cd   :  { %v762_v26 = vmul.f32 %v2139_v49, %v761_v52  ;;  %v769_v16 = vmul.f32 %v2141_v38, %v768_v44  ;;  %v618_v17 = vmul.f32 %v2813_v8, %v2795_v27  ;;  %v606_v43 = vsel %vm2827_vm2, %v2781_v62, %v602_v34 }
 0x1ce   :  { %v1035_v55 = vpack.c.bf16 %v1012_v59, %v1011_v57  ;;  %v899_v44 = vmul.f32 %v606_v43, %v2592_v13  ;;  %vm624_vm7 = vweird.f32 %v2813_v8 }
 0x1cf   :  { %v766_v33 = vsel %vm2821_vm1, %v2139_v49, %v762_v26  ;;  %v770_v54 = vmul.f32 0.5, %v769_v16  ;;  %v619_v19 = vmul.f32 %v2813_v8, %v618_v17  ;;  %v460_v35 = vpop.xlane.xlu0 %459  ;;  %v490_v46 = vpop.xlane.xlu1 %489  ;;  %vm2887_vm10 = vmor %vm623_vm6, %vm624_vm7 }
 0x1d0   :  { %v518_v48 = vmul.f32 %v460_v35, %v2556_v42  ;;  %v492_v3 = vpop.xlane.xlu2 %491  ;;  %v533_v5 = vmul.f32 %v490_v46, %v2556_v42  ;;  %1156 = vmatmul.bf16.vlgmr.msra.gmra.mxu3 %v1035_v55  ;;  %v915_v20 = vmul.f32 %v766_v33, %v2589_v56  ;;  %v932_v28 = vmul.f32 %v2750_v18, %v899_v44 }
 0x1d1   :  { %v771_v40 = vsub.f32 1.5, %v770_v54  ;;  %v620_v12 = vmul.f32 0.5, %v619_v19  ;;  %v534_v49 = vmul.f32 %v492_v3, %v2556_v42 }
 0x1d2   :  { %v2841_v10 = vpop.eup %2144  ;;  %v2843_v1 = vadd.f32 1e-05, %v518_v48  ;;  %v2845_v2 = vadd.f32 1e-05, %v533_v5  ;;  %v948_v26 = vmul.f32 %v2750_v18, %v915_v20 }
 0x1d3   :  { %v772_v62 = vmul.f32 %v2141_v38, %v771_v40  ;;  %v608_v52 = vmul.f32 %v2841_v10, %v2808_v22  ;;  %v621_v34 = vsub.f32 1.5, %v620_v12  ;;  %v2853_v56 = vadd.f32 1e-05, %v534_v49 }
 0x1d4   :  { %2146 = vrsqrt.f32 %v2843_v1  ;;  %vm614_vm8 = vweird.f32 %v2841_v10  ;;  %v981_v35 = vadd.f32 %v2775_v15, %v948_v26  ;;  %v2898_v49 = vadd.f32 %v2775_v15, %v932_v28 }
 0x1d5   :  { %v776_v57 = vsel %vm775_vm5, %v2141_v38, %v772_v62  ;;  %v609_v59 = vmul.f32 %v2841_v10, %v608_v52  ;;  %2148 = vrsqrt.f32 %v2845_v2  ;;  %v2864_v38 = vmul.f32 %v2813_v8, %v621_v34  ;;  %vm2908_vm11 = vmor %vm613_vm9, %vm614_vm8 }
 0x1d6   :  { %2150 = vrsqrt.f32 %v2853_v56  ;;  %v916_v25 = vmul.f32 %v776_v57, %v2604_v0  ;;  %vm633_vm12 = vweird.f32 %v2843_v1  ;;  %v1013_v34 = vmax.f32 %v981_v35, 0.0 }
 0x1d7   :  { %v610_v13 = vmul.f32 0.5, %v609_v59  ;;  %v341_v16 = vpop.xlane.xlu0 %340  ;;  %v462_v17 = vpop.xlane.xlu1 %461  ;;  %v626_v27 = vsel %vm2887_vm10, %v2813_v8, %v2864_v38  ;;  %vm783_vm1 = vweird.f32 %v2845_v2  ;;  %vm793_vm2 = vweird.f32 %v2853_v56 }
 0x1d8   :  { %v382_v55 = vmul.f32 %v2556_v42, %v341_v16  ;;  %v339_v14 = vpop.xlane.xlu2 %338  ;;  %v519_v33 = vmul.f32 %v462_v17, %v2556_v42  ;;  %v949_v54 = vmul.f32 %v2750_v18, %v916_v25 }
 0x1d9   :  { %v611_v0 = vsub.f32 1.5, %v610_v13  ;;  %v381_v19 = vmul.f32 %v2556_v42, %v339_v14 }
 0x1da   :  { %v2872_v46 = vpop.eup %2146  ;;  %v2876_v43 = vsub.f32 %v2647_v50, %v382_v55  ;;  %v2878_v48 = vadd.f32 1e-05, %v519_v33  ;;  %v982_v3 = vadd.f32 %v2775_v15, %v949_v54 }
 0x1db   :  { %v2881_v5 = vpop.eup %2148  ;;  %v612_v12 = vmul.f32 %v2841_v10, %v611_v0  ;;  %v628_v50 = vmul.f32 %v2872_v46, %v2843_v1  ;;  %v2895_v22 = vsub.f32 %v2652_v61, %v381_v19  ;;  %vm634_vm13 = vweird.f32 %v2872_v46 }
 0x1dc   :  { %v2900_v20 = vpop.eup %2150  ;;  %v778_v61 = vmul.f32 %v2881_v5, %v2845_v2  ;;  %2152 = vrsqrt.f32 %v2878_v48  ;;  %v446_v26 = vmul.f32 %v2876_v43, %v2876_v43  ;;  %v1014_v25 = vmax.f32 %v982_v3, 0.0  ;;  %vm2950_vm0 = vmor %vm633_vm12, %vm634_vm13 }
 0x1dd   :  { %v616_v52 = vsel %vm2908_vm11, %v2841_v10, %v612_v12  ;;  %v629_v44 = vmul.f32 %v2872_v46, %v628_v50  ;;  %v788_v8 = vmul.f32 %v2900_v20, %v2853_v56  ;;  %v445_v59 = vmul.f32 %v2895_v22, %v2895_v22 }
 0x1de   :  { %v779_v57 = vmul.f32 %v2881_v5, %v778_v61  ;;  %v900_v28 = vmul.f32 %v616_v52, %v2620_v36  ;;  %507 = vadd.xlane.f32.xlu0 %v446_v26  ;;  %v1036_v54 = vpack.c.bf16 %v1014_v25, %v1013_v34  ;;  %vm784_vm14 = vweird.f32 %v2881_v5 }
 0x1df   :  { %v630_v13 = vmul.f32 0.5, %v629_v44  ;;  %v789_v10 = vmul.f32 %v2900_v20, %v788_v8  ;;  %v307_v16 = vpop.xlane.xlu0 %306  ;;  %v496_v17 = vpop.xlane.xlu1 %495  ;;  %505 = vadd.xlane.f32.xlu2 %v445_v59  ;;  %vm794_vm15 = vweird.f32 %v2900_v20  ;;  %vm785_vm3 = vmor %vm783_vm1, %vm784_vm14  ;;  %vm643_vm12 = vweird.f32 %v2878_v48 }
 0x1e0   :  { %v780_v38 = vmul.f32 0.5, %v779_v57  ;;  %v365_v55 = vmul.f32 %v2556_v42, %v307_v16  ;;  %v464_v14 = vpop.xlane.xlu2 %463  ;;  %v536_v33 = vmul.f32 %v496_v17, %v2556_v42  ;;  %1161 = vmatmul.bf16.gmra.mxu3 %v1036_v54  ;;  %v933_v50 = vmul.f32 %v2750_v18, %v900_v28  ;;  %vm795_vm4 = vmor %vm793_vm2, %vm794_vm15 }
 0x1e1   :  { %v631_v0 = vsub.f32 1.5, %v630_v13  ;;  %v790_v19 = vmul.f32 0.5, %v789_v10  ;;  %v520_v35 = vmul.f32 %v464_v14, %v2556_v42  ;;  %v901_v57 = vmul.f32 %v626_v27, %v2612_v30 }
 0x1e2   :  { %v2934_v3 = vpop.eup %2152  ;;  %v781_v40 = vsub.f32 1.5, %v780_v38  ;;  %v2937_v36 = vsub.f32 %v2662_v9, %v365_v55  ;;  %v2939_v12 = vadd.f32 1e-05, %v536_v33  ;;  %v966_v26 = vadd.f32 %v2775_v15, %v933_v50 }
 0x1e3   :  { %v632_v62 = vmul.f32 %v2872_v46, %v631_v0  ;;  %v791_v61 = vsub.f32 1.5, %v790_v19  ;;  %v638_v52 = vmul.f32 %v2934_v3, %v2878_v48  ;;  %v2956_v8 = vadd.f32 1e-05, %v520_v35 }
 0x1e4   :  { %v782_v44 = vmul.f32 %v2881_v5, %v781_v40  ;;  %2154 = vrsqrt.f32 %v2939_v12  ;;  %v429_v1 = vmul.f32 %v2937_v36, %v2937_v36  ;;  %v997_v30 = vmax.f32 %v2898_v49, 0.0 }
 0x1e5   :  { %v792_v34 = vmul.f32 %v2900_v20, %v791_v61  ;;  %v636_v2 = vsel %vm2950_vm0, %v2872_v46, %v632_v62  ;;  %2156 = vrsqrt.f32 %v2956_v8  ;;  %v639_v25 = vmul.f32 %v2934_v3, %v638_v52 }
 0x1e6   :  { %v786_v59 = vsel %vm785_vm3, %v2881_v5, %v782_v44  ;;  %473 = vadd.xlane.f32.xlu1 %v429_v1  ;;  %v998_v17 = vmax.f32 %v966_v26, 0.0  ;;  %v902_v55 = vmul.f32 %v636_v2, %v2631_v4  ;;  %v934_v14 = vmul.f32 %v2750_v18, %v901_v57 }
 0x1e7   :  { %v796_v56 = vsel %vm795_vm4, %v2900_v20, %v792_v34  ;;  %v494_v13 = vpop.xlane.xlu0 %493  ;;  %v309_v10 = vpop.xlane.xlu1 %308  ;;  %v917_v27 = vmul.f32 %v786_v59, %v2626_v41  ;;  %v640_v4 = vmul.f32 0.5, %v639_v25  ;;  %vm644_vm5 = vweird.f32 %v2934_v3 }
 0x1e8   :  { %v535_v46 = vmul.f32 %v494_v13, %v2556_v42  ;;  %v345_v16 = vpop.xlane.xlu2 %344  ;;  %v366_v5 = vmul.f32 %v2556_v42, %v309_v10  ;;  %v918_v28 = vmul.f32 %v796_v56, %v2634_v47  ;;  %v1028_v54 = vpack.c.bf16 %v998_v17, %v997_v30  ;;  %vm3056_vm13 = vmor %vm643_vm12, %vm644_vm5 }
 0x1e9   :  { %v384_v38 = vmul.f32 %v2556_v42, %v345_v16  ;;  %v950_v20 = vmul.f32 %v2750_v18, %v917_v27  ;;  %v3006_v61 = vadd.f32 %v2775_v15, %v934_v14  ;;  %v935_v44 = vmul.f32 %v2750_v18, %v902_v55 }
 0x1ea   :  { %v2983_v33 = vpop.eup %2154  ;;  %v2985_v49 = vadd.f32 1e-05, %v535_v46  ;;  %v2988_v41 = vsub.f32 %v2681_v32, %v366_v5  ;;  %v951_v0 = vmul.f32 %v2750_v18, %v918_v28  ;;  %1121 = vmatmul.bf16.gmra.mxu1 %v1028_v54  ;;  %vm813_vm6 = vweird.f32 %v2939_v12 }
 0x1eb   :  { %v808_v47 = vmul.f32 %v2983_v33, %v2939_v12  ;;  %v2994_v19 = vsub.f32 %v2677_v24, %v384_v38  ;;  %v2996_v35 = vpop.eup %2156  ;;  %v983_v32 = vadd.f32 %v2775_v15, %v950_v20  ;;  %v641_v59 = vsub.f32 1.5, %v640_v4 }
 0x1ec   :  { %2158 = vrsqrt.f32 %v2985_v49  ;;  %v430_v40 = vmul.f32 %v2988_v41, %v2988_v41  ;;  %v648_v50 = vmul.f32 %v2996_v35, %v2956_v8  ;;  %v984_v52 = vadd.f32 %v2775_v15, %v951_v0 }
 0x1ed   :  { %v809_v62 = vmul.f32 %v2983_v33, %v808_v47  ;;  %v448_v24 = vmul.f32 %v2994_v19, %v2994_v19  ;;  %v1015_v9 = vmax.f32 %v983_v32, 0.0  ;;  %vm814_vm7 = vweird.f32 %v2983_v33 }
 0x1ee   :  { %475 = vadd.xlane.f32.xlu2 %v430_v40  ;;  %v649_v34 = vmul.f32 %v2996_v35, %v648_v50  ;;  %v1016_v13 = vmax.f32 %v984_v52, 0.0  ;;  %v968_v28 = vadd.f32 %v2775_v15, %v935_v44  ;;  %vm654_vm8 = vweird.f32 %v2996_v35  ;;  %vm3031_vm10 = vmor %vm813_vm6, %vm814_vm7 }
 0x1ef   :  { %v810_v1 = vmul.f32 0.5, %v809_v62  ;;  %v466_v57 = vpop.xlane.xlu0 %465  ;;  %v343_v2 = vpop.xlane.xlu1 %342  ;;  %511 = vadd.xlane.f32.xlu1 %v448_v24  ;;  %vm653_vm9 = vweird.f32 %v2956_v8  ;;  %v642_v0 = vmul.f32 %v2934_v3, %v641_v59  ;;  %v999_v48 = vmax.f32 %v3006_v61, 0.0 }
 0x1f0   :  { %v521_v26 = vmul.f32 %v466_v57, %v2556_v42  ;;  %v498_v56 = vpop.xlane.xlu2 %497  ;;  %v383_v25 = vmul.f32 %v2556_v42, %v343_v2  ;;  %v650_v10 = vmul.f32 0.5, %v649_v34  ;;  %v1037_v17 = vpack.c.bf16 %v1016_v13, %v1015_v9  ;;  %vm3045_vm11 = vmor %vm653_vm9, %vm654_vm8 }
 0x1f1   :  { %v811_v30 = vsub.f32 1.5, %v810_v1  ;;  %v537_v27 = vmul.f32 %v498_v56, %v2556_v42  ;;  %v1000_v40 = vmax.f32 %v968_v28, 0.0  ;;  %vm803_vm15 = vweird.f32 %v2985_v49 }
 0x1f2   :  { %v2159_v46 = vpop.eup %2158  ;;  %v3019_v16 = vadd.f32 1e-05, %v521_v26  ;;  %v3022_v5 = vsub.f32 %v2695_v39, %v383_v25  ;;  %v651_v38 = vsub.f32 1.5, %v650_v10  ;;  %1166 = vmatmul.bf16.gmra.mxu3 %v1037_v17 }
 0x1f3   :  { %v812_v20 = vmul.f32 %v2983_v33, %v811_v30  ;;  %v798_v55 = vmul.f32 %v2159_v46, %v2985_v49  ;;  %v3036_v39 = vadd.f32 1e-05, %v537_v27  ;;  %vm804_vm14 = vweird.f32 %v2159_v46 }
 0x1f4   :  { %2160 = vrsqrt.f32 %v3019_v16  ;;  %v447_v54 = vmul.f32 %v3022_v5, %v3022_v5  ;;  %v652_v47 = vmul.f32 %v2996_v35, %v651_v38  ;;  %v1029_v56 = vpack.c.bf16 %v1000_v40, %v999_v48  ;;  %vm805_vm0 = vmor %vm803_vm15, %vm804_vm14 }
 0x1f5   :  { %v816_v12 = vsel %vm3031_vm10, %v2983_v33, %v812_v20  ;;  %v799_v8 = vmul.f32 %v2159_v46, %v798_v55  ;;  %2162 = vrsqrt.f32 %v3036_v39  ;;  %vm663_vm1 = vweird.f32 %v3019_v16 }
 0x1f6   :  { %509 = vadd.xlane.f32.xlu0 %v447_v54  ;;  %v656_v32 = vsel %vm3045_vm11, %v2996_v35, %v652_v47  ;;  %v920_v34 = vmul.f32 %v816_v12, %v2665_v11  ;;  %v646_v35 = vsel %vm3056_vm13, %v2934_v3, %v642_v0  ;;  %vm823_vm5 = vweird.f32 %v3036_v39 }
 0x1f7   :  { %v800_v50 = vmul.f32 0.5, %v799_v8  ;;  %v500_v62 = vpop.xlane.xlu0 %499  ;;  %v468_v24 = vpop.xlane.xlu1 %467  ;;  %v904_v25 = vmul.f32 %v656_v32, %v2659_v7  ;;  %v903_v10 = vmul.f32 %v646_v35, %v2644_v58 }
 0x1f8   :  { %v538_v52 = vmul.f32 %v500_v62, %v2556_v42  ;;  %v311_v9 = vpop.xlane.xlu2 %310  ;;  %v522_v44 = vmul.f32 %v468_v24, %v2556_v42  ;;  %v953_v30 = vmul.f32 %v2750_v18, %v920_v34 }
 0x1f9   :  { %v801_v1 = vsub.f32 1.5, %v800_v50  ;;  %v367_v57 = vmul.f32 %v2556_v42, %v311_v9  ;;  %v937_v17 = vmul.f32 %v2750_v18, %v904_v25 }
 0x1fa   :  { %v3068_v2 = vpop.eup %2160  ;;  %v3070_v59 = vadd.f32 1e-05, %v538_v52  ;;  %v3072_v26 = vadd.f32 1e-05, %v522_v44  ;;  %1126 = vmatmul.bf16.gmra.mxu1 %v1029_v56  ;;  %v986_v54 = vadd.f32 %v2775_v15, %v953_v30 }
 0x1fb   :  { %v802_v61 = vmul.f32 %v2159_v46, %v801_v1  ;;  %v658_v11 = vmul.f32 %v3068_v2, %v3019_v16  ;;  %v3079_v3 = vsub.f32 %v2711_v53, %v367_v57  ;;  %v2163_v13 = vpop.eup %2162  ;;  %vm664_vm2 = vweird.f32 %v3068_v2 }
 0x1fc   :  { %2164 = vrsqrt.f32 %v3070_v59  ;;  %v818_v49 = vmul.f32 %v2163_v13, %v3036_v39  ;;  %v970_v8 = vadd.f32 %v2775_v15, %v937_v17  ;;  %vm824_vm3 = vweird.f32 %v2163_v13  ;;  %vm3109_vm4 = vmor %vm663_vm1, %vm664_vm2 }
 0x1fd   :  { %v806_v27 = vsel %vm805_vm0, %v2159_v46, %v802_v61  ;;  %v659_v7 = vmul.f32 %v3068_v2, %v658_v11  ;;  %2166 = vrsqrt.f32 %v3072_v26  ;;  %v431_v53 = vmul.f32 %v3079_v3, %v3079_v3  ;;  %vm825_vm6 = vmor %vm823_vm5, %vm824_vm3 }
 0x1fe   :  { %v919_v28 = vmul.f32 %v806_v27, %v2674_v23  ;;  %v819_v20 = vmul.f32 %v2163_v13, %v818_v49  ;;  %v936_v46 = vmul.f32 %v2750_v18, %v903_v10  ;;  %v1018_v9 = vmax.f32 %v986_v54, 0.0 }
 0x1ff   :  { %v660_v38 = vmul.f32 0.5, %v659_v7  ;;  %v313_v55 = vpop.xlane.xlu0 %312  ;;  %477 = vadd.xlane.f32.xlu2 %v431_v53  ;;  %v1002_v35 = vmax.f32 %v970_v8, 0.0  ;;  %vm833_vm8 = vweird.f32 %v3070_v59  ;;  %vm673_vm11 = vweird.f32 %v3072_v26 }
 0x200   :  { %v368_v58 = vmul.f32 %v2556_v42, %v313_v55  ;;  %v952_v14 = vmul.f32 %v2750_v18, %v919_v28  ;;  %v820_v47 = vmul.f32 0.5, %v819_v20  ;;  %v969_v33 = vadd.f32 %v2775_v15, %v936_v46 }
 0x201   :  { %v661_v0 = vsub.f32 1.5, %v660_v38 }
 0x202   :  { %v2165_v12 = vpop.eup %2164  ;;  %v3098_v23 = vsub.f32 %v2723_v60, %v368_v58  ;;  %v985_v4 = vadd.f32 %v2775_v15, %v952_v14  ;;  %v821_v32 = vsub.f32 1.5, %v820_v47  ;;  %v1001_v61 = vmax.f32 %v969_v33, 0.0  ;;  %v502_v47 = vpop.xlane.xlu1 %501 }
 0x203   :  { %v662_v40 = vmul.f32 %v3068_v2, %v661_v0  ;;  %v828_v50 = vmul.f32 %v2165_v12, %v3070_v59  ;;  %v2167_v62 = vpop.eup %2166  ;;  %vm834_vm7 = vweird.f32 %v2165_v12 }
 0x204   :  { %v432_v24 = vmul.f32 %v3098_v23, %v3098_v23  ;;  %v1017_v52 = vmax.f32 %v985_v4, 0.0  ;;  %v822_v44 = vmul.f32 %v2163_v13, %v821_v32  ;;  %v668_v34 = vmul.f32 %v2167_v62, %v3072_v26  ;;  %vm835_vm10 = vmor %vm833_vm8, %vm834_vm7 }
 0x205   :  { %v829_v48 = vmul.f32 %v2165_v12, %v828_v50  ;;  %v666_v57 = vsel %vm3109_vm4, %v3068_v2, %v662_v40  ;;  %v1030_v30 = vpack.c.bf16 %v1002_v35, %v1001_v61  ;;  %vm674_vm9 = vweird.f32 %v2167_v62 }
 0x206   :  { %479 = vadd.xlane.f32.xlu0 %v432_v24  ;;  %v1038_v1 = vpack.c.bf16 %v1018_v9, %v1017_v52  ;;  %v826_v56 = vsel %vm825_vm6, %v2163_v13, %v822_v44  ;;  %v669_v25 = vmul.f32 %v2167_v62, %v668_v34  ;;  %v905_v27 = vmul.f32 %v666_v57, %v2689_v21  ;;  %vm675_vm12 = vmor %vm673_vm11, %vm674_vm9 }
 0x207   :  { %v830_v16 = vmul.f32 0.5, %v829_v48  ;;  %v921_v11 = vmul.f32 %v826_v56, %v2692_v37 }
 0x208   :  { %1171 = vmatmul.bf16.gmra.mxu3 %v1038_v1  ;;  %v670_v39 = vmul.f32 0.5, %v669_v25  ;;  %v938_v37 = vmul.f32 %v2750_v18, %v905_v27 }
 0x209   :  { %v831_v10 = vsub.f32 1.5, %v830_v16  ;;  %v954_v2 = vmul.f32 %v2750_v18, %v921_v11 }
 0x20a   :  { %v671_v49 = vsub.f32 1.5, %v670_v39  ;;  %1131 = vmatmul.bf16.gmra.mxu1 %v1030_v30  ;;  %v971_v55 = vadd.f32 %v2775_v15, %v938_v37 }
 0x20b   :  { %v832_v7 = vmul.f32 %v2165_v12, %v831_v10  ;;  %v987_v38 = vadd.f32 %v2775_v15, %v954_v2 }
 0x20c   :  { %v672_v53 = vmul.f32 %v2167_v62, %v671_v49  ;;  %v1003_v54 = vmax.f32 %v971_v55, 0.0 }
 0x20d   :  { %v836_v13 = vsel %vm835_vm10, %v2165_v12, %v832_v7  ;;  %v1019_v46 = vmax.f32 %v987_v38, 0.0 }
 0x20e   :  { %v922_v17 = vmul.f32 %v836_v13, %v2708_v51  ;;  %v676_v28 = vsel %vm675_vm12, %v2167_v62, %v672_v53 }
 0x20f   :  { %v906_v21 = vmul.f32 %v676_v28, %v2705_v29  ;;  %v539_v29 = vmul.f32 %v502_v47, %v2556_v42  ;;  %v3141_v28 = vld [vmem:[#allocation8] sm:$0xff] }
 0x210   :  { %v955_v59 = vmul.f32 %v2750_v18, %v922_v17 }
 0x211   :  { %v939_v20 = vmul.f32 %v2750_v18, %v906_v21  ;;  %v571_v8 = vadd.f32 1e-05, %v539_v29  ;;  %v3144_v21 = vperm.slane %v3141_v28, 3 }
 0x212   :  { %v988_v58 = vadd.f32 %v2775_v15, %v955_v59 }
 0x213   :  { %v972_v26 = vadd.f32 %v2775_v15, %v939_v20  ;;  %2168 = vrsqrt.f32 %v571_v8  ;;  %vm843_vm14 = vweird.f32 %v571_v8 }
 0x214   :  { %v1020_v14 = vmax.f32 %v988_v58, 0.0 }
 0x215   :  { %v1004_v0 = vmax.f32 %v972_v26, 0.0 }
 0x216   :  { %v1039_v51 = vpack.c.bf16 %v1020_v14, %v1019_v46 }
 0x217   :  { %v1031_v12 = vpack.c.bf16 %v1004_v0, %v1003_v54 }
 0x218   :  { %1176 = vmatmul.bf16.gmra.mxu3 %v1039_v51 }
 0x219   :  { %v2169_v4 = vpop.eup %2168 }
 0x21a   :  { %1136 = vmatmul.bf16.gmra.mxu1 %v1031_v12  ;;  %v838_v40 = vmul.f32 %v2169_v4, %v571_v8  ;;  %vm844_vm13 = vweird.f32 %v2169_v4 }
 0x21b   :  { %vm845_vm15 = vmor %vm843_vm14, %vm844_vm13 }
 0x21c   :  { %v839_v24 = vmul.f32 %v2169_v4, %v838_v40 }
 0x21e   :  { %v840_v9 = vmul.f32 0.5, %v839_v24 }
 0x220   :  { %v841_v48 = vsub.f32 1.5, %v840_v9 }
 0x222   :  { %v842_v56 = vmul.f32 %v2169_v4, %v841_v48 }
 0x224   :  { %v846_v10 = vsel %vm845_vm15, %v2169_v4, %v842_v56 }
 0x225   :  { %v923_v7 = vmul.f32 %v846_v10, %v2720_v31 }
 0x227   :  { %v956_v31 = vmul.f32 %v2750_v18, %v923_v7 }
 0x229   :  { %v989_v54 = vadd.f32 %v2775_v15, %v956_v31 }
 0x22b   :  { %v472_v32 = vpop.xlane.xlu1 %471 }
 0x22c   :  { %v524_v50 = vmul.f32 %v472_v32, %v2556_v42 }
 0x22e   :  { %v556_v62 = vadd.f32 1e-05, %v524_v50 }
 0x230   :  { %2170 = vrsqrt.f32 %v556_v62  ;;  %vm693_vm2 = vweird.f32 %v556_v62 }
 0x231   :  { %v504_v33 = vpop.xlane.xlu2 %503 }
 0x232   :  { %v540_v52 = vmul.f32 %v504_v33, %v2556_v42 }
 0x234   :  { %v572_v60 = vadd.f32 1e-05, %v540_v52 }
 0x236   :  { %v2171_v44 = vpop.eup %2170  ;;  %2172 = vrsqrt.f32 %v572_v60  ;;  %vm853_vm4 = vweird.f32 %v572_v60 }
 0x237   :  { %v688_v34 = vmul.f32 %v2171_v44, %v556_v62  ;;  %vm694_vm0 = vweird.f32 %v2171_v44 }
 0x238   :  { %vm3137_vm3 = vmor %vm693_vm2, %vm694_vm0 }
 0x239   :  { %v689_v35 = vmul.f32 %v2171_v44, %v688_v34  ;;  %v470_v1 = vpop.xlane.xlu0 %469 }
 0x23a   :  { %v523_v57 = vmul.f32 %v470_v1, %v2556_v42 }
 0x23b   :  { %v690_v16 = vmul.f32 0.5, %v689_v35 }
 0x23c   :  { %v2173_v25 = vpop.eup %2172  ;;  %v555_v61 = vadd.f32 1e-05, %v523_v57 }
 0x23d   :  { %v848_v11 = vmul.f32 %v2173_v25, %v572_v60  ;;  %v691_v39 = vsub.f32 1.5, %v690_v16  ;;  %vm854_vm1 = vweird.f32 %v2173_v25 }
 0x23e   :  { %2174 = vrsqrt.f32 %v555_v61  ;;  %vm855_vm5 = vmor %vm853_vm4, %vm854_vm1  ;;  %vm683_vm7 = vweird.f32 %v555_v61 }
 0x23f   :  { %v849_v30 = vmul.f32 %v2173_v25, %v848_v11  ;;  %v692_v49 = vmul.f32 %v2171_v44, %v691_v39 }
 0x241   :  { %v850_v27 = vmul.f32 0.5, %v849_v30  ;;  %v696_v59 = vsel %vm3137_vm3, %v2171_v44, %v692_v49 }
 0x242   :  { %v908_v0 = vmul.f32 %v696_v59, %v2737_v63 }
 0x243   :  { %v851_v2 = vsub.f32 1.5, %v850_v27 }
 0x244   :  { %v2175_v13 = vpop.eup %2174  ;;  %v941_v8 = vmul.f32 %v2750_v18, %v908_v0 }
 0x245   :  { %v852_v37 = vmul.f32 %v2173_v25, %v851_v2  ;;  %v678_v17 = vmul.f32 %v2175_v13, %v555_v61  ;;  %vm684_vm6 = vweird.f32 %v2175_v13 }
 0x246   :  { %vm685_vm8 = vmor %vm683_vm7, %vm684_vm6  ;;  %v974_v24 = vadd.f32 %v2775_v15, %v941_v8 }
 0x247   :  { %v856_v38 = vsel %vm855_vm5, %v2173_v25, %v852_v37  ;;  %v679_v20 = vmul.f32 %v2175_v13, %v678_v17  ;;  %v1117_v26 = vpop.f32.mrf.mxu1 }
 0x248   :  { %v924_v55 = vmul.f32 %v856_v38, %v2755_v45  ;;  %v3151_v46 = vadd.f32 %v1117_v26, %v3144_v21  ;;  %v1021_v45 = vmax.f32 %v989_v54, 0.0  ;;  %v1006_v35 = vmax.f32 %v974_v24, 0.0 }
 0x249   :  { %v680_v58 = vmul.f32 0.5, %v679_v20 }
 0x24a   :  { %v957_v14 = vmul.f32 %v2750_v18, %v924_v55  ;;  %1197 = vadd.xlane.f32.xlu1 %v3151_v46 }
 0x24b   :  { %v681_v51 = vsub.f32 1.5, %v680_v58 }
 0x24c   :  { %v990_v47 = vadd.f32 %v2775_v15, %v957_v14 }
 0x24d   :  { %v682_v12 = vmul.f32 %v2175_v13, %v681_v51 }
 0x24e   :  { %v1022_v29 = vmax.f32 %v990_v47, 0.0 }
 0x24f   :  { %v686_v4 = vsel %vm685_vm8, %v2175_v13, %v682_v12  ;;  %v1119_v50 = vpop.f32.mrf.mxu1 }
 0x250   :  { %v1040_v40 = vpack.c.bf16 %v1022_v29, %v1021_v45  ;;  %v907_v32 = vmul.f32 %v686_v4, %v2786_v6  ;;  %v3161_v63 = vadd.f32 %v1119_v50, %v3144_v21 }
 0x251   :  { %v508_v52 = vpop.xlane.xlu0 %507 }
 0x252   :  { %1181 = vmatmul.bf16.gmra.mxu3 %v1040_v40  ;;  %v940_v62 = vmul.f32 %v2750_v18, %v907_v32  ;;  %v506_v33 = vpop.xlane.xlu2 %505  ;;  %v542_v60 = vmul.f32 %v508_v52, %v2556_v42  ;;  %1199 = vadd.xlane.f32.xlu2 %v3161_v63 }
 0x253   :  { %v541_v9 = vmul.f32 %v506_v33, %v2556_v42  ;;  %v1157_v1 = vpop.f32.mrf.mxu3 }
 0x254   :  { %v973_v44 = vadd.f32 %v2775_v15, %v940_v62  ;;  %v574_v48 = vadd.f32 1e-05, %v542_v60  ;;  %v3170_v56 = vadd.f32 %v1157_v1, %v3144_v21 }
 0x255   :  { %v573_v6 = vadd.f32 1e-05, %v541_v9 }
 0x256   :  { %v1005_v34 = vmax.f32 %v973_v44, 0.0  ;;  %vm873_vm13 = vweird.f32 %v574_v48 }
 0x257   :  { %2176 = vrsqrt.f32 %v573_v6  ;;  %vm863_vm11 = vweird.f32 %v573_v6 }
 0x258   :  { %v1032_v57 = vpack.c.bf16 %v1006_v35, %v1005_v34  ;;  %2178 = vrsqrt.f32 %v574_v48 }
 0x259   :  { %v474_v16 = vpop.xlane.xlu1 %473 }
 0x25a   :  { %1141 = vmatmul.bf16.gmra.mxu1 %v1032_v57  ;;  %v525_v25 = vmul.f32 %v474_v16, %v2556_v42  ;;  %1229 = vadd.xlane.f32.xlu2 %v3170_v56 }
 0x25b   :  { %v1159_v53 = vpop.f32.mrf.mxu3 }
 0x25c   :  { %v557_v61 = vadd.f32 1e-05, %v525_v25 }
 0x25d   :  { %v2177_v11 = vpop.eup %2176 }
 0x25e   :  { %v2179_v10 = vpop.eup %2178  ;;  %v858_v39 = vmul.f32 %v2177_v11, %v573_v6  ;;  %2180 = vrsqrt.f32 %v557_v61  ;;  %vm864_vm9 = vweird.f32 %v2177_v11  ;;  %vm703_vm0 = vweird.f32 %v557_v61 }
 0x25f   :  { %v868_v30 = vmul.f32 %v2179_v10, %v574_v48  ;;  %vm874_vm10 = vweird.f32 %v2179_v10  ;;  %vm865_vm12 = vmor %vm863_vm11, %vm864_vm9 }
 0x260   :  { %v859_v27 = vmul.f32 %v2177_v11, %v858_v39  ;;  %vm875_vm14 = vmor %vm873_vm13, %vm874_vm10 }
 0x261   :  { %v476_v7 = vpop.xlane.xlu2 %475  ;;  %v869_v49 = vmul.f32 %v2179_v10, %v868_v30 }
 0x262   :  { %v526_v2 = vmul.f32 %v476_v7, %v2556_v42  ;;  %v860_v13 = vmul.f32 0.5, %v859_v27  ;;  %v512_v37 = vpop.xlane.xlu1 %511 }
 0x263   :  { %v870_v17 = vmul.f32 0.5, %v869_v49  ;;  %v544_v59 = vmul.f32 %v512_v37, %v2556_v42  ;;  %v1162_v52 = vpop.f32.mrf.mxu3 }
 0x264   :  { %v3175_v31 = vadd.f32 1e-05, %v526_v2  ;;  %v2181_v38 = vpop.eup %2180  ;;  %v861_v20 = vsub.f32 1.5, %v860_v13 }
 0x265   :  { %v871_v55 = vsub.f32 1.5, %v870_v17  ;;  %v698_v58 = vmul.f32 %v2181_v38, %v557_v61  ;;  %v3179_v14 = vadd.f32 1e-05, %v544_v59  ;;  %vm704_vm15 = vweird.f32 %v2181_v38 }
 0x266   :  { %2182 = vrsqrt.f32 %v3175_v31  ;;  %v862_v26 = vmul.f32 %v2177_v11, %v861_v20  ;;  %vm3195_vm1 = vmor %vm703_vm0, %vm704_vm15  ;;  %vm713_vm3 = vweird.f32 %v3175_v31 }
 0x267   :  { %v872_v54 = vmul.f32 %v2179_v10, %v871_v55  ;;  %v699_v0 = vmul.f32 %v2181_v38, %v698_v58  ;;  %2184 = vrsqrt.f32 %v3179_v14  ;;  %v1122_v47 = vpop.f32.mrf.mxu1  ;;  %vm893_vm6 = vweird.f32 %v3179_v14 }
 0x268   :  { %v866_v51 = vsel %vm865_vm12, %v2177_v11, %v862_v26  ;;  %v3183_v8 = vadd.f32 %v1122_v47, %v3144_v21  ;;  %v3205_v11 = vadd.f32 %v1159_v53, %v3144_v21 }
 0x269   :  { %v510_v12 = vpop.xlane.xlu0 %509  ;;  %v876_v45 = vsel %vm875_vm14, %v2179_v10, %v872_v54  ;;  %v700_v29 = vmul.f32 0.5, %v699_v0  ;;  %v925_v40 = vmul.f32 %v866_v51, %v2895_v22 }
 0x26a   :  { %v543_v4 = vmul.f32 %v510_v12, %v2556_v42  ;;  %v926_v32 = vmul.f32 %v876_v45, %v2876_v43  ;;  %1201 = vadd.xlane.f32.xlu0 %v3183_v8 }
 0x26b   :  { %v701_v62 = vsub.f32 1.5, %v700_v29  ;;  %v958_v9 = vmul.f32 %v2750_v18, %v925_v40  ;;  %v1164_v58 = vpop.f32.mrf.mxu3 }
 0x26c   :  { %v2183_v50 = vpop.eup %2182  ;;  %v3189_v24 = vadd.f32 1e-05, %v543_v4  ;;  %v959_v60 = vmul.f32 %v2750_v18, %v926_v32 }
 0x26d   :  { %v708_v33 = vmul.f32 %v2183_v50, %v3175_v31  ;;  %v702_v44 = vmul.f32 %v2181_v38, %v701_v62  ;;  %v2185_v22 = vpop.eup %2184  ;;  %v991_v48 = vadd.f32 %v2775_v15, %v958_v9  ;;  %vm714_vm2 = vweird.f32 %v2183_v50 }
 0x26e   :  { %2186 = vrsqrt.f32 %v3189_v24  ;;  %v992_v34 = vadd.f32 %v2775_v15, %v959_v60  ;;  %v888_v1 = vmul.f32 %v2185_v22, %v3179_v14  ;;  %vm3216_vm4 = vmor %vm713_vm3, %vm714_vm2  ;;  %vm894_vm5 = vweird.f32 %v2185_v22 }
 0x26f   :  { %v709_v6 = vmul.f32 %v2183_v50, %v708_v33  ;;  %v706_v35 = vsel %vm3195_vm1, %v2181_v38, %v702_v44  ;;  %v1124_v16 = vpop.f32.mrf.mxu1  ;;  %v1023_v25 = vmax.f32 %v991_v48, 0.0  ;;  %vm895_vm7 = vmor %vm893_vm6, %vm894_vm5  ;;  %v3225_v31 = vadd.f32 %v1162_v52, %v3144_v21 }
 0x270   :  { %v1024_v61 = vmax.f32 %v992_v34, 0.0  ;;  %v889_v10 = vmul.f32 %v2185_v22, %v888_v1  ;;  %v3208_v39 = vadd.f32 %v1124_v16, %v3144_v21  ;;  %v909_v49 = vmul.f32 %v706_v35, %v2937_v36 }
 0x271   :  { %v710_v57 = vmul.f32 0.5, %v709_v6  ;;  %vm883_vm9 = vweird.f32 %v3189_v24  ;;  %v3242_v1 = vadd.f32 %v1164_v58, %v3144_v21 }
 0x272   :  { %v478_v27 = vpop.xlane.xlu2 %477  ;;  %v1041_v7 = vpack.c.bf16 %v1024_v61, %v1023_v25  ;;  %v890_v13 = vmul.f32 0.5, %v889_v10  ;;  %1203 = vadd.xlane.f32.xlu1 %v3208_v39  ;;  %1231 = vadd.xlane.f32.xlu0 %v3205_v11  ;;  %v942_v26 = vmul.f32 %v2750_v18, %v909_v49 }
 0x273   :  { %v711_v30 = vsub.f32 1.5, %v710_v57  ;;  %v527_v37 = vmul.f32 %v478_v27, %v2556_v42 }
 0x274   :  { %v2187_v2 = vpop.eup %2186  ;;  %1186 = vmatmul.bf16.gmra.mxu3 %v1041_v7  ;;  %v891_v38 = vsub.f32 1.5, %v890_v13  ;;  %v975_v32 = vadd.f32 %v2775_v15, %v942_v26 }
 0x275   :  { %v712_v53 = vmul.f32 %v2183_v50, %v711_v30  ;;  %v878_v17 = vmul.f32 %v2187_v2, %v3189_v24  ;;  %v559_v36 = vadd.f32 1e-05, %v527_v37  ;;  %vm884_vm8 = vweird.f32 %v2187_v2  ;;  %v1167_v48 = vpop.f32.mrf.mxu3 }
 0x276   :  { %v892_v54 = vmul.f32 %v2185_v22, %v891_v38  ;;  %vm885_vm10 = vmor %vm883_vm9, %vm884_vm8  ;;  %v3253_v59 = vadd.f32 %v1167_v48, %v3144_v21 }
 0x277   :  { %v716_v20 = vsel %vm3216_vm4, %v2183_v50, %v712_v53  ;;  %v879_v55 = vmul.f32 %v2187_v2, %v878_v17  ;;  %2188 = vrsqrt.f32 %v559_v36  ;;  %v1127_v51 = vpop.f32.mrf.mxu1  ;;  %vm723_vm12 = vweird.f32 %v559_v36 }
 0x278   :  { %v910_v12 = vmul.f32 %v716_v20, %v2988_v41  ;;  %v896_v45 = vsel %vm895_vm7, %v2185_v22, %v892_v54  ;;  %v3229_v29 = vadd.f32 %v1127_v51, %v3144_v21  ;;  %v1007_v22 = vmax.f32 %v975_v32, 0.0 }
 0x279   :  { %v880_v0 = vmul.f32 0.5, %v879_v55  ;;  %v480_v47 = vpop.xlane.xlu0 %479  ;;  %v928_v50 = vmul.f32 %v896_v45, %v2994_v19 }
 0x27a   :  { %v528_v4 = vmul.f32 %v480_v47, %v2556_v42  ;;  %v943_v14 = vmul.f32 %v2750_v18, %v910_v12  ;;  %1233 = vadd.xlane.f32.xlu1 %v3225_v31  ;;  %1205 = vadd.xlane.f32.xlu2 %v3229_v29 }
 0x27b   :  { %v881_v40 = vsub.f32 1.5, %v880_v0  ;;  %v961_v9 = vmul.f32 %v2750_v18, %v928_v50 }
 0x27c   :  { %v560_v62 = vadd.f32 1e-05, %v528_v4  ;;  %v976_v33 = vadd.f32 %v2775_v15, %v943_v14 }
 0x27d   :  { %v882_v41 = vmul.f32 %v2187_v2, %v881_v40  ;;  %v2189_v52 = vpop.eup %2188  ;;  %v994_v16 = vadd.f32 %v2775_v15, %v961_v9  ;;  %v1169_v58 = vpop.f32.mrf.mxu3 }
 0x27e   :  { %2190 = vrsqrt.f32 %v560_v62  ;;  %v718_v44 = vmul.f32 %v2189_v52, %v559_v36  ;;  %v1008_v43 = vmax.f32 %v976_v33, 0.0  ;;  %vm724_vm11 = vweird.f32 %v2189_v52 }
 0x27f   :  { %v886_v60 = vsel %vm885_vm10, %v2187_v2, %v882_v41  ;;  %v1129_v34 = vpop.f32.mrf.mxu1  ;;  %v1026_v7 = vmax.f32 %v994_v16, 0.0  ;;  %vm725_vm13 = vmor %vm723_vm12, %vm724_vm11  ;;  %vm733_vm15 = vweird.f32 %v560_v62  ;;  %v3264_v47 = vadd.f32 %v1169_v58, %v3144_v21 }
 0x280   :  { %v927_v19 = vmul.f32 %v886_v60, %v3022_v5  ;;  %v719_v6 = vmul.f32 %v2189_v52, %v718_v44  ;;  %v1033_v35 = vpack.c.bf16 %v1008_v43, %v1007_v22  ;;  %v3245_v24 = vadd.f32 %v1129_v34, %v3144_v21 }
 0x282   :  { %v960_v57 = vmul.f32 %v2750_v18, %v927_v19  ;;  %v720_v25 = vmul.f32 0.5, %v719_v6  ;;  %1146 = vmatmul.bf16.gmra.mxu1 %v1033_v35  ;;  %1235 = vadd.xlane.f32.xlu2 %v3242_v1 }
 0x283   :  { %1207 = vadd.xlane.f32.xlu0 %v3245_v24 }
 0x284   :  { %v2191_v61 = vpop.eup %2190  ;;  %v993_v5 = vadd.f32 %v2775_v15, %v960_v57  ;;  %v721_v10 = vsub.f32 1.5, %v720_v25 }
 0x285   :  { %v728_v30 = vmul.f32 %v2191_v61, %v560_v62  ;;  %vm734_vm14 = vweird.f32 %v2191_v61 }
 0x286   :  { %v1025_v27 = vmax.f32 %v993_v5, 0.0  ;;  %v722_v49 = vmul.f32 %v2189_v52, %v721_v10  ;;  %vm735_vm0 = vmor %vm733_vm15, %vm734_vm14 }
 0x287   :  { %v729_v2 = vmul.f32 %v2191_v61, %v728_v30  ;;  %v1132_v17 = vpop.f32.mrf.mxu1 }
 0x288   :  { %v1042_v13 = vpack.c.bf16 %v1026_v7, %v1025_v27  ;;  %v726_v37 = vsel %vm725_vm13, %v2189_v52, %v722_v49  ;;  %v3256_v38 = vadd.f32 %v1132_v17, %v3144_v21 }
 0x289   :  { %v730_v53 = vmul.f32 0.5, %v729_v2  ;;  %v911_v20 = vmul.f32 %v726_v37, %v3079_v3 }
 0x28a   :  { %1191 = vmatmul.bf16.gmra.mxu3 %v1042_v13  ;;  %1209 = vadd.xlane.f32.xlu1 %v3256_v38 }
 0x28b   :  { %v731_v55 = vsub.f32 1.5, %v730_v53  ;;  %1237 = vadd.xlane.f32.xlu0 %v3253_v59  ;;  %v944_v26 = vmul.f32 %v2750_v18, %v911_v20  ;;  %v1172_v4 = vpop.f32.mrf.mxu3 }
 0x28c   :  { %v3275_v62 = vadd.f32 %v1172_v4, %v3144_v21 }
 0x28d   :  { %v732_v36 = vmul.f32 %v2191_v61, %v731_v55  ;;  %v977_v45 = vadd.f32 %v2775_v15, %v944_v26 }
 0x28f   :  { %v736_v54 = vsel %vm735_vm0, %v2191_v61, %v732_v36  ;;  %v1134_v51 = vpop.f32.mrf.mxu1  ;;  %v1009_v14 = vmax.f32 %v977_v45, 0.0 }
 0x290   :  { %v912_v0 = vmul.f32 %v736_v54, %v3098_v23  ;;  %v3267_v3 = vadd.f32 %v1134_v51, %v3144_v21 }
 0x292   :  { %v945_v12 = vmul.f32 %v2750_v18, %v912_v0  ;;  %1239 = vadd.xlane.f32.xlu1 %v3264_v47  ;;  %1211 = vadd.xlane.f32.xlu2 %v3267_v3 }
 0x293   :  { %v1174_v18 = vpop.f32.mrf.mxu3 }
 0x294   :  { %v978_v40 = vadd.f32 %v2775_v15, %v945_v12  ;;  %v3283_v52 = vadd.f32 %v1174_v18, %v3144_v21 }
 0x296   :  { %v1010_v23 = vmax.f32 %v978_v40, 0.0 }
 0x297   :  { %v1137_v50 = vpop.f32.mrf.mxu1 }
 0x298   :  { %v1034_v32 = vpack.c.bf16 %v1010_v23, %v1009_v14  ;;  %v3278_v41 = vadd.f32 %v1137_v50, %v3144_v21 }
 0x29a   :  { %1151 = vmatmul.bf16.gmra.mxu1 %v1034_v32  ;;  %1241 = vadd.xlane.f32.xlu2 %v3275_v62 }
 0x29b   :  { %1213 = vadd.xlane.f32.xlu0 %v3278_v41  ;;  %v1177_v9 = vpop.f32.mrf.mxu3 }
 0x29c   :  { %v3291_v60 = vadd.f32 %v1177_v9, %v3144_v21 }
 0x29f   :  { %v1139_v33 = vpop.f32.mrf.mxu1 }
 0x2a0   :  { %v3286_v15 = vadd.f32 %v1139_v33, %v3144_v21 }
 0x2a2   :  { %1215 = vadd.xlane.f32.xlu1 %v3286_v15 }
 0x2a3   :  { %1243 = vadd.xlane.f32.xlu0 %v3283_v52  ;;  %v1179_v43 = vpop.f32.mrf.mxu3 }
 0x2a4   :  { %v3299_v6 = vadd.f32 %v1179_v43, %v3144_v21 }
 0x2aa   :  { %1245 = vadd.xlane.f32.xlu1 %v3291_v60 }
 0x2bd   :  { %v1198_v37 = vpop.xlane.xlu1 %1197 }
 0x2be   :  { %v1261_v51 = vmul.f32 %v1198_v37, %v2556_v42 }
 0x2c5   :  { %v1200_v36 = vpop.xlane.xlu2 %1199 }
 0x2c6   :  { %v1262_v50 = vmul.f32 %v1200_v36, %v2556_v42 }
 0x2cd   :  { %v1230_v32 = vpop.xlane.xlu2 %1229 }
 0x2d5   :  { %v1182_v34 = vpop.f32.mrf.mxu3 }
 0x2d6   :  { %v3307_v35 = vadd.f32 %v1182_v34, %v3144_v21 }
 0x2d7   :  { %v1142_v44 = vpop.f32.mrf.mxu1 }
 0x2d8   :  { %v3295_v22 = vadd.f32 %v1142_v44, %v3144_v21 }
 0x2da   :  { %1217 = vadd.xlane.f32.xlu2 %v3295_v22 }
 0x2dd   :  { %v1184_v57 = vpop.f32.mrf.mxu3  ;;  %v1202_v49 = vpop.xlane.xlu0 %1201 }
 0x2de   :  { %v3315_v30 = vadd.f32 %v1184_v57, %v3144_v21  ;;  %v1263_v55 = vmul.f32 %v1202_v49, %v2556_v42 }
 0x2df   :  { %v1144_v19 = vpop.f32.mrf.mxu1 }
 0x2e0   :  { %v3302_v48 = vadd.f32 %v1144_v19, %v3144_v21  ;;  %v3336_v26 = vsub.f32 %v3183_v8, %v1263_v55  ;;  %v3351_v8 = vsub.f32 %v3151_v46, %v1261_v51 }
 0x2e2   :  { %1219 = vadd.xlane.f32.xlu0 %v3302_v48  ;;  %1247 = vadd.xlane.f32.xlu2 %v3299_v6  ;;  %v1327_v40 = vmul.f32 %v3336_v26, %v3336_v26  ;;  %v1325_v9 = vmul.f32 %v3351_v8, %v3351_v8 }
 0x2e5   :  { %v1232_v58 = vpop.xlane.xlu0 %1231  ;;  %v1204_v54 = vpop.xlane.xlu1 %1203 }
 0x2e6   :  { %v1278_v4 = vmul.f32 %v1232_v58, %v2556_v42  ;;  %v1264_v18 = vmul.f32 %v1204_v54, %v2556_v42 }
 0x2e8   :  { %v3354_v23 = vsub.f32 %v3205_v11, %v1278_v4  ;;  %v3368_v11 = vsub.f32 %v3161_v63, %v1262_v50  ;;  %v3371_v19 = vsub.f32 %v3208_v39, %v1264_v18 }
 0x2ea   :  { %1249 = vadd.xlane.f32.xlu0 %v3307_v35  ;;  %v1342_v46 = vmul.f32 %v3354_v23, %v3354_v23 }
 0x2ed   :  { %v1234_v44 = vpop.xlane.xlu1 %1233  ;;  %v1206_v57 = vpop.xlane.xlu2 %1205 }
 0x2f5   :  { %v1236_v54 = vpop.xlane.xlu2 %1235 }
 0x2f6   :  { %v1208_v14 = vpop.xlane.xlu0 %1207 }
 0x2f7   :  { %v1187_v16 = vpop.f32.mrf.mxu3  ;;  %v1266_v43 = vmul.f32 %v1208_v14, %v2556_v42  ;;  %v1280_v14 = vmul.f32 %v1236_v54, %v2556_v42 }
 0x2f8   :  { %v3323_v2 = vadd.f32 %v1187_v16, %v3144_v21  ;;  %v1277_v16 = vmul.f32 %v1230_v32, %v2556_v42 }
 0x2f9   :  { %v3374_v34 = vsub.f32 %v3245_v24, %v1266_v43 }
 0x2fa   :  { %v3386_v24 = vsub.f32 %v3170_v56, %v1277_v16 }
 0x2fb   :  { %v1330_v39 = vmul.f32 %v3374_v34, %v3374_v34 }
 0x2fc   :  { %v1341_v58 = vmul.f32 %v3386_v24, %v3386_v24 }
 0x2ff   :  { %v1147_v25 = vpop.f32.mrf.mxu1  ;;  %v1189_v5 = vpop.f32.mrf.mxu3 }
 0x300   :  { %v3311_v61 = vadd.f32 %v1147_v25, %v3144_v21  ;;  %v3340_v12 = vadd.f32 %v1189_v5, %v3144_v21  ;;  %v1279_v25 = vmul.f32 %v1234_v44, %v2556_v42  ;;  %v1326_v5 = vmul.f32 %v3368_v11, %v3368_v11 }
 0x301   :  { %v3422_v44 = vsub.f32 %v3242_v1, %v1280_v14 }
 0x302   :  { %1221 = vadd.xlane.f32.xlu1 %v3311_v61  ;;  %v3389_v49 = vsub.f32 %v3225_v31, %v1279_v25 }
 0x303   :  { %v1344_v16 = vmul.f32 %v3422_v44, %v3422_v44 }
 0x304   :  { %v1343_v36 = vmul.f32 %v3389_v49, %v3389_v49 }
 0x307   :  { %v1149_v10 = vpop.f32.mrf.mxu1 }
 0x308   :  { %v3318_v27 = vadd.f32 %v1149_v10, %v3144_v21  ;;  %v1328_v10 = vmul.f32 %v3371_v19, %v3371_v19 }
 0x30a   :  { %1223 = vadd.xlane.f32.xlu2 %v3318_v27  ;;  %1251 = vadd.xlane.f32.xlu1 %v3315_v30 }
 0x30d   :  { %v1192_v7 = vpop.f32.mrf.mxu3 }
 0x30e   :  { %v3359_v33 = vadd.f32 %v1192_v7, %v3144_v21  ;;  %v1210_v7 = vpop.xlane.xlu1 %1209 }
 0x30f   :  { %v1267_v55 = vmul.f32 %v1210_v7, %v2556_v42 }
 0x311   :  { %v3407_v51 = vsub.f32 %v3256_v38, %v1267_v55 }
 0x312   :  { %1253 = vadd.xlane.f32.xlu2 %v3323_v2 }
 0x313   :  { %v1331_v18 = vmul.f32 %v3407_v51, %v3407_v51 }
 0x315   :  { %v1194_v13 = vpop.f32.mrf.mxu3 }
 0x316   :  { %v3327_v17 = vadd.f32 %v1194_v13, %v3144_v21 }
 0x317   :  { %v1152_v53 = vpop.f32.mrf.mxu1 }
 0x318   :  { %v3330_v20 = vadd.f32 %v1152_v53, %v3144_v21  ;;  %v1265_v53 = vmul.f32 %v1206_v57, %v2556_v42 }
 0x31a   :  { %1225 = vadd.xlane.f32.xlu0 %v3330_v20  ;;  %1259 = vadd.xlane.f32.xlu2 %v3327_v17 }
 0x31f   :  { %v1154_v0 = vpop.f32.mrf.mxu1 }
 0x320   :  { %v3343_v45 = vadd.f32 %v1154_v0, %v3144_v21  ;;  %v1238_v21 = vpop.xlane.xlu0 %1237  ;;  %v3404_v0 = vsub.f32 %v3229_v29, %v1265_v53 }
 0x321   :  { %v1281_v63 = vmul.f32 %v1238_v21, %v2556_v42 }
 0x322   :  { %1255 = vadd.xlane.f32.xlu0 %v3340_v12  ;;  %1227 = vadd.xlane.f32.xlu1 %v3343_v45  ;;  %v1329_v50 = vmul.f32 %v3404_v0, %v3404_v0 }
 0x323   :  { %1361 = vadd.xlane.f32.xlu2 %v1327_v40  ;;  %v3392_v37 = vsub.f32 %v3253_v59, %v1281_v63  ;;  %v1240_v59 = vpop.xlane.xlu1 %1239 }
 0x324   :  { %v1282_v32 = vmul.f32 %v1240_v59, %v2556_v42 }
 0x325   :  { %v1345_v31 = vmul.f32 %v3392_v37, %v3392_v37 }
 0x326   :  { %v3425_v43 = vsub.f32 %v3264_v47, %v1282_v32 }
 0x328   :  { %v1214_v13 = vpop.xlane.xlu0 %1213  ;;  %v1346_v25 = vmul.f32 %v3425_v43, %v3425_v43 }
 0x329   :  { %v1269_v56 = vmul.f32 %v1214_v13, %v2556_v42 }
 0x32a   :  { %1257 = vadd.xlane.f32.xlu1 %v3359_v33  ;;  %1357 = vadd.xlane.f32.xlu0 %v1325_v9  ;;  %v1212_v9 = vpop.xlane.xlu2 %1211 }
 0x32b   :  { %1391 = vadd.xlane.f32.xlu2 %v1342_v46  ;;  %v3410_v4 = vsub.f32 %v3278_v41, %v1269_v56  ;;  %v1216_v41 = vpop.xlane.xlu1 %1215  ;;  %v1268_v21 = vmul.f32 %v1212_v9, %v2556_v42 }
 0x32c   :  { %v1270_v57 = vmul.f32 %v1216_v41, %v2556_v42 }
 0x32d   :  { %v1333_v38 = vmul.f32 %v3410_v4, %v3410_v4 }
 0x330   :  { %v1244_v40 = vpop.xlane.xlu0 %1243 }
 0x331   :  { %v1284_v29 = vmul.f32 %v1244_v40, %v2556_v42 }
 0x332   :  { %1359 = vadd.xlane.f32.xlu1 %v1326_v5  ;;  %1363 = vadd.xlane.f32.xlu0 %v1328_v10  ;;  %v1242_v47 = vpop.xlane.xlu2 %1241  ;;  %v3442_v5 = vsub.f32 %v3286_v15, %v1270_v57 }
 0x333   :  { %1367 = vadd.xlane.f32.xlu2 %v1330_v39  ;;  %v3428_v46 = vsub.f32 %v3283_v52, %v1284_v29  ;;  %v3439_v52 = vsub.f32 %v3267_v3, %v1268_v21  ;;  %v1246_v10 = vpop.xlane.xlu1 %1245  ;;  %v1283_v63 = vmul.f32 %v1242_v47, %v2556_v42 }
 0x334   :  { %v1285_v7 = vmul.f32 %v1246_v10, %v2556_v42  ;;  %v1334_v13 = vmul.f32 %v3442_v5, %v3442_v5 }
 0x335   :  { %v1348_v1 = vmul.f32 %v3428_v46, %v3428_v46  ;;  %v1332_v39 = vmul.f32 %v3439_v52, %v3439_v52  ;;  %v3451_v3 = vsub.f32 %v3275_v62, %v1283_v63 }
 0x336   :  { %v3454_v15 = vsub.f32 %v3291_v60, %v1285_v7 }
 0x337   :  { %v1347_v56 = vmul.f32 %v3451_v3, %v3451_v3 }
 0x33a   :  { %1389 = vadd.xlane.f32.xlu1 %v1341_v58  ;;  %1393 = vadd.xlane.f32.xlu0 %v1343_v36 }
 0x33b   :  { %1397 = vadd.xlane.f32.xlu2 %v1345_v31  ;;  %v1349_v31 = vmul.f32 %v3454_v15, %v3454_v15 }
 0x342   :  { %1365 = vadd.xlane.f32.xlu1 %v1329_v50  ;;  %1369 = vadd.xlane.f32.xlu0 %v1331_v18 }
 0x343   :  { %1373 = vadd.xlane.f32.xlu2 %v1333_v38 }
 0x34a   :  { %1395 = vadd.xlane.f32.xlu1 %v1344_v16  ;;  %1399 = vadd.xlane.f32.xlu0 %v1346_v25 }
 0x34b   :  { %1403 = vadd.xlane.f32.xlu2 %v1348_v1 }
 0x34d   :  { %v1218_v53 = vpop.xlane.xlu2 %1217 }
 0x34e   :  { %v1271_v54 = vmul.f32 %v1218_v53, %v2556_v42 }
 0x350   :  { %v3468_v60 = vsub.f32 %v3295_v22, %v1271_v54 }
 0x352   :  { %1371 = vadd.xlane.f32.xlu1 %v1332_v39  ;;  %1375 = vadd.xlane.f32.xlu0 %v1334_v13  ;;  %v1335_v50 = vmul.f32 %v3468_v60, %v3468_v60 }
 0x355   :  { %v1220_v55 = vpop.xlane.xlu0 %1219 }
 0x356   :  { %v1272_v58 = vmul.f32 %v1220_v55, %v2556_v42 }
 0x358   :  { %v3458_v36 = vsub.f32 %v3302_v48, %v1272_v58  ;;  %v1248_v48 = vpop.xlane.xlu2 %1247 }
 0x359   :  { %v1286_v32 = vmul.f32 %v1248_v48, %v2556_v42 }
 0x35a   :  { %v1336_v62 = vmul.f32 %v3458_v36, %v3458_v36  ;;  %1401 = vadd.xlane.f32.xlu1 %v1347_v56  ;;  %1405 = vadd.xlane.f32.xlu0 %v1349_v31 }
 0x35b   :  { %v3480_v22 = vsub.f32 %v3299_v6, %v1286_v32 }
 0x35c   :  { %1379 = vadd.xlane.f32.xlu2 %v1336_v62 }
 0x35d   :  { %v1250_v59 = vpop.xlane.xlu0 %1249  ;;  %v1350_v9 = vmul.f32 %v3480_v22, %v3480_v22 }
 0x35e   :  { %v1287_v40 = vmul.f32 %v1250_v59, %v2556_v42 }
 0x360   :  { %v3472_v14 = vsub.f32 %v3307_v35, %v1287_v40 }
 0x362   :  { %v1351_v18 = vmul.f32 %v3472_v14, %v3472_v14  ;;  %1377 = vadd.xlane.f32.xlu1 %v1335_v50 }
 0x364   :  { %1409 = vadd.xlane.f32.xlu2 %v1351_v18 }
 0x36a   :  { %1407 = vadd.xlane.f32.xlu1 %v1350_v9 }
 0x375   :  { %v1222_v29 = vpop.xlane.xlu1 %1221 }
 0x376   :  { %v1273_v35 = vmul.f32 %v1222_v29, %v2556_v42 }
 0x378   :  { %v3486_v38 = vsub.f32 %v3311_v61, %v1273_v35 }
 0x37a   :  { %v1337_v41 = vmul.f32 %v3486_v38, %v3486_v38 }
 0x37c   :  { %1381 = vadd.xlane.f32.xlu0 %v1337_v41 }
 0x37d   :  { %v1224_v21 = vpop.xlane.xlu2 %1223  ;;  %v1252_v57 = vpop.xlane.xlu1 %1251 }
 0x37e   :  { %v1274_v16 = vmul.f32 %v1224_v21, %v2556_v42  ;;  %v1288_v6 = vmul.f32 %v1252_v57, %v2556_v42 }
 0x380   :  { %v3493_v25 = vsub.f32 %v3318_v27, %v1274_v16  ;;  %v3496_v1 = vsub.f32 %v3315_v30, %v1288_v6 }
 0x382   :  { %v1338_v61 = vmul.f32 %v3493_v25, %v3493_v25  ;;  %v1352_v47 = vmul.f32 %v3496_v1, %v3496_v1 }
 0x384   :  { %1383 = vadd.xlane.f32.xlu1 %v1338_v61  ;;  %1411 = vadd.xlane.f32.xlu0 %v1352_v47 }
 0x385   :  { %v1254_v10 = vpop.xlane.xlu2 %1253 }
 0x386   :  { %v1289_v63 = vmul.f32 %v1254_v10, %v2556_v42 }
 0x388   :  { %v3504_v7 = vsub.f32 %v3323_v2, %v1289_v63 }
 0x38a   :  { %v1353_v27 = vmul.f32 %v3504_v7, %v3504_v7 }
 0x38c   :  { %1413 = vadd.xlane.f32.xlu1 %v1353_v27 }
 0x38d   :  { %v1226_v30 = vpop.xlane.xlu0 %1225  ;;  %v1260_v39 = vpop.xlane.xlu2 %1259 }
 0x38e   :  { %v1275_v13 = vmul.f32 %v1226_v30, %v2556_v42  ;;  %v1292_v53 = vmul.f32 %v1260_v39, %v2556_v42 }
 0x390   :  { %v3511_v55 = vsub.f32 %v3330_v20, %v1275_v13  ;;  %v3514_v58 = vsub.f32 %v3327_v17, %v1292_v53 }
 0x392   :  { %v1339_v2 = vmul.f32 %v3511_v55, %v3511_v55  ;;  %v1356_v54 = vmul.f32 %v3514_v58, %v3514_v58 }
 0x394   :  { %1385 = vadd.xlane.f32.xlu2 %v1339_v2  ;;  %1419 = vadd.xlane.f32.xlu1 %v1356_v54 }
 0x395   :  { %v1256_v56 = vpop.xlane.xlu0 %1255  ;;  %v1228_v31 = vpop.xlane.xlu1 %1227 }
 0x396   :  { %v1290_v62 = vmul.f32 %v1256_v56, %v2556_v42  ;;  %v1362_v59 = vpop.xlane.xlu2 %1361  ;;  %v1276_v48 = vmul.f32 %v1228_v31, %v2556_v42 }
 0x397   :  { %v1423_v20 = vmul.f32 %v1362_v59, %v2556_v42 }
 0x398   :  { %v3524_v17 = vsub.f32 %v3340_v12, %v1290_v62  ;;  %v3527_v40 = vsub.f32 %v3343_v45, %v1276_v48 }
 0x399   :  { %v1455_v32 = vadd.f32 1e-05, %v1423_v20 }
 0x39a   :  { %v1354_v50 = vmul.f32 %v3524_v17, %v3524_v17  ;;  %v1340_v18 = vmul.f32 %v3527_v40, %v3527_v40 }
 0x39b   :  { %2192 = vrsqrt.f32 %v1455_v32  ;;  %vm1511_vm2 = vweird.f32 %v1455_v32 }
 0x39c   :  { %1415 = vadd.xlane.f32.xlu2 %v1354_v50  ;;  %1387 = vadd.xlane.f32.xlu0 %v1340_v18  ;;  %v3556_v18 = vperm.slane %v3141_v28, 4 }
 0x39d   :  { %v1358_v9 = vpop.xlane.xlu0 %1357  ;;  %v1258_v29 = vpop.xlane.xlu1 %1257 }
 0x39e   :  { %v1392_v35 = vpop.xlane.xlu2 %1391  ;;  %v1421_v41 = vmul.f32 %v1358_v9, %v2556_v42  ;;  %v1291_v12 = vmul.f32 %v1258_v29, %v2556_v42 }
 0x39f   :  { %v1438_v45 = vmul.f32 %v1392_v35, %v2556_v42 }
 0x3a0   :  { %v1453_v21 = vadd.f32 1e-05, %v1421_v41  ;;  %v3537_v57 = vsub.f32 %v3359_v33, %v1291_v12  ;;  %v3561_v41 = vperm.slane %v3141_v28, 5 }
 0x3a1   :  { %v2193_v16 = vpop.eup %2192  ;;  %v3539_v6 = vadd.f32 1e-05, %v1438_v45 }
 0x3a2   :  { %v1506_v61 = vmul.f32 %v2193_v16, %v1455_v32  ;;  %2194 = vrsqrt.f32 %v1453_v21  ;;  %v1355_v47 = vmul.f32 %v3537_v57, %v3537_v57  ;;  %vm1512_vm1 = vweird.f32 %v2193_v16 }
 0x3a3   :  { %2196 = vrsqrt.f32 %v3539_v6  ;;  %vm1513_vm3 = vmor %vm1511_vm2, %vm1512_vm1  ;;  %vm1491_vm4 = vweird.f32 %v1453_v21  ;;  %vm1661_vm6 = vweird.f32 %v3539_v6 }
 0x3a4   :  { %v1507_v10 = vmul.f32 %v2193_v16, %v1506_v61  ;;  %1417 = vadd.xlane.f32.xlu0 %v1355_v47 }
 0x3a5   :  { %v1364_v63 = vpop.xlane.xlu0 %1363  ;;  %v1360_v27 = vpop.xlane.xlu1 %1359 }
 0x3a6   :  { %v1508_v30 = vmul.f32 0.5, %v1507_v10  ;;  %v1368_v39 = vpop.xlane.xlu2 %1367  ;;  %v1424_v13 = vmul.f32 %v1364_v63, %v2556_v42  ;;  %v1422_v33 = vmul.f32 %v1360_v27, %v2556_v42 }
 0x3a7   :  { %v1426_v53 = vmul.f32 %v1368_v39, %v2556_v42 }
 0x3a8   :  { %v2195_v2 = vpop.eup %2194  ;;  %v1509_v54 = vsub.f32 1.5, %v1508_v30  ;;  %v3547_v56 = vadd.f32 1e-05, %v1424_v13  ;;  %v3549_v31 = vadd.f32 1e-05, %v1422_v33 }
 0x3a9   :  { %v2197_v62 = vpop.eup %2196  ;;  %v1486_v59 = vmul.f32 %v2195_v2, %v1453_v21  ;;  %v3551_v48 = vadd.f32 1e-05, %v1426_v53  ;;  %vm1492_vm5 = vweird.f32 %v2195_v2 }
 0x3aa   :  { %v1510_v20 = vmul.f32 %v2193_v16, %v1509_v54  ;;  %v1656_v50 = vmul.f32 %v2197_v62, %v3539_v6  ;;  %2198 = vrsqrt.f32 %v3547_v56  ;;  %vm1662_vm7 = vweird.f32 %v2197_v62  ;;  %vm1493_vm9 = vmor %vm1491_vm4, %vm1492_vm5 }
 0x3ab   :  { %v1487_v9 = vmul.f32 %v2195_v2, %v1486_v59  ;;  %2200 = vrsqrt.f32 %v3551_v48  ;;  %vm1521_vm8 = vweird.f32 %v3547_v56  ;;  %vm1541_vm10 = vweird.f32 %v3551_v48  ;;  %vm1663_vm11 = vmor %vm1661_vm6, %vm1662_vm7 }
 0x3ac   :  { %v1514_v29 = vsel %vm1513_vm3, %v2193_v16, %v1510_v20  ;;  %v1657_v35 = vmul.f32 %v2197_v62, %v1656_v50  ;;  %2202 = vrsqrt.f32 %v3549_v31  ;;  %vm1501_vm0 = vweird.f32 %v3549_v31 }
 0x3ad   :  { %v1807_v32 = vmul.f32 %v1514_v29, %v3336_v26  ;;  %v1488_v12 = vmul.f32 0.5, %v1487_v9  ;;  %v1394_v45 = vpop.xlane.xlu0 %1393  ;;  %v1390_v61 = vpop.xlane.xlu1 %1389 }
 0x3ae   :  { %v1658_v47 = vmul.f32 0.5, %v1657_v35  ;;  %v1398_v10 = vpop.xlane.xlu2 %1397  ;;  %v1439_v63 = vmul.f32 %v1394_v45, %v2556_v42  ;;  %v1437_v26 = vmul.f32 %v1390_v61, %v2556_v42  ;;  %v2257_v35 = vld [vmem:[#allocation2 + $0x10] sm:$0xff] }
 0x3af   :  { %v1840_v27 = vmul.f32 %v3556_v18, %v1807_v32  ;;  %v1489_v30 = vsub.f32 1.5, %v1488_v12  ;;  %v1441_v16 = vmul.f32 %v1398_v10, %v2556_v42 }
 0x3b0   :  { %v3567_v39 = vpop.eup %2198  ;;  %v1659_v28 = vsub.f32 1.5, %v1658_v47  ;;  %v3585_v29 = vadd.f32 1e-05, %v1439_v63 }
 0x3b1   :  { %v3571_v13 = vpop.eup %2200  ;;  %v1873_v33 = vadd.f32 %v3561_v41, %v1840_v27  ;;  %v1490_v53 = vmul.f32 %v2195_v2, %v1489_v30  ;;  %v1516_v54 = vmul.f32 %v3567_v39, %v3547_v56  ;;  %v3583_v9 = vadd.f32 1e-05, %v1441_v16 }
 0x3b2   :  { %v3577_v59 = vpop.eup %2202  ;;  %v1660_v20 = vmul.f32 %v2197_v62, %v1659_v28  ;;  %v1536_v50 = vmul.f32 %v3571_v13, %v3551_v48  ;;  %v3595_v27 = vadd.f32 1e-05, %v1437_v26  ;;  %vm1522_vm12 = vweird.f32 %v3567_v39 }
 0x3b3   :  { %v1905_v32 = vadd.f32 %v2257_v35, %v1873_v33  ;;  %v1494_v12 = vsel %vm1493_vm9, %v2195_v2, %v1490_v53  ;;  %v1517_v45 = vmul.f32 %v3567_v39, %v1516_v54  ;;  %v1496_v21 = vmul.f32 %v3577_v59, %v3549_v31  ;;  %vm1523_vm15 = vmor %vm1521_vm8, %vm1522_vm12 }
 0x3b4   :  { %v1664_v61 = vsel %vm1663_vm11, %v2197_v62, %v1660_v20  ;;  %v1805_v47 = vmul.f32 %v1494_v12, %v3351_v8  ;;  %v1537_v10 = vmul.f32 %v3571_v13, %v1536_v50  ;;  %2204 = vrsqrt.f32 %v3583_v9  ;;  %v2258_v12 = vld [vmem:[#allocation2] sm:$0xff] }
 0x3b5   :  { %v1937_v63 = vmax.f32 %v1905_v32, 0.0  ;;  %v1822_v30 = vmul.f32 %v1664_v61, %v3354_v23  ;;  %v1518_v16 = vmul.f32 0.5, %v1517_v45  ;;  %v1497_v6 = vmul.f32 %v3577_v59, %v1496_v21  ;;  %v1370_v28 = vpop.xlane.xlu0 %1369  ;;  %v1366_v2 = vpop.xlane.xlu1 %1365 }
 0x3b6   :  { %v1838_v33 = vmul.f32 %v3556_v18, %v1805_v47  ;;  %v1538_v53 = vmul.f32 0.5, %v1537_v10  ;;  %2206 = vrsqrt.f32 %v3585_v29  ;;  %v1374_v23 = vpop.xlane.xlu2 %1373  ;;  %vm1542_vm13 = vweird.f32 %v3571_v13  ;;  %v2259_v47 = vld [vmem:[#allocation2 + $0x88] sm:$0xff] }
 0x3b7   :  { %1969 = vst [vmem:[#allocation10 + $0x10] sm:$0xff] %v1937_v63  ;;  %v1855_v8 = vmul.f32 %v3556_v18, %v1822_v30  ;;  %v1519_v62 = vsub.f32 1.5, %v1518_v16  ;;  %v1498_v26 = vmul.f32 0.5, %v1497_v6  ;;  %2208 = vrsqrt.f32 %v3595_v27  ;;  %vm1543_vm1 = vmor %vm1541_vm10, %vm1542_vm13 }
 0x3b8   :  { %v1871_v54 = vadd.f32 %v3561_v41, %v1838_v33  ;;  %v1539_v20 = vsub.f32 1.5, %v1538_v53  ;;  %vm1502_vm14 = vweird.f32 %v3577_v59  ;;  %v1429_v61 = vmul.f32 %v1374_v23, %v2556_v42 }
 0x3b9   :  { %v1888_v50 = vadd.f32 %v3561_v41, %v1855_v8  ;;  %v1520_v35 = vmul.f32 %v3567_v39, %v1519_v62  ;;  %v1499_v32 = vsub.f32 1.5, %v1498_v26  ;;  %v1427_v16 = vmul.f32 %v1370_v28, %v2556_v42  ;;  %vm1503_vm2 = vmor %vm1501_vm0, %vm1502_vm14 }
 0x3ba   :  { %v1903_v45 = vadd.f32 %v2258_v12, %v1871_v54  ;;  %v1540_v21 = vmul.f32 %v3571_v13, %v1539_v20  ;;  %v3622_v6 = vpop.eup %2204  ;;  %v3628_v53 = vadd.f32 1e-05, %v1429_v61  ;;  %vm1691_vm3 = vweird.f32 %v3583_v9  ;;  %v2260_v61 = vld [vmem:[#allocation2 + $0x18] sm:$0xff] }
 0x3bb   :  { %v1920_v10 = vadd.f32 %v2259_v47, %v1888_v50  ;;  %v1524_v63 = vsel %vm1523_vm15, %v3567_v39, %v1520_v35  ;;  %v1500_v30 = vmul.f32 %v3577_v59, %v1499_v32  ;;  %v1686_v28 = vmul.f32 %v3622_v6, %v3583_v9 }
 0x3bc   :  { %v1935_v33 = vmax.f32 %v1903_v45, 0.0  ;;  %v1544_v56 = vsel %vm1543_vm1, %v3571_v13, %v1540_v21  ;;  %v1808_v31 = vmul.f32 %v1524_v63, %v3371_v19  ;;  %v3630_v48 = vpop.eup %2206  ;;  %v1425_v54 = vmul.f32 %v1366_v2, %v2556_v42 }
 0x3bd   :  { %v1952_v8 = vmax.f32 %v1920_v10, 0.0  ;;  %v1810_v39 = vmul.f32 %v1544_v56, %v3374_v34  ;;  %v1504_v62 = vsel %vm1503_vm2, %v3577_v59, %v1500_v30  ;;  %v3637_v13 = vpop.eup %2208  ;;  %v1666_v23 = vmul.f32 %v3630_v48, %v3585_v29  ;;  %v1400_v34 = vpop.xlane.xlu0 %1399  ;;  %v2261_v30 = vld [vmem:[#allocation2 + $0x28] sm:$0xff] }
 0x3be   :  { %1967 = vst [vmem:[#allocation10] sm:$0xff] %v1935_v33  ;;  %v1841_v19 = vmul.f32 %v3556_v18, %v1808_v31  ;;  %v1806_v26 = vmul.f32 %v1504_v62, %v3368_v11  ;;  %v1687_v20 = vmul.f32 %v3622_v6, %v1686_v28  ;;  %vm1692_vm4 = vweird.f32 %v3622_v6  ;;  %v3649_v35 = vpop.xlane.xlu1 %1395  ;;  %v2262_v62 = vld [vmem:[#allocation2 + $0x8] sm:$0xff] }
 0x3bf   :  { %1984 = vst [vmem:[#allocation10 + $0x88] sm:$0xff] %v1952_v8  ;;  %v1843_v59 = vmul.f32 %v3556_v18, %v1810_v39  ;;  %v1646_v50 = vmul.f32 %v3637_v13, %v3595_v27  ;;  %v1667_v12 = vmul.f32 %v3630_v48, %v1666_v23  ;;  %vm1672_vm5 = vweird.f32 %v3630_v48  ;;  %v1404_v23 = vpop.xlane.xlu2 %1403  ;;  %vm1693_vm7 = vmor %vm1691_vm3, %vm1692_vm4 }
 0x3c0   :  { %v1874_v11 = vadd.f32 %v3561_v41, %v1841_v19  ;;  %v1839_v32 = vmul.f32 %v3556_v18, %v1806_v26  ;;  %v1688_v45 = vmul.f32 0.5, %v1687_v20  ;;  %2210 = vrsqrt.f32 %v3628_v53 }
 0x3c1   :  { %v1876_v2 = vadd.f32 %v3561_v41, %v1843_v59  ;;  %v1647_v21 = vmul.f32 %v3637_v13, %v1646_v50  ;;  %v1668_v63 = vmul.f32 0.5, %v1667_v12  ;;  %vm1652_vm6 = vweird.f32 %v3637_v13 }
 0x3c2   :  { %v1906_v47 = vadd.f32 %v2260_v61, %v1874_v11  ;;  %v1872_v10 = vadd.f32 %v3561_v41, %v1839_v32  ;;  %v1689_v56 = vsub.f32 1.5, %v1688_v45  ;;  %v3660_v8 = vadd.f32 1e-05, %v1427_v16 }
 0x3c3   :  { %v1908_v33 = vadd.f32 %v2261_v30, %v1876_v2  ;;  %v1648_v31 = vmul.f32 0.5, %v1647_v21  ;;  %v1669_v19 = vsub.f32 1.5, %v1668_v63  ;;  %v3662_v26 = vadd.f32 1e-05, %v1425_v54 }
 0x3c4   :  { %v1938_v39 = vmax.f32 %v1906_v47, 0.0  ;;  %v1904_v28 = vadd.f32 %v2262_v62, %v1872_v10  ;;  %v1690_v20 = vmul.f32 %v3622_v6, %v1689_v56  ;;  %2212 = vrsqrt.f32 %v3660_v8 }
 0x3c5   :  { %v1940_v59 = vmax.f32 %v1908_v33, 0.0  ;;  %v1649_v50 = vsub.f32 1.5, %v1648_v31  ;;  %v1670_v16 = vmul.f32 %v3630_v48, %v1669_v19  ;;  %vm1671_vm8 = vweird.f32 %v3585_v29  ;;  %v1376_v45 = vpop.xlane.xlu0 %1375  ;;  %v2263_v19 = vld [vmem:[#allocation2 + $0xa0] sm:$0xff] }
 0x3c6   :  { %1970 = vst [vmem:[#allocation10 + $0x18] sm:$0xff] %v1938_v39  ;;  %v1936_v11 = vmax.f32 %v1904_v28, 0.0  ;;  %2214 = vrsqrt.f32 %v3662_v26  ;;  %v3673_v54 = vpop.eup %2210  ;;  %v1694_v32 = vsel %vm1693_vm7, %v3622_v6, %v1690_v20  ;;  %vm1673_vm9 = vmor %vm1671_vm8, %vm1672_vm5  ;;  %vm1651_vm10 = vweird.f32 %v3595_v27  ;;  %v1372_v10 = vpop.xlane.xlu1 %1371 }
 0x3c7   :  { %1972 = vst [vmem:[#allocation10 + $0x28] sm:$0xff] %v1940_v59  ;;  %v1650_v12 = vmul.f32 %v3637_v13, %v1649_v50  ;;  %v1444_v9 = vmul.f32 %v1404_v23, %v2556_v42  ;;  %v1825_v2 = vmul.f32 %v1694_v32, %v3392_v37  ;;  %v1674_v29 = vsel %vm1673_vm9, %v3630_v48, %v1670_v16  ;;  %vm1653_vm11 = vmor %vm1651_vm10, %vm1652_vm6 }
 0x3c8   :  { %1968 = vst [vmem:[#allocation10 + $0x8] sm:$0xff] %v1936_v11  ;;  %v1566_v6 = vmul.f32 %v3673_v54, %v3628_v53  ;;  %v1823_v21 = vmul.f32 %v1674_v29, %v3389_v49  ;;  %v1442_v27 = vmul.f32 %v1400_v34, %v2556_v42  ;;  %vm1571_vm12 = vweird.f32 %v3628_v53  ;;  %v2264_v11 = vld [vmem:[#allocation2 + $0x90] sm:$0xff] }
 0x3c9   :  { %v1654_v61 = vsel %vm1653_vm11, %v3637_v13, %v1650_v12  ;;  %v3689_v47 = vadd.f32 1e-05, %v1444_v9  ;;  %v1858_v37 = vmul.f32 %v3556_v18, %v1825_v2  ;;  %vm1551_vm13 = vweird.f32 %v3660_v8  ;;  %v2265_v9 = vld [vmem:[#allocation2 + $0x80] sm:$0xff] }
 0x3ca   :  { %v1821_v48 = vmul.f32 %v1654_v61, %v3386_v24  ;;  %v1567_v63 = vmul.f32 %v3673_v54, %v1566_v6  ;;  %v3695_v30 = vpop.eup %2212  ;;  %v1856_v33 = vmul.f32 %v3556_v18, %v1823_v21  ;;  %v3700_v49 = vadd.f32 1e-05, %v1442_v27 }
 0x3cb   :  { %2216 = vrsqrt.f32 %v3689_v47  ;;  %v1891_v34 = vadd.f32 %v3561_v41, %v1858_v37  ;;  %v1546_v24 = vmul.f32 %v3695_v30, %v3660_v8  ;;  %vm1572_vm14 = vweird.f32 %v3673_v54 }
 0x3cc   :  { %v3702_v13 = vpop.eup %2214  ;;  %v1854_v56 = vmul.f32 %v3556_v18, %v1821_v48  ;;  %v1568_v31 = vmul.f32 0.5, %v1567_v63  ;;  %v1889_v39 = vadd.f32 %v3561_v41, %v1856_v33  ;;  %vm1531_vm15 = vweird.f32 %v3662_v26  ;;  %vm1573_vm1 = vmor %vm1571_vm12, %vm1572_vm14 }
 0x3cd   :  { %v1526_v62 = vmul.f32 %v3702_v13, %v3662_v26  ;;  %v1440_v28 = vmul.f32 %v3649_v35, %v2556_v42  ;;  %v1923_v23 = vadd.f32 %v2263_v19, %v1891_v34  ;;  %v1547_v50 = vmul.f32 %v3695_v30, %v1546_v24 }
 0x3ce   :  { %v1887_v59 = vadd.f32 %v3561_v41, %v1854_v56  ;;  %v1569_v20 = vsub.f32 1.5, %v1568_v31  ;;  %v1921_v16 = vadd.f32 %v2264_v11, %v1889_v39  ;;  %vm1552_vm0 = vweird.f32 %v3695_v30  ;;  %v1406_v56 = vpop.xlane.xlu0 %1405  ;;  %v3737_v53 = vpop.xlane.xlu1 %1401 }
 0x3cf   :  { %v1527_v32 = vmul.f32 %v3702_v13, %v1526_v62  ;;  %2218 = vrsqrt.f32 %v3700_v49  ;;  %v1955_v12 = vmax.f32 %v1923_v23, 0.0  ;;  %v1548_v29 = vmul.f32 0.5, %v1547_v50  ;;  %vm1553_vm4 = vmor %vm1551_vm13, %vm1552_vm0 }
 0x3d0   :  { %v1919_v2 = vadd.f32 %v2265_v9, %v1887_v59  ;;  %v1570_v35 = vmul.f32 %v3673_v54, %v1569_v20  ;;  %v1953_v21 = vmax.f32 %v1921_v16, 0.0  ;;  %v3728_v27 = vadd.f32 1e-05, %v1440_v28 }
 0x3d1   :  { %v3722_v6 = vpop.eup %2216  ;;  %v1528_v61 = vmul.f32 0.5, %v1527_v32  ;;  %v1430_v37 = vmul.f32 %v1376_v45, %v2556_v42  ;;  %1987 = vst [vmem:[#allocation10 + $0xa0] sm:$0xff] %v1955_v12  ;;  %v1549_v33 = vsub.f32 1.5, %v1548_v29  ;;  %vm1532_vm2 = vweird.f32 %v3702_v13  ;;  %v2266_v12 = vld [vmem:[#allocation2 + $0x40] sm:$0xff] }
 0x3d2   :  { %v1951_v48 = vmax.f32 %v1919_v2, 0.0  ;;  %v1574_v63 = vsel %vm1573_vm1, %v3673_v54, %v1570_v35  ;;  %v1716_v34 = vmul.f32 %v3722_v6, %v3689_v47  ;;  %1985 = vst [vmem:[#allocation10 + $0x90] sm:$0xff] %v1953_v21  ;;  %2220 = vrsqrt.f32 %v3728_v27  ;;  %vm1533_vm5 = vmor %vm1531_vm15, %vm1532_vm2 }
 0x3d3   :  { %v1813_v31 = vmul.f32 %v1574_v63, %v3410_v4  ;;  %v1529_v24 = vsub.f32 1.5, %v1528_v61  ;;  %v1550_v45 = vmul.f32 %v3695_v30, %v1549_v33  ;;  %vm1721_vm3 = vweird.f32 %v3689_v47  ;;  %v1380_v47 = vpop.xlane.xlu2 %1379 }
 0x3d4   :  { %1983 = vst [vmem:[#allocation10 + $0x80] sm:$0xff] %v1951_v48  ;;  %v1717_v54 = vmul.f32 %v3722_v6, %v1716_v34  ;;  %v3742_v39 = vadd.f32 1e-05, %v1430_v37  ;;  %v1428_v19 = vmul.f32 %v1372_v10, %v2556_v42  ;;  %v1445_v23 = vmul.f32 %v1406_v56, %v2556_v42 }
 0x3d5   :  { %v3744_v62 = vpop.eup %2218  ;;  %v1846_v4 = vmul.f32 %v3556_v18, %v1813_v31  ;;  %v1530_v28 = vmul.f32 %v3702_v13, %v1529_v24  ;;  %v1554_v59 = vsel %vm1553_vm4, %v3695_v30, %v1550_v45  ;;  %vm1701_vm6 = vweird.f32 %v3700_v49  ;;  %v2267_v31 = vld [vmem:[#allocation2 + $0x30] sm:$0xff] }
 0x3d6   :  { %v1718_v20 = vmul.f32 0.5, %v1717_v54  ;;  %v1696_v50 = vmul.f32 %v3744_v62, %v3700_v49  ;;  %v1811_v11 = vmul.f32 %v1554_v59, %v3407_v51  ;;  %2222 = vrsqrt.f32 %v3742_v39  ;;  %v1378_v54 = vpop.xlane.xlu1 %1377 }
 0x3d7   :  { %v1879_v8 = vadd.f32 %v3561_v41, %v1846_v4  ;;  %v1534_v10 = vsel %vm1533_vm5, %v3702_v13, %v1530_v28  ;;  %vm1722_vm7 = vweird.f32 %v3722_v6  ;;  %v3772_v35 = vadd.f32 1e-05, %v1428_v19  ;;  %v2268_v4 = vld [vmem:[#allocation2 + $0x20] sm:$0xff] }
 0x3d8   :  { %v1809_v30 = vmul.f32 %v1534_v10, %v3404_v0  ;;  %v1719_v16 = vsub.f32 1.5, %v1718_v20  ;;  %v1697_v26 = vmul.f32 %v3744_v62, %v1696_v50  ;;  %v3769_v32 = vpop.eup %2220  ;;  %v1844_v2 = vmul.f32 %v3556_v18, %v1811_v11  ;;  %vm1723_vm8 = vmor %vm1721_vm3, %vm1722_vm7 }
 0x3d9   :  { %v1911_v9 = vadd.f32 %v2266_v12, %v1879_v8  ;;  %v3774_v51 = vadd.f32 1e-05, %v1445_v23  ;;  %v1676_v21 = vmul.f32 %v3769_v32, %v3728_v27  ;;  %vm1702_vm9 = vweird.f32 %v3744_v62 }
 0x3da   :  { %v1842_v13 = vmul.f32 %v3556_v18, %v1809_v30  ;;  %v1720_v29 = vmul.f32 %v3722_v6, %v1719_v16  ;;  %v1698_v0 = vmul.f32 0.5, %v1697_v26  ;;  %v1877_v37 = vadd.f32 %v3561_v41, %v1844_v2  ;;  %vm1703_vm11 = vmor %vm1701_vm6, %vm1702_vm9 }
 0x3db   :  { %v1943_v61 = vmax.f32 %v1911_v9, 0.0  ;;  %2224 = vrsqrt.f32 %v3772_v35  ;;  %v1677_v34 = vmul.f32 %v3769_v32, %v1676_v21  ;;  %vm1681_vm10 = vweird.f32 %v3728_v27 }
 0x3dc   :  { %v1875_v48 = vadd.f32 %v3561_v41, %v1842_v13  ;;  %v1724_v63 = vsel %vm1723_vm8, %v3722_v6, %v1720_v29  ;;  %v1699_v33 = vsub.f32 1.5, %v1698_v0  ;;  %v3788_v56 = vpop.eup %2222  ;;  %v1909_v24 = vadd.f32 %v2267_v31, %v1877_v37  ;;  %v2269_v13 = vld [vmem:[#allocation2 + $0xb8] sm:$0xff] }
 0x3dd   :  { %1975 = vst [vmem:[#allocation10 + $0x40] sm:$0xff] %v1943_v61  ;;  %v1828_v45 = vmul.f32 %v1724_v63, %v3428_v46  ;;  %2226 = vrsqrt.f32 %v3774_v51  ;;  %v1678_v19 = vmul.f32 0.5, %v1677_v34  ;;  %v1576_v23 = vmul.f32 %v3788_v56, %v3742_v39 }
 0x3de   :  { %v1907_v28 = vadd.f32 %v2268_v4, %v1875_v48  ;;  %v1700_v6 = vmul.f32 %v3744_v62, %v1699_v33  ;;  %v1941_v59 = vmax.f32 %v1909_v24, 0.0  ;;  %vm1682_vm12 = vweird.f32 %v3769_v32  ;;  %v1408_v4 = vpop.xlane.xlu1 %1407 }
 0x3df   :  { %v1861_v20 = vmul.f32 %v3556_v18, %v1828_v45  ;;  %vm1581_vm13 = vweird.f32 %v3742_v39  ;;  %v1679_v8 = vsub.f32 1.5, %v1678_v19  ;;  %v1577_v11 = vmul.f32 %v3788_v56, %v1576_v23  ;;  %vm1683_vm15 = vmor %vm1681_vm10, %vm1682_vm12 }
 0x3e0   :  { %v1939_v46 = vmax.f32 %v1907_v28, 0.0  ;;  %v1704_v50 = vsel %vm1703_vm11, %v3744_v62, %v1700_v6  ;;  %1973 = vst [vmem:[#allocation10 + $0x30] sm:$0xff] %v1941_v59  ;;  %v1443_v49 = vmul.f32 %v3737_v53, %v2556_v42  ;;  %v1432_v26 = vmul.f32 %v1380_v47, %v2556_v42 }
 0x3e1   :  { %v3805_v10 = vpop.eup %2224  ;;  %v1894_v30 = vadd.f32 %v3561_v41, %v1861_v20  ;;  %v1826_v16 = vmul.f32 %v1704_v50, %v3425_v43  ;;  %v1680_v12 = vmul.f32 %v3769_v32, %v1679_v8  ;;  %v1578_v9 = vmul.f32 0.5, %v1577_v11 }
 0x3e2   :  { %1971 = vst [vmem:[#allocation10 + $0x20] sm:$0xff] %v1939_v46  ;;  %vm1582_vm14 = vweird.f32 %v3788_v56  ;;  %v1556_v62 = vmul.f32 %v3805_v10, %v3772_v35  ;;  %v3823_v53 = vadd.f32 1e-05, %v1443_v49  ;;  %v3825_v0 = vadd.f32 1e-05, %v1432_v26 }
 0x3e3   :  { %v3816_v2 = vpop.eup %2226  ;;  %v1926_v29 = vadd.f32 %v2269_v13, %v1894_v30  ;;  %v1859_v43 = vmul.f32 %v3556_v18, %v1826_v16  ;;  %v1684_v21 = vsel %vm1683_vm15, %v3769_v32, %v1680_v12  ;;  %v1579_v61 = vsub.f32 1.5, %v1578_v9  ;;  %v2270_v32 = vld [vmem:[#allocation2 + $0xa8] sm:$0xff]  ;;  %vm1583_vm1 = vmor %vm1581_vm13, %vm1582_vm14 }
 0x3e4   :  { %v1557_v37 = vmul.f32 %v3805_v10, %v1556_v62  ;;  %v1726_v48 = vmul.f32 %v3816_v2, %v3774_v51  ;;  %v1824_v34 = vmul.f32 %v1684_v21, %v3422_v44  ;;  %vm1561_vm0 = vweird.f32 %v3772_v35  ;;  %v1410_v44 = vpop.xlane.xlu2 %1409  ;;  %v2272_v21 = vld [vmem:[#allocation2 + $0x48] sm:$0xff] }
 0x3e5   :  { %v1958_v63 = vmax.f32 %v1926_v29, 0.0  ;;  %v1892_v33 = vadd.f32 %v3561_v41, %v1859_v43  ;;  %v1580_v27 = vmul.f32 %v3788_v56, %v1579_v61  ;;  %2228 = vrsqrt.f32 %v3823_v53 }
 0x3e6   :  { %v1558_v31 = vmul.f32 0.5, %v1557_v37  ;;  %v1727_v24 = vmul.f32 %v3816_v2, %v1726_v48  ;;  %v1857_v47 = vmul.f32 %v3556_v18, %v1824_v34  ;;  %vm1562_vm2 = vweird.f32 %v3805_v10 }
 0x3e7   :  { %1990 = vst [vmem:[#allocation10 + $0xb8] sm:$0xff] %v1958_v63  ;;  %v1924_v45 = vadd.f32 %v2270_v32, %v1892_v33  ;;  %2230 = vrsqrt.f32 %v3825_v0  ;;  %v1584_v28 = vsel %vm1583_vm1, %v3788_v56, %v1580_v27  ;;  %vm1732_vm3 = vweird.f32 %v3816_v2  ;;  %v2271_v56 = vld [vmem:[#allocation2 + $0x98] sm:$0xff]  ;;  %vm1563_vm4 = vmor %vm1561_vm0, %vm1562_vm2 }
 0x3e8   :  { %v1559_v6 = vsub.f32 1.5, %v1558_v31  ;;  %v1728_v19 = vmul.f32 0.5, %v1727_v24  ;;  %v1890_v59 = vadd.f32 %v3561_v41, %v1857_v47  ;;  %v1814_v20 = vmul.f32 %v1584_v28, %v3442_v5 }
 0x3e9   :  { %v1956_v23 = vmax.f32 %v1924_v45, 0.0  ;;  %v1431_v39 = vmul.f32 %v1378_v54, %v2556_v42  ;;  %v1447_v8 = vmul.f32 %v1410_v44, %v2556_v42  ;;  %v1446_v11 = vmul.f32 %v1408_v4, %v2556_v42  ;;  %v2273_v45 = vld [vmem:[#allocation2 + $0x38] sm:$0xff] }
 0x3ea   :  { %v1560_v46 = vmul.f32 %v3805_v10, %v1559_v6  ;;  %v1729_v50 = vsub.f32 1.5, %v1728_v19  ;;  %v1922_v30 = vadd.f32 %v2271_v56, %v1890_v59  ;;  %v1847_v16 = vmul.f32 %v3556_v18, %v1814_v20  ;;  %v2274_v19 = vld [vmem:[#allocation2 + $0xc0] sm:$0xff] }
 0x3eb   :  { %1988 = vst [vmem:[#allocation10 + $0xa8] sm:$0xff] %v1956_v23  ;;  %v2229_v5 = vpop.eup %2228  ;;  %vm1731_vm5 = vweird.f32 %v3774_v51  ;;  %v3860_v26 = vadd.f32 1e-05, %v1431_v39  ;;  %v3869_v43 = vadd.f32 1e-05, %v1447_v8  ;;  %vm1711_vm9 = vweird.f32 %v3823_v53 }
 0x3ec   :  { %v1564_v54 = vsel %vm1563_vm4, %v3805_v10, %v1560_v46  ;;  %v1730_v49 = vmul.f32 %v3816_v2, %v1729_v50  ;;  %v1954_v9 = vmax.f32 %v1922_v30, 0.0  ;;  %v1880_v62 = vadd.f32 %v3561_v41, %v1847_v16  ;;  %vm1733_vm6 = vmor %vm1731_vm5, %vm1732_vm3 }
 0x3ed   :  { %v2231_v12 = vpop.eup %2230  ;;  %v1812_v13 = vmul.f32 %v1564_v54, %v3439_v52  ;;  %v1706_v35 = vmul.f32 %v2229_v5, %v3823_v53  ;;  %v3871_v51 = vadd.f32 1e-05, %v1446_v11  ;;  %2232 = vrsqrt.f32 %v3860_v26 }
 0x3ee   :  { %v1734_v29 = vsel %vm1733_vm6, %v3816_v2, %v1730_v49  ;;  %v1596_v10 = vmul.f32 %v2231_v12, %v3825_v0  ;;  %1986 = vst [vmem:[#allocation10 + $0x98] sm:$0xff] %v1954_v9  ;;  %v1912_v61 = vadd.f32 %v2272_v21, %v1880_v62  ;;  %vm1712_vm7 = vweird.f32 %v2229_v5 }
 0x3ef   :  { %v1845_v37 = vmul.f32 %v3556_v18, %v1812_v13  ;;  %v1829_v52 = vmul.f32 %v1734_v29, %v3454_v15  ;;  %v1707_v48 = vmul.f32 %v2229_v5, %v1706_v35  ;;  %v1382_v63 = vpop.xlane.xlu0 %1381  ;;  %2234 = vrsqrt.f32 %v3869_v43  ;;  %vm1713_vm10 = vmor %vm1711_vm9, %vm1712_vm7 }
 0x3f0   :  { %v1597_v33 = vmul.f32 %v2231_v12, %v1596_v10  ;;  %v1944_v34 = vmax.f32 %v1912_v61, 0.0  ;;  %v1433_v32 = vmul.f32 %v1382_v63, %v2556_v42  ;;  %2236 = vrsqrt.f32 %v3871_v51 }
 0x3f1   :  { %v1878_v2 = vadd.f32 %v3561_v41, %v1845_v37  ;;  %v1862_v27 = vmul.f32 %v3556_v18, %v1829_v52  ;;  %v1708_v31 = vmul.f32 0.5, %v1707_v48  ;;  %vm1602_vm8 = vweird.f32 %v2231_v12 }
 0x3f2   :  { %v1598_v24 = vmul.f32 0.5, %v1597_v33  ;;  %1976 = vst [vmem:[#allocation10 + $0x48] sm:$0xff] %v1944_v34  ;;  %v3882_v28 = vadd.f32 1e-05, %v1433_v32  ;;  %vm1601_vm11 = vweird.f32 %v3825_v0  ;;  %vm1591_vm13 = vweird.f32 %v3860_v26  ;;  %v2275_v34 = vld [vmem:[#allocation2 + $0xb0] sm:$0xff] }
 0x3f3   :  { %v1910_v15 = vadd.f32 %v2273_v45, %v1878_v2  ;;  %v1895_v47 = vadd.f32 %v3561_v41, %v1862_v27  ;;  %v1709_v44 = vsub.f32 1.5, %v1708_v31  ;;  %v3885_v20 = vpop.eup %2232  ;;  %vm1603_vm12 = vmor %vm1601_vm11, %vm1602_vm8  ;;  %vm1751_vm14 = vweird.f32 %v3869_v43  ;;  %v2276_v31 = vld [vmem:[#allocation2 + $0x58] sm:$0xff] }
 0x3f4   :  { %v1599_v4 = vsub.f32 1.5, %v1598_v24  ;;  %2238 = vrsqrt.f32 %v3882_v28  ;;  %v1586_v8 = vmul.f32 %v3885_v20, %v3860_v26  ;;  %vm1741_vm15 = vweird.f32 %v3871_v51 }
 0x3f5   :  { %v1942_v6 = vmax.f32 %v1910_v15, 0.0  ;;  %v1927_v23 = vadd.f32 %v2274_v19, %v1895_v47  ;;  %v1710_v59 = vmul.f32 %v2229_v5, %v1709_v44  ;;  %v3894_v56 = vpop.eup %2234  ;;  %vm1592_vm0 = vweird.f32 %v3885_v20 }
 0x3f6   :  { %v1600_v39 = vmul.f32 %v2231_v12, %v1599_v4  ;;  %v3899_v49 = vpop.eup %2236  ;;  %v1587_v9 = vmul.f32 %v3885_v20, %v1586_v8  ;;  %v1746_v62 = vmul.f32 %v3894_v56, %v3869_v43  ;;  %vm1752_vm1 = vweird.f32 %v3894_v56  ;;  %vm1593_vm2 = vmor %vm1591_vm13, %vm1592_vm0 }
 0x3f7   :  { %1974 = vst [vmem:[#allocation10 + $0x38] sm:$0xff] %v1942_v6  ;;  %v1959_v46 = vmax.f32 %v1927_v23, 0.0  ;;  %v1714_v50 = vsel %vm1713_vm10, %v2229_v5, %v1710_v59  ;;  %v1412_v53 = vpop.xlane.xlu0 %1411  ;;  %v1384_v11 = vpop.xlane.xlu1 %1383  ;;  %vm1742_vm3 = vweird.f32 %v3899_v49  ;;  %vm1753_vm4 = vmor %vm1751_vm14, %vm1752_vm1  ;;  %vm1611_vm5 = vweird.f32 %v3882_v28 }
 0x3f8   :  { %v1827_v30 = vmul.f32 %v1714_v50, %v3451_v3  ;;  %v1604_v16 = vsel %vm1603_vm12, %v2231_v12, %v1600_v39  ;;  %v1448_v0 = vmul.f32 %v1412_v53, %v2556_v42  ;;  %v1434_v54 = vmul.f32 %v1384_v11, %v2556_v42  ;;  %vm1743_vm6 = vmor %vm1741_vm15, %vm1742_vm3 }
 0x3f9   :  { %1991 = vst [vmem:[#allocation10 + $0xc0] sm:$0xff] %v1959_v46  ;;  %v1816_v5 = vmul.f32 %v1604_v16, %v3458_v36  ;;  %v1736_v3 = vmul.f32 %v3899_v49, %v3871_v51  ;;  %v1588_v29 = vmul.f32 0.5, %v1587_v9  ;;  %v1747_v36 = vmul.f32 %v3894_v56, %v1746_v62 }
 0x3fa   :  { %v1860_v13 = vmul.f32 %v3556_v18, %v1827_v30  ;;  %v3910_v12 = vadd.f32 1e-05, %v1448_v0  ;;  %v3914_v10 = vadd.f32 1e-05, %v1434_v54  ;;  %v3916_v21 = vpop.eup %2238 }
 0x3fb   :  { %v1849_v35 = vmul.f32 %v3556_v18, %v1816_v5  ;;  %v1737_v37 = vmul.f32 %v3899_v49, %v1736_v3  ;;  %v1589_v48 = vsub.f32 1.5, %v1588_v29  ;;  %v1748_v63 = vmul.f32 0.5, %v1747_v36 }
 0x3fc   :  { %v1893_v61 = vadd.f32 %v3561_v41, %v1860_v13  ;;  %2240 = vrsqrt.f32 %v3910_v12  ;;  %v1606_v33 = vmul.f32 %v3916_v21, %v3882_v28  ;;  %vm1612_vm7 = vweird.f32 %v3916_v21 }
 0x3fd   :  { %v1882_v52 = vadd.f32 %v3561_v41, %v1849_v35  ;;  %v1738_v27 = vmul.f32 0.5, %v1737_v37  ;;  %2242 = vrsqrt.f32 %v3914_v10  ;;  %v1590_v32 = vmul.f32 %v3885_v20, %v1589_v48  ;;  %vm1613_vm9 = vmor %vm1611_vm5, %vm1612_vm7  ;;  %v2277_v35 = vld [vmem:[#allocation2 + $0x50] sm:$0xff] }
 0x3fe   :  { %v1925_v2 = vadd.f32 %v2275_v34, %v1893_v61  ;;  %v1749_v45 = vsub.f32 1.5, %v1748_v63  ;;  %v1607_v15 = vmul.f32 %v3916_v21, %v1606_v33  ;;  %vm1761_vm8 = vweird.f32 %v3910_v12  ;;  %v2278_v34 = vld [vmem:[#allocation2 + $0xd0] sm:$0xff] }
 0x3ff   :  { %v1914_v24 = vadd.f32 %v2276_v31, %v1882_v52  ;;  %v1414_v47 = vpop.xlane.xlu1 %1413  ;;  %v1739_v4 = vsub.f32 1.5, %v1738_v27  ;;  %v1594_v23 = vsel %vm1593_vm2, %v3885_v20, %v1590_v32  ;;  %vm1621_vm13 = vweird.f32 %v3914_v10 }
 0x400   :  { %v1957_v44 = vmax.f32 %v1925_v2, 0.0  ;;  %v1449_v6 = vmul.f32 %v1414_v47, %v2556_v42  ;;  %v1750_v59 = vmul.f32 %v3894_v56, %v1749_v45  ;;  %v1608_v39 = vmul.f32 0.5, %v1607_v15 }
 0x401   :  { %v1946_v19 = vmax.f32 %v1914_v24, 0.0  ;;  %v1815_v50 = vmul.f32 %v1594_v23, %v3468_v60  ;;  %v1740_v26 = vmul.f32 %v3899_v49, %v1739_v4  ;;  %v2279_v24 = vld [vmem:[#allocation2 + $0xc8] sm:$0xff] }
 0x402   :  { %v3937_v46 = vpop.eup %2240  ;;  %1989 = vst [vmem:[#allocation10 + $0xb0] sm:$0xff] %v1957_v44  ;;  %v3946_v8 = vadd.f32 1e-05, %v1449_v6  ;;  %v1754_v20 = vsel %vm1753_vm4, %v3894_v56, %v1750_v59  ;;  %v1609_v60 = vsub.f32 1.5, %v1608_v39  ;;  %v2280_v59 = vld [vmem:[#allocation2 + $0x60] sm:$0xff] }
 0x403   :  { %1978 = vst [vmem:[#allocation10 + $0x58] sm:$0xff] %v1946_v19  ;;  %v1756_v43 = vmul.f32 %v3937_v46, %v3910_v12  ;;  %v3957_v53 = vpop.eup %2242  ;;  %v1848_v11 = vmul.f32 %v3556_v18, %v1815_v50  ;;  %v1831_v30 = vmul.f32 %v1754_v20, %v3472_v14  ;;  %v1744_v56 = vsel %vm1743_vm6, %v3899_v49, %v1740_v26 }
 0x404   :  { %2244 = vrsqrt.f32 %v3946_v8  ;;  %v1830_v51 = vmul.f32 %v1744_v56, %v3480_v22  ;;  %v1610_v16 = vmul.f32 %v3916_v21, %v1609_v60  ;;  %v1616_v54 = vmul.f32 %v3957_v53, %v3914_v10 }
 0x405   :  { %v1757_v0 = vmul.f32 %v3937_v46, %v1756_v43  ;;  %v1881_v5 = vadd.f32 %v3561_v41, %v1848_v11  ;;  %v1864_v9 = vmul.f32 %v3556_v18, %v1831_v30  ;;  %vm1762_vm10 = vweird.f32 %v3937_v46 }
 0x406   :  { %vm1622_vm11 = vweird.f32 %v3957_v53  ;;  %v1863_v14 = vmul.f32 %v3556_v18, %v1830_v51  ;;  %v1614_v22 = vsel %vm1613_vm9, %v3916_v21, %v1610_v16  ;;  %v1617_v62 = vmul.f32 %v3957_v53, %v1616_v54  ;;  %vm1763_vm12 = vmor %vm1761_vm8, %vm1762_vm10 }
 0x407   :  { %v1758_v49 = vmul.f32 0.5, %v1757_v0  ;;  %v1386_v13 = vpop.xlane.xlu2 %1385  ;;  %v1420_v3 = vpop.xlane.xlu1 %1419  ;;  %v1913_v29 = vadd.f32 %v2277_v35, %v1881_v5  ;;  %v1897_v36 = vadd.f32 %v3561_v41, %v1864_v9  ;;  %v1817_v28 = vmul.f32 %v1614_v22, %v3486_v38  ;;  %vm1623_vm14 = vmor %vm1621_vm13, %vm1622_vm11  ;;  %v2281_v5 = vld [vmem:[#allocation2 + $0xd8] sm:$0xff]  ;;  %v2282_v35 = vld [vmem:[#allocation2 + $0x68] sm:$0xff] }
 0x408   :  { %v1435_v61 = vmul.f32 %v1386_v13, %v2556_v42  ;;  %v1896_v37 = vadd.f32 %v3561_v41, %v1863_v14  ;;  %v1618_v48 = vmul.f32 0.5, %v1617_v62  ;;  %v1452_v63 = vmul.f32 %v1420_v3, %v2556_v42 }
 0x409   :  { %v1759_v52 = vsub.f32 1.5, %v1758_v49  ;;  %v1945_v33 = vmax.f32 %v1913_v29, 0.0  ;;  %v1929_v2 = vadd.f32 %v2278_v34, %v1897_v36  ;;  %v1850_v27 = vmul.f32 %v3556_v18, %v1817_v28 }
 0x40a   :  { %v2245_v21 = vpop.eup %2244  ;;  %v3983_v31 = vadd.f32 1e-05, %v1435_v61  ;;  %v1928_v32 = vadd.f32 %v2279_v24, %v1896_v37  ;;  %v1619_v45 = vsub.f32 1.5, %v1618_v48  ;;  %v3999_v12 = vadd.f32 1e-05, %v1452_v63 }
 0x40b   :  { %v1760_v38 = vmul.f32 %v3937_v46, %v1759_v52  ;;  %v1766_v15 = vmul.f32 %v2245_v21, %v3946_v8  ;;  %1977 = vst [vmem:[#allocation10 + $0x50] sm:$0xff] %v1945_v33  ;;  %v1961_v47 = vmax.f32 %v1929_v2, 0.0  ;;  %v1883_v44 = vadd.f32 %v3561_v41, %v1850_v27 }
 0x40c   :  { %2246 = vrsqrt.f32 %v3983_v31  ;;  %v1960_v4 = vmax.f32 %v1928_v32, 0.0  ;;  %v1620_v19 = vmul.f32 %v3957_v53, %v1619_v45  ;;  %vm1772_vm15 = vweird.f32 %v2245_v21  ;;  %v2283_v32 = vld [vmem:[#allocation2 + $0xe0] sm:$0xff] }
 0x40d   :  { %v1764_v6 = vsel %vm1763_vm12, %v3937_v46, %v1760_v38  ;;  %v1767_v23 = vmul.f32 %v2245_v21, %v1766_v15  ;;  %1993 = vst [vmem:[#allocation10 + $0xd0] sm:$0xff] %v1961_v47  ;;  %v1915_v39 = vadd.f32 %v2280_v59, %v1883_v44  ;;  %2248 = vrsqrt.f32 %v3999_v12 }
 0x40e   :  { %v1832_v50 = vmul.f32 %v1764_v6, %v3496_v1  ;;  %1992 = vst [vmem:[#allocation10 + $0xc8] sm:$0xff] %v1960_v4  ;;  %v1624_v10 = vsel %vm1623_vm14, %v3957_v53, %v1620_v19  ;;  %vm1771_vm0 = vweird.f32 %v3946_v8  ;;  %vm1631_vm3 = vweird.f32 %v3983_v31 }
 0x40f   :  { %v1768_v26 = vmul.f32 0.5, %v1767_v23  ;;  %v1416_v20 = vpop.xlane.xlu2 %1415  ;;  %v1388_v60 = vpop.xlane.xlu0 %1387  ;;  %v1947_v46 = vmax.f32 %v1915_v39, 0.0  ;;  %v1818_v11 = vmul.f32 %v1624_v10, %v3493_v25  ;;  %vm1773_vm1 = vmor %vm1771_vm0, %vm1772_vm15  ;;  %vm1801_vm6 = vweird.f32 %v3999_v12 }
 0x410   :  { %v1865_v43 = vmul.f32 %v3556_v18, %v1832_v50  ;;  %v1450_v1 = vmul.f32 %v1416_v20, %v2556_v42  ;;  %v1436_v56 = vmul.f32 %v1388_v60, %v2556_v42 }
 0x411   :  { %v1769_v30 = vsub.f32 1.5, %v1768_v26  ;;  %1979 = vst [vmem:[#allocation10 + $0x60] sm:$0xff] %v1947_v46  ;;  %v1851_v16 = vmul.f32 %v3556_v18, %v1818_v11  ;;  %v2284_v46 = vld [vmem:[#allocation2 + $0x70] sm:$0xff] }
 0x412   :  { %v2247_v51 = vpop.eup %2246  ;;  %v1898_v53 = vadd.f32 %v3561_v41, %v1865_v43  ;;  %v4011_v25 = vadd.f32 1e-05, %v1450_v1  ;;  %v4014_v22 = vadd.f32 1e-05, %v1436_v56 }
 0x413   :  { %v1770_v0 = vmul.f32 %v2245_v21, %v1769_v30  ;;  %v1626_v54 = vmul.f32 %v2247_v51, %v3983_v31  ;;  %v1884_v14 = vadd.f32 %v3561_v41, %v1851_v16  ;;  %v2249_v13 = vpop.eup %2248  ;;  %vm1632_vm2 = vweird.f32 %v2247_v51 }
 0x414   :  { %v1930_v9 = vadd.f32 %v2281_v5, %v1898_v53  ;;  %2250 = vrsqrt.f32 %v4011_v25  ;;  %v1796_v28 = vmul.f32 %v2249_v13, %v3999_v12  ;;  %vm1633_vm4 = vmor %vm1631_vm3, %vm1632_vm2  ;;  %vm1802_vm5 = vweird.f32 %v2249_v13 }
 0x415   :  { %v1774_v49 = vsel %vm1773_vm1, %v2245_v21, %v1770_v0  ;;  %v1627_v62 = vmul.f32 %v2247_v51, %v1626_v54  ;;  %v1916_v29 = vadd.f32 %v2282_v35, %v1884_v14  ;;  %2252 = vrsqrt.f32 %v4014_v22  ;;  %vm1803_vm7 = vmor %vm1801_vm6, %vm1802_vm5  ;;  %v2285_v54 = vld [vmem:[#allocation2 + $0xf8] sm:$0xff] }
 0x416   :  { %v1962_v3 = vmax.f32 %v1930_v9, 0.0  ;;  %v1833_v8 = vmul.f32 %v1774_v49, %v3504_v7  ;;  %v1797_v63 = vmul.f32 %v2249_v13, %v1796_v28  ;;  %vm1781_vm10 = vweird.f32 %v4011_v25 }
 0x417   :  { %v1628_v36 = vmul.f32 0.5, %v1627_v62  ;;  %v1948_v61 = vmax.f32 %v1916_v29, 0.0  ;;  %v1418_v52 = vpop.xlane.xlu0 %1417  ;;  %vm1641_vm12 = vweird.f32 %v4014_v22 }
 0x418   :  { %1994 = vst [vmem:[#allocation10 + $0xd8] sm:$0xff] %v1962_v3  ;;  %v1866_v37 = vmul.f32 %v3556_v18, %v1833_v8  ;;  %v1451_v21 = vmul.f32 %v1418_v52, %v2556_v42  ;;  %v1798_v2 = vmul.f32 0.5, %v1797_v63  ;;  %v2286_v3 = vld [vmem:[#allocation2 + $0xe8] sm:$0xff]  ;;  %v2287_v8 = vld [vmem:[#allocation2 + $0x78] sm:$0xff]  ;;  %v2288_v63 = vld [vmem:[#allocation2 + $0xf0] sm:$0xff] }
 0x419   :  { %v1629_v48 = vsub.f32 1.5, %v1628_v36  ;;  %1980 = vst [vmem:[#allocation10 + $0x68] sm:$0xff] %v1948_v61 }
 0x41a   :  { %v1899_v33 = vadd.f32 %v3561_v41, %v1866_v37  ;;  %v2251_v34 = vpop.eup %2250  ;;  %v4024_v27 = vadd.f32 1e-05, %v1451_v21  ;;  %v1799_v47 = vsub.f32 1.5, %v1798_v2 }
 0x41b   :  { %v1630_v7 = vmul.f32 %v2247_v51, %v1629_v48  ;;  %v2253_v24 = vpop.eup %2252  ;;  %v1776_v45 = vmul.f32 %v2251_v34, %v4011_v25  ;;  %vm1782_vm8 = vweird.f32 %v2251_v34 }
 0x41c   :  { %v1931_v38 = vadd.f32 %v2283_v32, %v1899_v33  ;;  %v1636_v42 = vmul.f32 %v2253_v24, %v4014_v22  ;;  %2254 = vrsqrt.f32 %v4024_v27  ;;  %v1800_v31 = vmul.f32 %v2249_v13, %v1799_v47  ;;  %vm1783_vm11 = vmor %vm1781_vm10, %vm1782_vm8 }
 0x41d   :  { %v1634_v15 = vsel %vm1633_vm4, %v2247_v51, %v1630_v7  ;;  %v1777_v6 = vmul.f32 %v2251_v34, %v1776_v45  ;;  %vm1642_vm9 = vweird.f32 %v2253_v24  ;;  %vm1791_vm15 = vweird.f32 %v4024_v27 }
 0x41e   :  { %v1963_v44 = vmax.f32 %v1931_v38, 0.0  ;;  %v1819_v4 = vmul.f32 %v1634_v15, %v3511_v55  ;;  %v1637_v19 = vmul.f32 %v2253_v24, %v1636_v42  ;;  %v1804_v39 = vsel %vm1803_vm7, %v2249_v13, %v1800_v31  ;;  %vm1643_vm13 = vmor %vm1641_vm12, %vm1642_vm9 }
 0x41f   :  { %v1778_v59 = vmul.f32 0.5, %v1777_v6  ;;  %v1836_v26 = vmul.f32 %v1804_v39, %v3514_v58 }
 0x420   :  { %1995 = vst [vmem:[#allocation10 + $0xe0] sm:$0xff] %v1963_v44  ;;  %v1852_v23 = vmul.f32 %v3556_v18, %v1819_v4  ;;  %v1638_v50 = vmul.f32 0.5, %v1637_v19 }
 0x421   :  { %v1779_v20 = vsub.f32 1.5, %v1778_v59  ;;  %v1869_v12 = vmul.f32 %v3556_v18, %v1836_v26 }
 0x422   :  { %v1885_v10 = vadd.f32 %v3561_v41, %v1852_v23  ;;  %v1639_v55 = vsub.f32 1.5, %v1638_v50  ;;  %v2255_v60 = vpop.eup %2254 }
 0x423   :  { %v1780_v11 = vmul.f32 %v2251_v34, %v1779_v20  ;;  %v1786_v1 = vmul.f32 %v2255_v60, %v4024_v27  ;;  %v1902_v58 = vadd.f32 %v3561_v41, %v1869_v12  ;;  %vm1792_vm14 = vweird.f32 %v2255_v60 }
 0x424   :  { %v1917_v43 = vadd.f32 %v2284_v46, %v1885_v10  ;;  %v1640_v30 = vmul.f32 %v2253_v24, %v1639_v55  ;;  %vm1793_vm0 = vmor %vm1791_vm15, %vm1792_vm14 }
 0x425   :  { %v1784_v51 = vsel %vm1783_vm11, %v2251_v34, %v1780_v11  ;;  %v1787_v0 = vmul.f32 %v2255_v60, %v1786_v1  ;;  %v1934_v5 = vadd.f32 %v2285_v54, %v1902_v58 }
 0x426   :  { %v1949_v56 = vmax.f32 %v1917_v43, 0.0  ;;  %v1834_v53 = vmul.f32 %v1784_v51, %v3524_v17  ;;  %v1644_v16 = vsel %vm1643_vm13, %v2253_v24, %v1640_v30 }
 0x427   :  { %v1820_v25 = vmul.f32 %v1644_v16, %v3527_v40  ;;  %v1788_v14 = vmul.f32 0.5, %v1787_v0  ;;  %v1966_v22 = vmax.f32 %v1934_v5, 0.0 }
 0x428   :  { %1981 = vst [vmem:[#allocation10 + $0x70] sm:$0xff] %v1949_v56  ;;  %v1867_v9 = vmul.f32 %v3556_v18, %v1834_v53 }
 0x429   :  { %v1853_v49 = vmul.f32 %v3556_v18, %v1820_v25  ;;  %v1789_v13 = vsub.f32 1.5, %v1788_v14  ;;  %1998 = vst [vmem:[#allocation10 + $0xf8] sm:$0xff] %v1966_v22 }
 0x42a   :  { %v1900_v62 = vadd.f32 %v3561_v41, %v1867_v9 }
 0x42b   :  { %v1886_v17 = vadd.f32 %v3561_v41, %v1853_v49  ;;  %v1790_v29 = vmul.f32 %v2255_v60, %v1789_v13 }
 0x42c   :  { %v1932_v35 = vadd.f32 %v2286_v3, %v1900_v62 }
 0x42d   :  { %v1918_v40 = vadd.f32 %v2287_v8, %v1886_v17  ;;  %v1794_v28 = vsel %vm1793_vm0, %v2255_v60, %v1790_v29 }
 0x42e   :  { %v1964_v36 = vmax.f32 %v1932_v35, 0.0  ;;  %v1835_v37 = vmul.f32 %v1794_v28, %v3537_v57 }
 0x42f   :  { %v1950_v61 = vmax.f32 %v1918_v40, 0.0 }
 0x430   :  { %1996 = vst [vmem:[#allocation10 + $0xe8] sm:$0xff] %v1964_v36  ;;  %v1868_v52 = vmul.f32 %v3556_v18, %v1835_v37 }
 0x431   :  { %1982 = vst [vmem:[#allocation10 + $0x78] sm:$0xff] %v1950_v61 }
 0x432   :  { %v1901_v48 = vadd.f32 %v3561_v41, %v1868_v52 }
 0x434   :  { %v1933_v21 = vadd.f32 %v2288_v63, %v1901_v48 }
 0x436   :  { %v1965_v33 = vmax.f32 %v1933_v21, 0.0 }
 0x438   :  { %1997 = vst [vmem:[#allocation10 + $0xf0] sm:$0xff] %v1965_v33 }
 0x439   :  { %2011 = dma.vmem_to_hbm [thread:$0]  %s2004_s3, 4096, %s2006_s13, [#allocation4], %s2421_s27, %s2421_s27, %s2422_s28  }
 0x43a   :  { %2415 = dma.done.wait [#allocation4], 4096  }
 0x43b   :  { %2416 = vsyncadd [#allocation4], 4294963200 }
 0x43c   :  { %2016 = vsyncpa [#allocation3], 1 }
 0x43d   :  { %2017 = vsyncpa [#allocation6], 1 }
 0x43e   :  { %2018 = vsyncpa [#allocation9], 1 }
 0x43f   :  { %2019 = vsyncpa [#allocation4], 1 }

</bundles_post_ra>
